<compile_context>
chip_gen: v7x
topology: tpu7x:2x2x1
jax: 0.10.0
libtpu: 0.0.40
codegen_flags: <defaults>
</compile_context>

<pallas_src>
import jax
import jax.numpy as jnp
from jax import lax
from jax.experimental import pallas as pl
from jax.experimental.pallas import tpu as pltpu


def _decoder_kernel(enc_ref, ud_ref, fused_w_ref, wy_d_t_ref, wy_c_t_ref,
                    slab_ref, out_ref):
    """Full decoder forward for one batch shard (all T steps in one call)."""
    BB, T, M = enc_ref.shape
    P = fused_w_ref.shape[0]
    G = fused_w_ref.shape[1]          # M + 3P (fused matmul output width)

    # NOTE: the softmax over time and the context sum assume the block holds
    # the FULL T axis (block T == array T).  Do not tile T in the BlockSpec.

    enc = enc_ref[...]                                   # (BB, T, M)
    fused_w = fused_w_ref[...]                           # (P, M+3P) = [W_d^T | W_hh^T]

    # ---- Unpack the packed small-parameter slab (one (8,128) vreg) ---------
    slab = slab_ref[...]
    fused_b = slab[0:1, :G]                              # [W_d bias | GRU b_hh]
    wih_row = slab[1:2, :3 * P]                          # GRU W_ih (input dim 1)
    bih     = slab[2:3, :3 * P]                          # GRU b_ih
    vd_row  = slab[3:4, :M]                              # v_d weight
    wt_w    = slab[4:5, :M]                              # w_tilda weight
    wy_b    = slab[5:6, :P]                              # W_y bias
    vy_w    = slab[6:7, :P]                              # v_y weight
    wt_b    = slab[7:8, 0:1]                             # w_tilda bias (scalar)
    vy_b    = slab[7:8, 1:2]                             # v_y bias (scalar)

    # ---- Hoisted, time-invariant: y1 = U_d(encoded_inputs) -----------------
    # Batched 'btm,bnm->btn' (flash-attention-style dot_general: batch dim 0,
    # contract last dims) avoids any in-kernel (BB,T,M)<->(BB*T,M) reshape.
    ud_b = jnp.broadcast_to(ud_ref[...], (BB, M, M))     # hoisted once per call
    y1 = jnp.einsum("btm,bnm->btn", enc, ud_b,
                    preferred_element_type=jnp.float32)  # (BB, T, M)

    def step(_, carry):
        d, _c = carry
        # One fused MXU matmul per step: [x1 | gh] = d @ [W_d^T | W_hh^T] + b.
        fused = jnp.dot(d, fused_w,
                        preferred_element_type=jnp.float32) + fused_b  # (BB, M+3P)
        x1 = fused[:, :M]                                 # W_d(d_tm1) + b_d
        gh = fused[:, M:]                                 # W_hh(d_tm1) + b_hh

        # Attention scores + softmax over time.
        z1 = jnp.tanh(x1[:, None, :] + y1)                # (BB, T, M)
        l = jnp.sum(z1 * vd_row, axis=-1)                 # (BB, T)   v_d(z1)
        l = l - jnp.max(l, axis=1, keepdims=True)
        p = jnp.exp(l)
        s = jnp.sum(p, axis=1, keepdims=True)             # s >= 1 (max-subtracted)
        inv = pl.reciprocal(s, approx=True)
        inv = inv * (2.0 - s * inv)                       # Newton step -> f32 accuracy
        beta = p * inv                                    # (BB, T)

        # Context vector and GRU input.
        c = jnp.sum(beta[:, :, None] * enc, axis=1)       # (BB, M)
        yt = jnp.sum(c * wt_w, axis=-1, keepdims=True) + wt_b   # (BB, 1)

        # GRUCell(input_size=1, hidden_size=P), PyTorch gate order (r, z, n).
        # Input-side "matmul" is a broadcast multiply since input dim == 1.
        gi = yt * wih_row + bih                           # (BB, 3P)
        r  = jax.nn.sigmoid(gi[:, :P] + gh[:, :P])
        zg = jax.nn.sigmoid(gi[:, P:2 * P] + gh[:, P:2 * P])
        n  = jnp.tanh(gi[:, 2 * P:] + r * gh[:, 2 * P:])
        d_new = (1.0 - zg) * n + zg * d                   # (BB, P)
        return d_new, c

    d0 = jnp.zeros((BB, P), jnp.float32)
    c0 = jnp.zeros((BB, M), jnp.float32)
    d, c = lax.fori_loop(0, T, step, (d0, c0),
                         unroll=True if T <= 8 else 4)

    # ---- Head: y = v_y(W_y(concat(d, c)))  (concat avoided via split W_y) --
    wy = (jnp.dot(d, wy_d_t_ref[...], preferred_element_type=jnp.float32)
          + jnp.dot(c, wy_c_t_ref[...], preferred_element_type=jnp.float32)
          + wy_b)                                         # (BB, P)
    out_ref[...] = jnp.sum(wy * vy_w, axis=-1, keepdims=True) + vy_b   # (BB, 1)


def prepare_params(params):
    """One-time wrapper-side weight preprocessing (hoisted out of the call path)."""
    f32 = jnp.float32
    M = params["ud_w"].shape[0]
    P = params["gru_w_hh"].shape[1]
    G = M + 3 * P
    W = ((max(G, 2) + 127) // 128) * 128                  # lane-pad slab width

    fused_w = jnp.concatenate(
        [jnp.asarray(params["wd_w"], f32).T,              # (P, M)
         jnp.asarray(params["gru_w_hh"], f32).T],         # (P, 3P)
        axis=1)                                           # (P, M+3P)
    fused_b = jnp.concatenate(
        [jnp.asarray(params["wd_b"], f32).reshape(-1),
         jnp.asarray(params["gru_b_hh"], f32).reshape(-1)])  # (M+3P,)

    def row(v):
        v = jnp.asarray(v, f32).reshape(-1)
        return jnp.pad(v, (0, W - v.shape[0]))

    slab = jnp.stack([
        row(fused_b),                                     # 0: [W_d bias | b_hh]
        row(params["gru_w_ih"]),                          # 1: GRU W_ih (3P)
        row(params["gru_b_ih"]),                          # 2: GRU b_ih  (3P)
        row(params["vd_w"]),                              # 3: v_d       (M)
        row(params["wt_w"]),                              # 4: w_tilda w (M)
        row(params["wy_b"]),                              # 5: W_y bias  (P)
        row(params["vy_w"]),                              # 6: v_y       (P)
        row(jnp.concatenate([jnp.asarray(params["wt_b"], f32).reshape(-1),
                             jnp.asarray(params["vy_b"], f32).reshape(-1)])),
    ])                                                    # (8, W)

    wy_w = jnp.asarray(params["wy_w"], f32)               # (P, P+M)
    return {
        "ud_w": jnp.asarray(params["ud_w"], f32),         # (M, M), PyTorch layout
        "fused_w": fused_w,                               # (P, M+3P)
        "wy_d_t": wy_w[:, :P].T,                          # (P, P)
        "wy_c_t": wy_w[:, P:].T,                          # (M, P)
        "slab": slab,                                     # (8, W)
    }


def _pick_batch_block(B, batch_block=None):
    if batch_block is not None:
        assert B % batch_block == 0, "batch must be divisible by batch_block"
        return batch_block
    cap = min(B, 256)                                     # feed the MXU rows
    if B >= 16:
        cap = min(cap, B // 2)                            # >= 2 grid steps -> v7x 2-TC sharding
    candidates = [d for d in range(1, B + 1)
                  if B % d == 0 and d <= cap and (d == B or d % 8 == 0)]
    return max(candidates) if candidates else B


def temporal_attention_decoder(encoded_inputs, prepared, *, batch_block=None):
    """Pallas forward pass.  encoded_inputs: (B, T, M) f32 -> (B, 1) f32."""
    B, T, M = encoded_inputs.shape
    P = prepared["fused_w"].shape[0]
    G = prepared["fused_w"].shape[1]
    Wslab = prepared["slab"].shape[1]

    bb = _pick_batch_block(B, batch_block)
    grid = (B // bb,)

    const2 = lambda b: (0, 0)                             # grid-invariant weights
    in_specs = [
        # Full T in the block: the in-kernel softmax over time requires it.
        pl.BlockSpec((bb, T, M), lambda b: (b, 0, 0)),    # encoded_inputs shard
        pl.BlockSpec((M, M), const2),                     # U_d weight
        pl.BlockSpec((P, G), const2),                     # fused [W_d^T | W_hh^T]
        pl.BlockSpec((P, P), const2),                     # W_y^T (decoder half)
        pl.BlockSpec((M, P), const2),                     # W_y^T (context half)
        pl.BlockSpec((8, Wslab), const2),                 # packed small params
    ]

    return pl.pallas_call(
        _decoder_kernel,
        out_shape=jax.ShapeDtypeStruct((B, 1), jnp.float32),
        grid=grid,
        in_specs=in_specs,
        out_specs=pl.BlockSpec((bb, 1), lambda b: (b, 0)),
        compiler_params=pltpu.CompilerParams(
            # Batch shards are independent (recurrence is internal) -> parallel,
            # so on v7x the two TensorCores split the batch grid.
            dimension_semantics=("parallel",)),
    )(encoded_inputs, prepared["ud_w"], prepared["fused_w"],
      prepared["wy_d_t"], prepared["wy_c_t"], prepared["slab"])


def reference_forward(enc, params):
    """Pure-JAX replica of the PyTorch forward (for verification)."""
    B, T, M = enc.shape
    P = params["gru_w_hh"].shape[1]
    d = jnp.zeros((B, P), jnp.float32)
    c = jnp.zeros((B, M), jnp.float32)
    for _t in range(T):
        x1 = d @ params["wd_w"].T + params["wd_b"]                   # (B, M)
        y1 = jnp.einsum("btm,nm->btn", enc, params["ud_w"])          # (B, T, M)
        z1 = jnp.tanh(x1[:, None, :] + y1)
        l = jnp.einsum("btm,m->bt", z1, params["vd_w"][0])           # (B, T)
        beta = jax.nn.softmax(l, axis=1)
        c = jnp.sum(beta[:, :, None] * enc, axis=1)                  # (B, M)
        yt = c @ params["wt_w"].T + params["wt_b"]                   # (B, 1)
        gi = yt @ params["gru_w_ih"].T + params["gru_b_ih"]          # (B, 3P)
        gh = d @ params["gru_w_hh"].T + params["gru_b_hh"]           # (B, 3P)
        r = jax.nn.sigmoid(gi[:, :P] + gh[:, :P])
        zg = jax.nn.sigmoid(gi[:, P:2 * P] + gh[:, P:2 * P])
        n = jnp.tanh(gi[:, 2 * P:] + r * gh[:, 2 * P:])
        d = (1.0 - zg) * n + zg * d
    dc = jnp.concatenate([d, c], axis=1)                             # (B, P+M)
    wy = dc @ params["wy_w"].T + params["wy_b"]                      # (B, P)
    return wy @ params["vy_w"].T + params["vy_b"]                    # (B, 1)


def make_params(key, M, P, T):
    """Deterministic synthetic parameters (PyTorch-default-style uniform init)."""
    ks = jax.random.split(key, 14)

    def u(k, shape, fan):
        bound = 1.0 / float(fan) ** 0.5
        return jax.random.uniform(k, shape, jnp.float32, -bound, bound)

    return {
        "gru_w_ih": u(ks[0], (3 * P, 1), P),    # GRUCell weight_ih (input_size=1)
        "gru_w_hh": u(ks[1], (3 * P, P), P),    # GRUCell weight_hh
        "gru_b_ih": u(ks[2], (3 * P,), P),      # GRUCell bias_ih
        "gru_b_hh": u(ks[3], (3 * P,), P),      # GRUCell bias_hh
        "wd_w": u(ks[4], (M, P), P),            # W_d (Linear P->M) weight
        "wd_b": u(ks[5], (M,), P),              # W_d bias
        "ud_w": u(ks[6], (M, M), M),            # U_d (Linear M->M, no bias) weight
        "vd_w": u(ks[7], (1, M), M),            # v_d (Linear M->1, no bias) weight
        "wt_w": u(ks[8], (1, M), M),            # w_tilda (Linear M->1) weight
        "wt_b": u(ks[9], (1,), M),              # w_tilda bias
        "wy_w": u(ks[10], (P, P + M), P + M),   # W_y (Linear P+M->P) weight
        "wy_b": u(ks[11], (P,), P + M),         # W_y bias
        "vy_w": u(ks[12], (1, P), P),           # v_y (Linear P->1) weight
        "vy_b": u(ks[13], (1,), P),             # v_y bias
    }


if __name__ == "__main__":
    # Small demo shapes: B fills a full sublane group; T = sequence length,
    # M = encoder hidden, P = decoder hidden (M + 3P = 128 -> fused matmul
    # output is exactly one full vreg row of lanes).
    B, T, M, P = 8, 8, 32, 32

    key = jax.random.PRNGKey(0)
    pkey, xkey = jax.random.split(key)
    params = make_params(pkey, M, P, T)
    encoded_inputs = jax.random.normal(xkey, (B, T, M), jnp.float32)

    prepared = prepare_params(params)          # hoisted one-time preprocessing
    out = temporal_attention_decoder(encoded_inputs, prepared)
    out = jax.block_until_ready(out)

    ref = reference_forward(encoded_inputs, params)
    assert out.shape == (B, 1)
    assert jnp.allclose(out, ref, atol=1e-4, rtol=1e-4), (
        f"max abs diff = {jnp.max(jnp.abs(out - ref))}")

    print("KERNEL_OK")
</pallas_src>

<mosaic_0001>
module attributes {stable_mosaic.version = 11 : i64} {
  func.func @_decoder_kernel(%arg0: i32, %arg1: memref<8x8x32xf32, #tpu.memory_space<vmem>>, %arg2: memref<32x32xf32, #tpu.memory_space<vmem>>, %arg3: memref<32x128xf32, #tpu.memory_space<vmem>>, %arg4: memref<32x32xf32, #tpu.memory_space<vmem>>, %arg5: memref<32x32xf32, #tpu.memory_space<vmem>>, %arg6: memref<8x128xf32, #tpu.memory_space<vmem>>, %arg7: memref<8x1xf32, #tpu.memory_space<vmem>>) attributes {dimension_semantics = [#tpu.dimension_semantics<parallel>], iteration_bounds = array<i64: 1>, scalar_prefetch = 0 : i64, scratch_operands = 0 : i64, tpu.core_type = #tpu.core_type<tc>, window_params = [{transform_indices = @transform_0, window_bounds = array<i64: 8, 8, 32>}, {pipeline_mode = #tpu.pipeline_mode<synchronous>, transform_indices = @transform_1, window_bounds = array<i64: 32, 32>}, {pipeline_mode = #tpu.pipeline_mode<synchronous>, transform_indices = @transform_2, window_bounds = array<i64: 32, 128>}, {pipeline_mode = #tpu.pipeline_mode<synchronous>, transform_indices = @transform_3, window_bounds = array<i64: 32, 32>}, {pipeline_mode = #tpu.pipeline_mode<synchronous>, transform_indices = @transform_4, window_bounds = array<i64: 32, 32>}, {pipeline_mode = #tpu.pipeline_mode<synchronous>, transform_indices = @transform_5, window_bounds = array<i64: 8, 128>}, {transform_indices = @transform_6, window_bounds = array<i64: 8, 1>}]} {
    %c0 = arith.constant 0 : index
    %c0_0 = arith.constant 0 : index
    %c0_1 = arith.constant 0 : index
    %0 = vector.load %arg1[%c0, %c0_0, %c0_1] : memref<8x8x32xf32, #tpu.memory_space<vmem>>, vector<8x8x32xf32>
    %c0_2 = arith.constant 0 : index
    %c0_3 = arith.constant 0 : index
    %1 = vector.load %arg3[%c0_2, %c0_3] : memref<32x128xf32, #tpu.memory_space<vmem>>, vector<32x128xf32>
    %c0_4 = arith.constant 0 : index
    %c0_5 = arith.constant 0 : index
    %2 = vector.load %arg6[%c0_4, %c0_5] : memref<8x128xf32, #tpu.memory_space<vmem>>, vector<8x128xf32>
    %3 = vector.extract_strided_slice %2 {offsets = [0, 0], sizes = [1, 128], strides = [1, 1]} : vector<8x128xf32> to vector<1x128xf32>
    %4 = vector.extract_strided_slice %2 {offsets = [1, 0], sizes = [1, 96], strides = [1, 1]} : vector<8x128xf32> to vector<1x96xf32>
    %5 = vector.extract_strided_slice %2 {offsets = [2, 0], sizes = [1, 96], strides = [1, 1]} : vector<8x128xf32> to vector<1x96xf32>
    %6 = vector.extract_strided_slice %2 {offsets = [3, 0], sizes = [1, 32], strides = [1, 1]} : vector<8x128xf32> to vector<1x32xf32>
    %7 = vector.extract_strided_slice %2 {offsets = [4, 0], sizes = [1, 32], strides = [1, 1]} : vector<8x128xf32> to vector<1x32xf32>
    %8 = vector.extract_strided_slice %2 {offsets = [5, 0], sizes = [1, 32], strides = [1, 1]} : vector<8x128xf32> to vector<1x32xf32>
    %9 = vector.extract_strided_slice %2 {offsets = [6, 0], sizes = [1, 32], strides = [1, 1]} : vector<8x128xf32> to vector<1x32xf32>
    %10 = vector.extract_strided_slice %2 {offsets = [7, 0], sizes = [1, 1], strides = [1, 1]} : vector<8x128xf32> to vector<1x1xf32>
    %11 = vector.extract_strided_slice %2 {offsets = [7, 1], sizes = [1, 1], strides = [1, 1]} : vector<8x128xf32> to vector<1x1xf32>
    %c0_6 = arith.constant 0 : index
    %c0_7 = arith.constant 0 : index
    %12 = vector.load %arg2[%c0_6, %c0_7] : memref<32x32xf32, #tpu.memory_space<vmem>>, vector<32x32xf32>
    %13 = vector.shape_cast %12 : vector<32x32xf32> to vector<1x32x32xf32>
    %14 = vector.broadcast %13 : vector<1x32x32xf32> to vector<8x32x32xf32>
    "tpu.trace_start"() <{level = 10 : i32, message = "btm,bnm->btn"}> : () -> ()
    %cst = arith.constant dense<0.000000e+00> : vector<8x8x32xf32>
    %15 = tpu.matmul %0, %14, %cst {dimension_numbers = #tpu.dot_dimension_numbers<[2], [2], [1], [1], [0, 0, 0, 1, 1, 1], [0], [0]>} : vector<8x8x32xf32>, vector<8x32x32xf32>, vector<8x8x32xf32> -> vector<8x8x32xf32>
    %cst_8 = arith.constant 0.000000e+00 : f32
    "tpu.trace_stop"() : () -> ()
    %16 = vector.broadcast %cst_8 : f32 to vector<8x32xf32>
    %cst_9 = arith.constant 0.000000e+00 : f32
    %17 = vector.broadcast %cst_9 : f32 to vector<8x32xf32>
    %c0_i32 = arith.constant 0 : i32
    %cst_10 = arith.constant dense<0.000000e+00> : vector<8x128xf32>
    %18 = tpu.matmul %16, %1, %cst_10 {dimension_numbers = #tpu.dot_dimension_numbers<[1], [0], [0], [1], [0, 0, 1, 1], [], []>} : vector<8x32xf32>, vector<32x128xf32>, vector<8x128xf32> -> vector<8x128xf32>
    %19 = vector.broadcast %3 : vector<1x128xf32> to vector<8x128xf32>
    %20 = arith.addf %18, %19 : vector<8x128xf32>
    %21 = vector.extract_strided_slice %20 {offsets = [0, 0], sizes = [8, 32], strides = [1, 1]} : vector<8x128xf32> to vector<8x32xf32>
    %22 = vector.extract_strided_slice %20 {offsets = [0, 32], sizes = [8, 96], strides = [1, 1]} : vector<8x128xf32> to vector<8x96xf32>
    %23 = vector.shape_cast %21 : vector<8x32xf32> to vector<8x1x32xf32>
    %24 = vector.broadcast %23 : vector<8x1x32xf32> to vector<8x8x32xf32>
    %25 = arith.addf %24, %15 : vector<8x8x32xf32>
    %26 = math.tanh %25 : vector<8x8x32xf32>
    %27 = vector.shape_cast %6 : vector<1x32xf32> to vector<1x1x32xf32>
    %28 = vector.broadcast %27 : vector<1x1x32xf32> to vector<8x8x32xf32>
    %29 = arith.mulf %26, %28 : vector<8x8x32xf32>
    %cst_11 = arith.constant dense<0.000000e+00> : vector<8x8xf32>
    %30 = vector.multi_reduction <add>, %29, %cst_11 [2] : vector<8x8x32xf32> to vector<8x8xf32>
    %cst_12 = arith.constant dense<0xFF800000> : vector<8xf32>
    %31 = vector.multi_reduction <maximumf>, %30, %cst_12 [1] : vector<8x8xf32> to vector<8xf32>
    %32 = vector.shape_cast %31 : vector<8xf32> to vector<8x1xf32>
    %33 = vector.broadcast %32 : vector<8x1xf32> to vector<8x8xf32>
    %34 = arith.subf %30, %33 : vector<8x8xf32>
    %35 = math.exp %34 : vector<8x8xf32>
    %cst_13 = arith.constant dense<0.000000e+00> : vector<8xf32>
    %36 = vector.multi_reduction <add>, %35, %cst_13 [1] : vector<8x8xf32> to vector<8xf32>
    %37 = vector.shape_cast %36 : vector<8xf32> to vector<8x1xf32>
    %38 = tpu.reciprocal %37 {approx = true} : vector<8x1xf32> -> vector<8x1xf32>
    %39 = arith.mulf %37, %38 : vector<8x1xf32>
    %cst_14 = arith.constant 2.000000e+00 : f32
    %40 = vector.broadcast %cst_14 : f32 to vector<8x1xf32>
    %41 = arith.subf %40, %39 : vector<8x1xf32>
    %42 = arith.mulf %38, %41 : vector<8x1xf32>
    %43 = vector.broadcast %42 : vector<8x1xf32> to vector<8x8xf32>
    %44 = arith.mulf %35, %43 : vector<8x8xf32>
    %45 = vector.shape_cast %44 : vector<8x8xf32> to vector<8x8x1xf32>
    %46 = vector.broadcast %45 : vector<8x8x1xf32> to vector<8x8x32xf32>
    %47 = arith.mulf %46, %0 : vector<8x8x32xf32>
    %cst_15 = arith.constant dense<0.000000e+00> : vector<8x32xf32>
    %48 = vector.multi_reduction <add>, %47, %cst_15 [1] : vector<8x8x32xf32> to vector<8x32xf32>
    %49 = vector.broadcast %7 : vector<1x32xf32> to vector<8x32xf32>
    %50 = arith.mulf %48, %49 : vector<8x32xf32>
    %cst_16 = arith.constant dense<0.000000e+00> : vector<8xf32>
    %51 = vector.multi_reduction <add>, %50, %cst_16 [1] : vector<8x32xf32> to vector<8xf32>
    %52 = vector.shape_cast %51 : vector<8xf32> to vector<8x1xf32>
    %53 = vector.broadcast %10 : vector<1x1xf32> to vector<8x1xf32>
    %54 = arith.addf %52, %53 : vector<8x1xf32>
    %55 = vector.broadcast %54 : vector<8x1xf32> to vector<8x96xf32>
    %56 = vector.broadcast %4 : vector<1x96xf32> to vector<8x96xf32>
    %57 = arith.mulf %55, %56 : vector<8x96xf32>
    %58 = vector.broadcast %5 : vector<1x96xf32> to vector<8x96xf32>
    %59 = arith.addf %57, %58 : vector<8x96xf32>
    %60 = vector.extract_strided_slice %59 {offsets = [0, 0], sizes = [8, 32], strides = [1, 1]} : vector<8x96xf32> to vector<8x32xf32>
    %61 = vector.extract_strided_slice %22 {offsets = [0, 0], sizes = [8, 32], strides = [1, 1]} : vector<8x96xf32> to vector<8x32xf32>
    %62 = arith.addf %60, %61 : vector<8x32xf32>
    %63 = arith.negf %62 : vector<8x32xf32>
    %64 = math.exp %63 : vector<8x32xf32>
    %cst_17 = arith.constant 1.000000e+00 : f32
    %65 = vector.broadcast %cst_17 : f32 to vector<8x32xf32>
    %66 = arith.addf %65, %64 : vector<8x32xf32>
    %67 = arith.divf %65, %66 : vector<8x32xf32>
    %68 = vector.extract_strided_slice %59 {offsets = [0, 32], sizes = [8, 32], strides = [1, 1]} : vector<8x96xf32> to vector<8x32xf32>
    %69 = vector.extract_strided_slice %22 {offsets = [0, 32], sizes = [8, 32], strides = [1, 1]} : vector<8x96xf32> to vector<8x32xf32>
    %70 = arith.addf %68, %69 : vector<8x32xf32>
    %71 = arith.negf %70 : vector<8x32xf32>
    %72 = math.exp %71 : vector<8x32xf32>
    %cst_18 = arith.constant 1.000000e+00 : f32
    %73 = vector.broadcast %cst_18 : f32 to vector<8x32xf32>
    %74 = arith.addf %73, %72 : vector<8x32xf32>
    %75 = arith.divf %73, %74 : vector<8x32xf32>
    %76 = vector.extract_strided_slice %59 {offsets = [0, 64], sizes = [8, 32], strides = [1, 1]} : vector<8x96xf32> to vector<8x32xf32>
    %77 = vector.extract_strided_slice %22 {offsets = [0, 64], sizes = [8, 32], strides = [1, 1]} : vector<8x96xf32> to vector<8x32xf32>
    %78 = arith.mulf %67, %77 : vector<8x32xf32>
    %79 = arith.addf %76, %78 : vector<8x32xf32>
    %80 = math.tanh %79 : vector<8x32xf32>
    %cst_19 = arith.constant 1.000000e+00 : f32
    %81 = vector.broadcast %cst_19 : f32 to vector<8x32xf32>
    %82 = arith.subf %81, %75 : vector<8x32xf32>
    %83 = arith.mulf %82, %80 : vector<8x32xf32>
    %84 = arith.mulf %75, %16 : vector<8x32xf32>
    %85 = arith.addf %83, %84 : vector<8x32xf32>
    %c1_i32 = arith.constant 1 : i32
    %cst_20 = arith.constant dense<0.000000e+00> : vector<8x128xf32>
    %86 = tpu.matmul %85, %1, %cst_20 {dimension_numbers = #tpu.dot_dimension_numbers<[1], [0], [0], [1], [0, 0, 1, 1], [], []>} : vector<8x32xf32>, vector<32x128xf32>, vector<8x128xf32> -> vector<8x128xf32>
    %87 = vector.broadcast %3 : vector<1x128xf32> to vector<8x128xf32>
    %88 = arith.addf %86, %87 : vector<8x128xf32>
    %89 = vector.extract_strided_slice %88 {offsets = [0, 0], sizes = [8, 32], strides = [1, 1]} : vector<8x128xf32> to vector<8x32xf32>
    %90 = vector.extract_strided_slice %88 {offsets = [0, 32], sizes = [8, 96], strides = [1, 1]} : vector<8x128xf32> to vector<8x96xf32>
    %91 = vector.shape_cast %89 : vector<8x32xf32> to vector<8x1x32xf32>
    %92 = vector.broadcast %91 : vector<8x1x32xf32> to vector<8x8x32xf32>
    %93 = arith.addf %92, %15 : vector<8x8x32xf32>
    %94 = math.tanh %93 : vector<8x8x32xf32>
    %95 = vector.shape_cast %6 : vector<1x32xf32> to vector<1x1x32xf32>
    %96 = vector.broadcast %95 : vector<1x1x32xf32> to vector<8x8x32xf32>
    %97 = arith.mulf %94, %96 : vector<8x8x32xf32>
    %cst_21 = arith.constant dense<0.000000e+00> : vector<8x8xf32>
    %98 = vector.multi_reduction <add>, %97, %cst_21 [2] : vector<8x8x32xf32> to vector<8x8xf32>
    %cst_22 = arith.constant dense<0xFF800000> : vector<8xf32>
    %99 = vector.multi_reduction <maximumf>, %98, %cst_22 [1] : vector<8x8xf32> to vector<8xf32>
    %100 = vector.shape_cast %99 : vector<8xf32> to vector<8x1xf32>
    %101 = vector.broadcast %100 : vector<8x1xf32> to vector<8x8xf32>
    %102 = arith.subf %98, %101 : vector<8x8xf32>
    %103 = math.exp %102 : vector<8x8xf32>
    %cst_23 = arith.constant dense<0.000000e+00> : vector<8xf32>
    %104 = vector.multi_reduction <add>, %103, %cst_23 [1] : vector<8x8xf32> to vector<8xf32>
    %105 = vector.shape_cast %104 : vector<8xf32> to vector<8x1xf32>
    %106 = tpu.reciprocal %105 {approx = true} : vector<8x1xf32> -> vector<8x1xf32>
    %107 = arith.mulf %105, %106 : vector<8x1xf32>
    %cst_24 = arith.constant 2.000000e+00 : f32
    %108 = vector.broadcast %cst_24 : f32 to vector<8x1xf32>
    %109 = arith.subf %108, %107 : vector<8x1xf32>
    %110 = arith.mulf %106, %109 : vector<8x1xf32>
    %111 = vector.broadcast %110 : vector<8x1xf32> to vector<8x8xf32>
    %112 = arith.mulf %103, %111 : vector<8x8xf32>
    %113 = vector.shape_cast %112 : vector<8x8xf32> to vector<8x8x1xf32>
    %114 = vector.broadcast %113 : vector<8x8x1xf32> to vector<8x8x32xf32>
    %115 = arith.mulf %114, %0 : vector<8x8x32xf32>
    %cst_25 = arith.constant dense<0.000000e+00> : vector<8x32xf32>
    %116 = vector.multi_reduction <add>, %115, %cst_25 [1] : vector<8x8x32xf32> to vector<8x32xf32>
    %117 = vector.broadcast %7 : vector<1x32xf32> to vector<8x32xf32>
    %118 = arith.mulf %116, %117 : vector<8x32xf32>
    %cst_26 = arith.constant dense<0.000000e+00> : vector<8xf32>
    %119 = vector.multi_reduction <add>, %118, %cst_26 [1] : vector<8x32xf32> to vector<8xf32>
    %120 = vector.shape_cast %119 : vector<8xf32> to vector<8x1xf32>
    %121 = vector.broadcast %10 : vector<1x1xf32> to vector<8x1xf32>
    %122 = arith.addf %120, %121 : vector<8x1xf32>
    %123 = vector.broadcast %122 : vector<8x1xf32> to vector<8x96xf32>
    %124 = vector.broadcast %4 : vector<1x96xf32> to vector<8x96xf32>
    %125 = arith.mulf %123, %124 : vector<8x96xf32>
    %126 = vector.broadcast %5 : vector<1x96xf32> to vector<8x96xf32>
    %127 = arith.addf %125, %126 : vector<8x96xf32>
    %128 = vector.extract_strided_slice %127 {offsets = [0, 0], sizes = [8, 32], strides = [1, 1]} : vector<8x96xf32> to vector<8x32xf32>
    %129 = vector.extract_strided_slice %90 {offsets = [0, 0], sizes = [8, 32], strides = [1, 1]} : vector<8x96xf32> to vector<8x32xf32>
    %130 = arith.addf %128, %129 : vector<8x32xf32>
    %131 = arith.negf %130 : vector<8x32xf32>
    %132 = math.exp %131 : vector<8x32xf32>
    %cst_27 = arith.constant 1.000000e+00 : f32
    %133 = vector.broadcast %cst_27 : f32 to vector<8x32xf32>
    %134 = arith.addf %133, %132 : vector<8x32xf32>
    %135 = arith.divf %133, %134 : vector<8x32xf32>
    %136 = vector.extract_strided_slice %127 {offsets = [0, 32], sizes = [8, 32], strides = [1, 1]} : vector<8x96xf32> to vector<8x32xf32>
    %137 = vector.extract_strided_slice %90 {offsets = [0, 32], sizes = [8, 32], strides = [1, 1]} : vector<8x96xf32> to vector<8x32xf32>
    %138 = arith.addf %136, %137 : vector<8x32xf32>
    %139 = arith.negf %138 : vector<8x32xf32>
    %140 = math.exp %139 : vector<8x32xf32>
    %cst_28 = arith.constant 1.000000e+00 : f32
    %141 = vector.broadcast %cst_28 : f32 to vector<8x32xf32>
    %142 = arith.addf %141, %140 : vector<8x32xf32>
    %143 = arith.divf %141, %142 : vector<8x32xf32>
    %144 = vector.extract_strided_slice %127 {offsets = [0, 64], sizes = [8, 32], strides = [1, 1]} : vector<8x96xf32> to vector<8x32xf32>
    %145 = vector.extract_strided_slice %90 {offsets = [0, 64], sizes = [8, 32], strides = [1, 1]} : vector<8x96xf32> to vector<8x32xf32>
    %146 = arith.mulf %135, %145 : vector<8x32xf32>
    %147 = arith.addf %144, %146 : vector<8x32xf32>
    %148 = math.tanh %147 : vector<8x32xf32>
    %cst_29 = arith.constant 1.000000e+00 : f32
    %149 = vector.broadcast %cst_29 : f32 to vector<8x32xf32>
    %150 = arith.subf %149, %143 : vector<8x32xf32>
    %151 = arith.mulf %150, %148 : vector<8x32xf32>
    %152 = arith.mulf %143, %85 : vector<8x32xf32>
    %153 = arith.addf %151, %152 : vector<8x32xf32>
    %c2_i32 = arith.constant 2 : i32
    %cst_30 = arith.constant dense<0.000000e+00> : vector<8x128xf32>
    %154 = tpu.matmul %153, %1, %cst_30 {dimension_numbers = #tpu.dot_dimension_numbers<[1], [0], [0], [1], [0, 0, 1, 1], [], []>} : vector<8x32xf32>, vector<32x128xf32>, vector<8x128xf32> -> vector<8x128xf32>
    %155 = vector.broadcast %3 : vector<1x128xf32> to vector<8x128xf32>
    %156 = arith.addf %154, %155 : vector<8x128xf32>
    %157 = vector.extract_strided_slice %156 {offsets = [0, 0], sizes = [8, 32], strides = [1, 1]} : vector<8x128xf32> to vector<8x32xf32>
    %158 = vector.extract_strided_slice %156 {offsets = [0, 32], sizes = [8, 96], strides = [1, 1]} : vector<8x128xf32> to vector<8x96xf32>
    %159 = vector.shape_cast %157 : vector<8x32xf32> to vector<8x1x32xf32>
    %160 = vector.broadcast %159 : vector<8x1x32xf32> to vector<8x8x32xf32>
    %161 = arith.addf %160, %15 : vector<8x8x32xf32>
    %162 = math.tanh %161 : vector<8x8x32xf32>
    %163 = vector.shape_cast %6 : vector<1x32xf32> to vector<1x1x32xf32>
    %164 = vector.broadcast %163 : vector<1x1x32xf32> to vector<8x8x32xf32>
    %165 = arith.mulf %162, %164 : vector<8x8x32xf32>
    %cst_31 = arith.constant dense<0.000000e+00> : vector<8x8xf32>
    %166 = vector.multi_reduction <add>, %165, %cst_31 [2] : vector<8x8x32xf32> to vector<8x8xf32>
    %cst_32 = arith.constant dense<0xFF800000> : vector<8xf32>
    %167 = vector.multi_reduction <maximumf>, %166, %cst_32 [1] : vector<8x8xf32> to vector<8xf32>
    %168 = vector.shape_cast %167 : vector<8xf32> to vector<8x1xf32>
    %169 = vector.broadcast %168 : vector<8x1xf32> to vector<8x8xf32>
    %170 = arith.subf %166, %169 : vector<8x8xf32>
    %171 = math.exp %170 : vector<8x8xf32>
    %cst_33 = arith.constant dense<0.000000e+00> : vector<8xf32>
    %172 = vector.multi_reduction <add>, %171, %cst_33 [1] : vector<8x8xf32> to vector<8xf32>
    %173 = vector.shape_cast %172 : vector<8xf32> to vector<8x1xf32>
    %174 = tpu.reciprocal %173 {approx = true} : vector<8x1xf32> -> vector<8x1xf32>
    %175 = arith.mulf %173, %174 : vector<8x1xf32>
    %cst_34 = arith.constant 2.000000e+00 : f32
    %176 = vector.broadcast %cst_34 : f32 to vector<8x1xf32>
    %177 = arith.subf %176, %175 : vector<8x1xf32>
    %178 = arith.mulf %174, %177 : vector<8x1xf32>
    %179 = vector.broadcast %178 : vector<8x1xf32> to vector<8x8xf32>
    %180 = arith.mulf %171, %179 : vector<8x8xf32>
    %181 = vector.shape_cast %180 : vector<8x8xf32> to vector<8x8x1xf32>
    %182 = vector.broadcast %181 : vector<8x8x1xf32> to vector<8x8x32xf32>
    %183 = arith.mulf %182, %0 : vector<8x8x32xf32>
    %cst_35 = arith.constant dense<0.000000e+00> : vector<8x32xf32>
    %184 = vector.multi_reduction <add>, %183, %cst_35 [1] : vector<8x8x32xf32> to vector<8x32xf32>
    %185 = vector.broadcast %7 : vector<1x32xf32> to vector<8x32xf32>
    %186 = arith.mulf %184, %185 : vector<8x32xf32>
    %cst_36 = arith.constant dense<0.000000e+00> : vector<8xf32>
    %187 = vector.multi_reduction <add>, %186, %cst_36 [1] : vector<8x32xf32> to vector<8xf32>
    %188 = vector.shape_cast %187 : vector<8xf32> to vector<8x1xf32>
    %189 = vector.broadcast %10 : vector<1x1xf32> to vector<8x1xf32>
    %190 = arith.addf %188, %189 : vector<8x1xf32>
    %191 = vector.broadcast %190 : vector<8x1xf32> to vector<8x96xf32>
    %192 = vector.broadcast %4 : vector<1x96xf32> to vector<8x96xf32>
    %193 = arith.mulf %191, %192 : vector<8x96xf32>
    %194 = vector.broadcast %5 : vector<1x96xf32> to vector<8x96xf32>
    %195 = arith.addf %193, %194 : vector<8x96xf32>
    %196 = vector.extract_strided_slice %195 {offsets = [0, 0], sizes = [8, 32], strides = [1, 1]} : vector<8x96xf32> to vector<8x32xf32>
    %197 = vector.extract_strided_slice %158 {offsets = [0, 0], sizes = [8, 32], strides = [1, 1]} : vector<8x96xf32> to vector<8x32xf32>
    %198 = arith.addf %196, %197 : vector<8x32xf32>
    %199 = arith.negf %198 : vector<8x32xf32>
    %200 = math.exp %199 : vector<8x32xf32>
    %cst_37 = arith.constant 1.000000e+00 : f32
    %201 = vector.broadcast %cst_37 : f32 to vector<8x32xf32>
    %202 = arith.addf %201, %200 : vector<8x32xf32>
    %203 = arith.divf %201, %202 : vector<8x32xf32>
    %204 = vector.extract_strided_slice %195 {offsets = [0, 32], sizes = [8, 32], strides = [1, 1]} : vector<8x96xf32> to vector<8x32xf32>
    %205 = vector.extract_strided_slice %158 {offsets = [0, 32], sizes = [8, 32], strides = [1, 1]} : vector<8x96xf32> to vector<8x32xf32>
    %206 = arith.addf %204, %205 : vector<8x32xf32>
    %207 = arith.negf %206 : vector<8x32xf32>
    %208 = math.exp %207 : vector<8x32xf32>
    %cst_38 = arith.constant 1.000000e+00 : f32
    %209 = vector.broadcast %cst_38 : f32 to vector<8x32xf32>
    %210 = arith.addf %209, %208 : vector<8x32xf32>
    %211 = arith.divf %209, %210 : vector<8x32xf32>
    %212 = vector.extract_strided_slice %195 {offsets = [0, 64], sizes = [8, 32], strides = [1, 1]} : vector<8x96xf32> to vector<8x32xf32>
    %213 = vector.extract_strided_slice %158 {offsets = [0, 64], sizes = [8, 32], strides = [1, 1]} : vector<8x96xf32> to vector<8x32xf32>
    %214 = arith.mulf %203, %213 : vector<8x32xf32>
    %215 = arith.addf %212, %214 : vector<8x32xf32>
    %216 = math.tanh %215 : vector<8x32xf32>
    %cst_39 = arith.constant 1.000000e+00 : f32
    %217 = vector.broadcast %cst_39 : f32 to vector<8x32xf32>
    %218 = arith.subf %217, %211 : vector<8x32xf32>
    %219 = arith.mulf %218, %216 : vector<8x32xf32>
    %220 = arith.mulf %211, %153 : vector<8x32xf32>
    %221 = arith.addf %219, %220 : vector<8x32xf32>
    %c3_i32 = arith.constant 3 : i32
    %cst_40 = arith.constant dense<0.000000e+00> : vector<8x128xf32>
    %222 = tpu.matmul %221, %1, %cst_40 {dimension_numbers = #tpu.dot_dimension_numbers<[1], [0], [0], [1], [0, 0, 1, 1], [], []>} : vector<8x32xf32>, vector<32x128xf32>, vector<8x128xf32> -> vector<8x128xf32>
    %223 = vector.broadcast %3 : vector<1x128xf32> to vector<8x128xf32>
    %224 = arith.addf %222, %223 : vector<8x128xf32>
    %225 = vector.extract_strided_slice %224 {offsets = [0, 0], sizes = [8, 32], strides = [1, 1]} : vector<8x128xf32> to vector<8x32xf32>
    %226 = vector.extract_strided_slice %224 {offsets = [0, 32], sizes = [8, 96], strides = [1, 1]} : vector<8x128xf32> to vector<8x96xf32>
    %227 = vector.shape_cast %225 : vector<8x32xf32> to vector<8x1x32xf32>
    %228 = vector.broadcast %227 : vector<8x1x32xf32> to vector<8x8x32xf32>
    %229 = arith.addf %228, %15 : vector<8x8x32xf32>
    %230 = math.tanh %229 : vector<8x8x32xf32>
    %231 = vector.shape_cast %6 : vector<1x32xf32> to vector<1x1x32xf32>
    %232 = vector.broadcast %231 : vector<1x1x32xf32> to vector<8x8x32xf32>
    %233 = arith.mulf %230, %232 : vector<8x8x32xf32>
    %cst_41 = arith.constant dense<0.000000e+00> : vector<8x8xf32>
    %234 = vector.multi_reduction <add>, %233, %cst_41 [2] : vector<8x8x32xf32> to vector<8x8xf32>
    %cst_42 = arith.constant dense<0xFF800000> : vector<8xf32>
    %235 = vector.multi_reduction <maximumf>, %234, %cst_42 [1] : vector<8x8xf32> to vector<8xf32>
    %236 = vector.shape_cast %235 : vector<8xf32> to vector<8x1xf32>
    %237 = vector.broadcast %236 : vector<8x1xf32> to vector<8x8xf32>
    %238 = arith.subf %234, %237 : vector<8x8xf32>
    %239 = math.exp %238 : vector<8x8xf32>
    %cst_43 = arith.constant dense<0.000000e+00> : vector<8xf32>
    %240 = vector.multi_reduction <add>, %239, %cst_43 [1] : vector<8x8xf32> to vector<8xf32>
    %241 = vector.shape_cast %240 : vector<8xf32> to vector<8x1xf32>
    %242 = tpu.reciprocal %241 {approx = true} : vector<8x1xf32> -> vector<8x1xf32>
    %243 = arith.mulf %241, %242 : vector<8x1xf32>
    %cst_44 = arith.constant 2.000000e+00 : f32
    %244 = vector.broadcast %cst_44 : f32 to vector<8x1xf32>
    %245 = arith.subf %244, %243 : vector<8x1xf32>
    %246 = arith.mulf %242, %245 : vector<8x1xf32>
    %247 = vector.broadcast %246 : vector<8x1xf32> to vector<8x8xf32>
    %248 = arith.mulf %239, %247 : vector<8x8xf32>
    %249 = vector.shape_cast %248 : vector<8x8xf32> to vector<8x8x1xf32>
    %250 = vector.broadcast %249 : vector<8x8x1xf32> to vector<8x8x32xf32>
    %251 = arith.mulf %250, %0 : vector<8x8x32xf32>
    %cst_45 = arith.constant dense<0.000000e+00> : vector<8x32xf32>
    %252 = vector.multi_reduction <add>, %251, %cst_45 [1] : vector<8x8x32xf32> to vector<8x32xf32>
    %253 = vector.broadcast %7 : vector<1x32xf32> to vector<8x32xf32>
    %254 = arith.mulf %252, %253 : vector<8x32xf32>
    %cst_46 = arith.constant dense<0.000000e+00> : vector<8xf32>
    %255 = vector.multi_reduction <add>, %254, %cst_46 [1] : vector<8x32xf32> to vector<8xf32>
    %256 = vector.shape_cast %255 : vector<8xf32> to vector<8x1xf32>
    %257 = vector.broadcast %10 : vector<1x1xf32> to vector<8x1xf32>
    %258 = arith.addf %256, %257 : vector<8x1xf32>
    %259 = vector.broadcast %258 : vector<8x1xf32> to vector<8x96xf32>
    %260 = vector.broadcast %4 : vector<1x96xf32> to vector<8x96xf32>
    %261 = arith.mulf %259, %260 : vector<8x96xf32>
    %262 = vector.broadcast %5 : vector<1x96xf32> to vector<8x96xf32>
    %263 = arith.addf %261, %262 : vector<8x96xf32>
    %264 = vector.extract_strided_slice %263 {offsets = [0, 0], sizes = [8, 32], strides = [1, 1]} : vector<8x96xf32> to vector<8x32xf32>
    %265 = vector.extract_strided_slice %226 {offsets = [0, 0], sizes = [8, 32], strides = [1, 1]} : vector<8x96xf32> to vector<8x32xf32>
    %266 = arith.addf %264, %265 : vector<8x32xf32>
    %267 = arith.negf %266 : vector<8x32xf32>
    %268 = math.exp %267 : vector<8x32xf32>
    %cst_47 = arith.constant 1.000000e+00 : f32
    %269 = vector.broadcast %cst_47 : f32 to vector<8x32xf32>
    %270 = arith.addf %269, %268 : vector<8x32xf32>
    %271 = arith.divf %269, %270 : vector<8x32xf32>
    %272 = vector.extract_strided_slice %263 {offsets = [0, 32], sizes = [8, 32], strides = [1, 1]} : vector<8x96xf32> to vector<8x32xf32>
    %273 = vector.extract_strided_slice %226 {offsets = [0, 32], sizes = [8, 32], strides = [1, 1]} : vector<8x96xf32> to vector<8x32xf32>
    %274 = arith.addf %272, %273 : vector<8x32xf32>
    %275 = arith.negf %274 : vector<8x32xf32>
    %276 = math.exp %275 : vector<8x32xf32>
    %cst_48 = arith.constant 1.000000e+00 : f32
    %277 = vector.broadcast %cst_48 : f32 to vector<8x32xf32>
    %278 = arith.addf %277, %276 : vector<8x32xf32>
    %279 = arith.divf %277, %278 : vector<8x32xf32>
    %280 = vector.extract_strided_slice %263 {offsets = [0, 64], sizes = [8, 32], strides = [1, 1]} : vector<8x96xf32> to vector<8x32xf32>
    %281 = vector.extract_strided_slice %226 {offsets = [0, 64], sizes = [8, 32], strides = [1, 1]} : vector<8x96xf32> to vector<8x32xf32>
    %282 = arith.mulf %271, %281 : vector<8x32xf32>
    %283 = arith.addf %280, %282 : vector<8x32xf32>
    %284 = math.tanh %283 : vector<8x32xf32>
    %cst_49 = arith.constant 1.000000e+00 : f32
    %285 = vector.broadcast %cst_49 : f32 to vector<8x32xf32>
    %286 = arith.subf %285, %279 : vector<8x32xf32>
    %287 = arith.mulf %286, %284 : vector<8x32xf32>
    %288 = arith.mulf %279, %221 : vector<8x32xf32>
    %289 = arith.addf %287, %288 : vector<8x32xf32>
    %c4_i32 = arith.constant 4 : i32
    %cst_50 = arith.constant dense<0.000000e+00> : vector<8x128xf32>
    %290 = tpu.matmul %289, %1, %cst_50 {dimension_numbers = #tpu.dot_dimension_numbers<[1], [0], [0], [1], [0, 0, 1, 1], [], []>} : vector<8x32xf32>, vector<32x128xf32>, vector<8x128xf32> -> vector<8x128xf32>
    %291 = vector.broadcast %3 : vector<1x128xf32> to vector<8x128xf32>
    %292 = arith.addf %290, %291 : vector<8x128xf32>
    %293 = vector.extract_strided_slice %292 {offsets = [0, 0], sizes = [8, 32], strides = [1, 1]} : vector<8x128xf32> to vector<8x32xf32>
    %294 = vector.extract_strided_slice %292 {offsets = [0, 32], sizes = [8, 96], strides = [1, 1]} : vector<8x128xf32> to vector<8x96xf32>
    %295 = vector.shape_cast %293 : vector<8x32xf32> to vector<8x1x32xf32>
    %296 = vector.broadcast %295 : vector<8x1x32xf32> to vector<8x8x32xf32>
    %297 = arith.addf %296, %15 : vector<8x8x32xf32>
    %298 = math.tanh %297 : vector<8x8x32xf32>
    %299 = vector.shape_cast %6 : vector<1x32xf32> to vector<1x1x32xf32>
    %300 = vector.broadcast %299 : vector<1x1x32xf32> to vector<8x8x32xf32>
    %301 = arith.mulf %298, %300 : vector<8x8x32xf32>
    %cst_51 = arith.constant dense<0.000000e+00> : vector<8x8xf32>
    %302 = vector.multi_reduction <add>, %301, %cst_51 [2] : vector<8x8x32xf32> to vector<8x8xf32>
    %cst_52 = arith.constant dense<0xFF800000> : vector<8xf32>
    %303 = vector.multi_reduction <maximumf>, %302, %cst_52 [1] : vector<8x8xf32> to vector<8xf32>
    %304 = vector.shape_cast %303 : vector<8xf32> to vector<8x1xf32>
    %305 = vector.broadcast %304 : vector<8x1xf32> to vector<8x8xf32>
    %306 = arith.subf %302, %305 : vector<8x8xf32>
    %307 = math.exp %306 : vector<8x8xf32>
    %cst_53 = arith.constant dense<0.000000e+00> : vector<8xf32>
    %308 = vector.multi_reduction <add>, %307, %cst_53 [1] : vector<8x8xf32> to vector<8xf32>
    %309 = vector.shape_cast %308 : vector<8xf32> to vector<8x1xf32>
    %310 = tpu.reciprocal %309 {approx = true} : vector<8x1xf32> -> vector<8x1xf32>
    %311 = arith.mulf %309, %310 : vector<8x1xf32>
    %cst_54 = arith.constant 2.000000e+00 : f32
    %312 = vector.broadcast %cst_54 : f32 to vector<8x1xf32>
    %313 = arith.subf %312, %311 : vector<8x1xf32>
    %314 = arith.mulf %310, %313 : vector<8x1xf32>
    %315 = vector.broadcast %314 : vector<8x1xf32> to vector<8x8xf32>
    %316 = arith.mulf %307, %315 : vector<8x8xf32>
    %317 = vector.shape_cast %316 : vector<8x8xf32> to vector<8x8x1xf32>
    %318 = vector.broadcast %317 : vector<8x8x1xf32> to vector<8x8x32xf32>
    %319 = arith.mulf %318, %0 : vector<8x8x32xf32>
    %cst_55 = arith.constant dense<0.000000e+00> : vector<8x32xf32>
    %320 = vector.multi_reduction <add>, %319, %cst_55 [1] : vector<8x8x32xf32> to vector<8x32xf32>
    %321 = vector.broadcast %7 : vector<1x32xf32> to vector<8x32xf32>
    %322 = arith.mulf %320, %321 : vector<8x32xf32>
    %cst_56 = arith.constant dense<0.000000e+00> : vector<8xf32>
    %323 = vector.multi_reduction <add>, %322, %cst_56 [1] : vector<8x32xf32> to vector<8xf32>
    %324 = vector.shape_cast %323 : vector<8xf32> to vector<8x1xf32>
    %325 = vector.broadcast %10 : vector<1x1xf32> to vector<8x1xf32>
    %326 = arith.addf %324, %325 : vector<8x1xf32>
    %327 = vector.broadcast %326 : vector<8x1xf32> to vector<8x96xf32>
    %328 = vector.broadcast %4 : vector<1x96xf32> to vector<8x96xf32>
    %329 = arith.mulf %327, %328 : vector<8x96xf32>
    %330 = vector.broadcast %5 : vector<1x96xf32> to vector<8x96xf32>
    %331 = arith.addf %329, %330 : vector<8x96xf32>
    %332 = vector.extract_strided_slice %331 {offsets = [0, 0], sizes = [8, 32], strides = [1, 1]} : vector<8x96xf32> to vector<8x32xf32>
    %333 = vector.extract_strided_slice %294 {offsets = [0, 0], sizes = [8, 32], strides = [1, 1]} : vector<8x96xf32> to vector<8x32xf32>
    %334 = arith.addf %332, %333 : vector<8x32xf32>
    %335 = arith.negf %334 : vector<8x32xf32>
    %336 = math.exp %335 : vector<8x32xf32>
    %cst_57 = arith.constant 1.000000e+00 : f32
    %337 = vector.broadcast %cst_57 : f32 to vector<8x32xf32>
    %338 = arith.addf %337, %336 : vector<8x32xf32>
    %339 = arith.divf %337, %338 : vector<8x32xf32>
    %340 = vector.extract_strided_slice %331 {offsets = [0, 32], sizes = [8, 32], strides = [1, 1]} : vector<8x96xf32> to vector<8x32xf32>
    %341 = vector.extract_strided_slice %294 {offsets = [0, 32], sizes = [8, 32], strides = [1, 1]} : vector<8x96xf32> to vector<8x32xf32>
    %342 = arith.addf %340, %341 : vector<8x32xf32>
    %343 = arith.negf %342 : vector<8x32xf32>
    %344 = math.exp %343 : vector<8x32xf32>
    %cst_58 = arith.constant 1.000000e+00 : f32
    %345 = vector.broadcast %cst_58 : f32 to vector<8x32xf32>
    %346 = arith.addf %345, %344 : vector<8x32xf32>
    %347 = arith.divf %345, %346 : vector<8x32xf32>
    %348 = vector.extract_strided_slice %331 {offsets = [0, 64], sizes = [8, 32], strides = [1, 1]} : vector<8x96xf32> to vector<8x32xf32>
    %349 = vector.extract_strided_slice %294 {offsets = [0, 64], sizes = [8, 32], strides = [1, 1]} : vector<8x96xf32> to vector<8x32xf32>
    %350 = arith.mulf %339, %349 : vector<8x32xf32>
    %351 = arith.addf %348, %350 : vector<8x32xf32>
    %352 = math.tanh %351 : vector<8x32xf32>
    %cst_59 = arith.constant 1.000000e+00 : f32
    %353 = vector.broadcast %cst_59 : f32 to vector<8x32xf32>
    %354 = arith.subf %353, %347 : vector<8x32xf32>
    %355 = arith.mulf %354, %352 : vector<8x32xf32>
    %356 = arith.mulf %347, %289 : vector<8x32xf32>
    %357 = arith.addf %355, %356 : vector<8x32xf32>
    %c5_i32 = arith.constant 5 : i32
    %cst_60 = arith.constant dense<0.000000e+00> : vector<8x128xf32>
    %358 = tpu.matmul %357, %1, %cst_60 {dimension_numbers = #tpu.dot_dimension_numbers<[1], [0], [0], [1], [0, 0, 1, 1], [], []>} : vector<8x32xf32>, vector<32x128xf32>, vector<8x128xf32> -> vector<8x128xf32>
    %359 = vector.broadcast %3 : vector<1x128xf32> to vector<8x128xf32>
    %360 = arith.addf %358, %359 : vector<8x128xf32>
    %361 = vector.extract_strided_slice %360 {offsets = [0, 0], sizes = [8, 32], strides = [1, 1]} : vector<8x128xf32> to vector<8x32xf32>
    %362 = vector.extract_strided_slice %360 {offsets = [0, 32], sizes = [8, 96], strides = [1, 1]} : vector<8x128xf32> to vector<8x96xf32>
    %363 = vector.shape_cast %361 : vector<8x32xf32> to vector<8x1x32xf32>
    %364 = vector.broadcast %363 : vector<8x1x32xf32> to vector<8x8x32xf32>
    %365 = arith.addf %364, %15 : vector<8x8x32xf32>
    %366 = math.tanh %365 : vector<8x8x32xf32>
    %367 = vector.shape_cast %6 : vector<1x32xf32> to vector<1x1x32xf32>
    %368 = vector.broadcast %367 : vector<1x1x32xf32> to vector<8x8x32xf32>
    %369 = arith.mulf %366, %368 : vector<8x8x32xf32>
    %cst_61 = arith.constant dense<0.000000e+00> : vector<8x8xf32>
    %370 = vector.multi_reduction <add>, %369, %cst_61 [2] : vector<8x8x32xf32> to vector<8x8xf32>
    %cst_62 = arith.constant dense<0xFF800000> : vector<8xf32>
    %371 = vector.multi_reduction <maximumf>, %370, %cst_62 [1] : vector<8x8xf32> to vector<8xf32>
    %372 = vector.shape_cast %371 : vector<8xf32> to vector<8x1xf32>
    %373 = vector.broadcast %372 : vector<8x1xf32> to vector<8x8xf32>
    %374 = arith.subf %370, %373 : vector<8x8xf32>
    %375 = math.exp %374 : vector<8x8xf32>
    %cst_63 = arith.constant dense<0.000000e+00> : vector<8xf32>
    %376 = vector.multi_reduction <add>, %375, %cst_63 [1] : vector<8x8xf32> to vector<8xf32>
    %377 = vector.shape_cast %376 : vector<8xf32> to vector<8x1xf32>
    %378 = tpu.reciprocal %377 {approx = true} : vector<8x1xf32> -> vector<8x1xf32>
    %379 = arith.mulf %377, %378 : vector<8x1xf32>
    %cst_64 = arith.constant 2.000000e+00 : f32
    %380 = vector.broadcast %cst_64 : f32 to vector<8x1xf32>
    %381 = arith.subf %380, %379 : vector<8x1xf32>
    %382 = arith.mulf %378, %381 : vector<8x1xf32>
    %383 = vector.broadcast %382 : vector<8x1xf32> to vector<8x8xf32>
    %384 = arith.mulf %375, %383 : vector<8x8xf32>
    %385 = vector.shape_cast %384 : vector<8x8xf32> to vector<8x8x1xf32>
    %386 = vector.broadcast %385 : vector<8x8x1xf32> to vector<8x8x32xf32>
    %387 = arith.mulf %386, %0 : vector<8x8x32xf32>
    %cst_65 = arith.constant dense<0.000000e+00> : vector<8x32xf32>
    %388 = vector.multi_reduction <add>, %387, %cst_65 [1] : vector<8x8x32xf32> to vector<8x32xf32>
    %389 = vector.broadcast %7 : vector<1x32xf32> to vector<8x32xf32>
    %390 = arith.mulf %388, %389 : vector<8x32xf32>
    %cst_66 = arith.constant dense<0.000000e+00> : vector<8xf32>
    %391 = vector.multi_reduction <add>, %390, %cst_66 [1] : vector<8x32xf32> to vector<8xf32>
    %392 = vector.shape_cast %391 : vector<8xf32> to vector<8x1xf32>
    %393 = vector.broadcast %10 : vector<1x1xf32> to vector<8x1xf32>
    %394 = arith.addf %392, %393 : vector<8x1xf32>
    %395 = vector.broadcast %394 : vector<8x1xf32> to vector<8x96xf32>
    %396 = vector.broadcast %4 : vector<1x96xf32> to vector<8x96xf32>
    %397 = arith.mulf %395, %396 : vector<8x96xf32>
    %398 = vector.broadcast %5 : vector<1x96xf32> to vector<8x96xf32>
    %399 = arith.addf %397, %398 : vector<8x96xf32>
    %400 = vector.extract_strided_slice %399 {offsets = [0, 0], sizes = [8, 32], strides = [1, 1]} : vector<8x96xf32> to vector<8x32xf32>
    %401 = vector.extract_strided_slice %362 {offsets = [0, 0], sizes = [8, 32], strides = [1, 1]} : vector<8x96xf32> to vector<8x32xf32>
    %402 = arith.addf %400, %401 : vector<8x32xf32>
    %403 = arith.negf %402 : vector<8x32xf32>
    %404 = math.exp %403 : vector<8x32xf32>
    %cst_67 = arith.constant 1.000000e+00 : f32
    %405 = vector.broadcast %cst_67 : f32 to vector<8x32xf32>
    %406 = arith.addf %405, %404 : vector<8x32xf32>
    %407 = arith.divf %405, %406 : vector<8x32xf32>
    %408 = vector.extract_strided_slice %399 {offsets = [0, 32], sizes = [8, 32], strides = [1, 1]} : vector<8x96xf32> to vector<8x32xf32>
    %409 = vector.extract_strided_slice %362 {offsets = [0, 32], sizes = [8, 32], strides = [1, 1]} : vector<8x96xf32> to vector<8x32xf32>
    %410 = arith.addf %408, %409 : vector<8x32xf32>
    %411 = arith.negf %410 : vector<8x32xf32>
    %412 = math.exp %411 : vector<8x32xf32>
    %cst_68 = arith.constant 1.000000e+00 : f32
    %413 = vector.broadcast %cst_68 : f32 to vector<8x32xf32>
    %414 = arith.addf %413, %412 : vector<8x32xf32>
    %415 = arith.divf %413, %414 : vector<8x32xf32>
    %416 = vector.extract_strided_slice %399 {offsets = [0, 64], sizes = [8, 32], strides = [1, 1]} : vector<8x96xf32> to vector<8x32xf32>
    %417 = vector.extract_strided_slice %362 {offsets = [0, 64], sizes = [8, 32], strides = [1, 1]} : vector<8x96xf32> to vector<8x32xf32>
    %418 = arith.mulf %407, %417 : vector<8x32xf32>
    %419 = arith.addf %416, %418 : vector<8x32xf32>
    %420 = math.tanh %419 : vector<8x32xf32>
    %cst_69 = arith.constant 1.000000e+00 : f32
    %421 = vector.broadcast %cst_69 : f32 to vector<8x32xf32>
    %422 = arith.subf %421, %415 : vector<8x32xf32>
    %423 = arith.mulf %422, %420 : vector<8x32xf32>
    %424 = arith.mulf %415, %357 : vector<8x32xf32>
    %425 = arith.addf %423, %424 : vector<8x32xf32>
    %c6_i32 = arith.constant 6 : i32
    %cst_70 = arith.constant dense<0.000000e+00> : vector<8x128xf32>
    %426 = tpu.matmul %425, %1, %cst_70 {dimension_numbers = #tpu.dot_dimension_numbers<[1], [0], [0], [1], [0, 0, 1, 1], [], []>} : vector<8x32xf32>, vector<32x128xf32>, vector<8x128xf32> -> vector<8x128xf32>
    %427 = vector.broadcast %3 : vector<1x128xf32> to vector<8x128xf32>
    %428 = arith.addf %426, %427 : vector<8x128xf32>
    %429 = vector.extract_strided_slice %428 {offsets = [0, 0], sizes = [8, 32], strides = [1, 1]} : vector<8x128xf32> to vector<8x32xf32>
    %430 = vector.extract_strided_slice %428 {offsets = [0, 32], sizes = [8, 96], strides = [1, 1]} : vector<8x128xf32> to vector<8x96xf32>
    %431 = vector.shape_cast %429 : vector<8x32xf32> to vector<8x1x32xf32>
    %432 = vector.broadcast %431 : vector<8x1x32xf32> to vector<8x8x32xf32>
    %433 = arith.addf %432, %15 : vector<8x8x32xf32>
    %434 = math.tanh %433 : vector<8x8x32xf32>
    %435 = vector.shape_cast %6 : vector<1x32xf32> to vector<1x1x32xf32>
    %436 = vector.broadcast %435 : vector<1x1x32xf32> to vector<8x8x32xf32>
    %437 = arith.mulf %434, %436 : vector<8x8x32xf32>
    %cst_71 = arith.constant dense<0.000000e+00> : vector<8x8xf32>
    %438 = vector.multi_reduction <add>, %437, %cst_71 [2] : vector<8x8x32xf32> to vector<8x8xf32>
    %cst_72 = arith.constant dense<0xFF800000> : vector<8xf32>
    %439 = vector.multi_reduction <maximumf>, %438, %cst_72 [1] : vector<8x8xf32> to vector<8xf32>
    %440 = vector.shape_cast %439 : vector<8xf32> to vector<8x1xf32>
    %441 = vector.broadcast %440 : vector<8x1xf32> to vector<8x8xf32>
    %442 = arith.subf %438, %441 : vector<8x8xf32>
    %443 = math.exp %442 : vector<8x8xf32>
    %cst_73 = arith.constant dense<0.000000e+00> : vector<8xf32>
    %444 = vector.multi_reduction <add>, %443, %cst_73 [1] : vector<8x8xf32> to vector<8xf32>
    %445 = vector.shape_cast %444 : vector<8xf32> to vector<8x1xf32>
    %446 = tpu.reciprocal %445 {approx = true} : vector<8x1xf32> -> vector<8x1xf32>
    %447 = arith.mulf %445, %446 : vector<8x1xf32>
    %cst_74 = arith.constant 2.000000e+00 : f32
    %448 = vector.broadcast %cst_74 : f32 to vector<8x1xf32>
    %449 = arith.subf %448, %447 : vector<8x1xf32>
    %450 = arith.mulf %446, %449 : vector<8x1xf32>
    %451 = vector.broadcast %450 : vector<8x1xf32> to vector<8x8xf32>
    %452 = arith.mulf %443, %451 : vector<8x8xf32>
    %453 = vector.shape_cast %452 : vector<8x8xf32> to vector<8x8x1xf32>
    %454 = vector.broadcast %453 : vector<8x8x1xf32> to vector<8x8x32xf32>
    %455 = arith.mulf %454, %0 : vector<8x8x32xf32>
    %cst_75 = arith.constant dense<0.000000e+00> : vector<8x32xf32>
    %456 = vector.multi_reduction <add>, %455, %cst_75 [1] : vector<8x8x32xf32> to vector<8x32xf32>
    %457 = vector.broadcast %7 : vector<1x32xf32> to vector<8x32xf32>
    %458 = arith.mulf %456, %457 : vector<8x32xf32>
    %cst_76 = arith.constant dense<0.000000e+00> : vector<8xf32>
    %459 = vector.multi_reduction <add>, %458, %cst_76 [1] : vector<8x32xf32> to vector<8xf32>
    %460 = vector.shape_cast %459 : vector<8xf32> to vector<8x1xf32>
    %461 = vector.broadcast %10 : vector<1x1xf32> to vector<8x1xf32>
    %462 = arith.addf %460, %461 : vector<8x1xf32>
    %463 = vector.broadcast %462 : vector<8x1xf32> to vector<8x96xf32>
    %464 = vector.broadcast %4 : vector<1x96xf32> to vector<8x96xf32>
    %465 = arith.mulf %463, %464 : vector<8x96xf32>
    %466 = vector.broadcast %5 : vector<1x96xf32> to vector<8x96xf32>
    %467 = arith.addf %465, %466 : vector<8x96xf32>
    %468 = vector.extract_strided_slice %467 {offsets = [0, 0], sizes = [8, 32], strides = [1, 1]} : vector<8x96xf32> to vector<8x32xf32>
    %469 = vector.extract_strided_slice %430 {offsets = [0, 0], sizes = [8, 32], strides = [1, 1]} : vector<8x96xf32> to vector<8x32xf32>
    %470 = arith.addf %468, %469 : vector<8x32xf32>
    %471 = arith.negf %470 : vector<8x32xf32>
    %472 = math.exp %471 : vector<8x32xf32>
    %cst_77 = arith.constant 1.000000e+00 : f32
    %473 = vector.broadcast %cst_77 : f32 to vector<8x32xf32>
    %474 = arith.addf %473, %472 : vector<8x32xf32>
    %475 = arith.divf %473, %474 : vector<8x32xf32>
    %476 = vector.extract_strided_slice %467 {offsets = [0, 32], sizes = [8, 32], strides = [1, 1]} : vector<8x96xf32> to vector<8x32xf32>
    %477 = vector.extract_strided_slice %430 {offsets = [0, 32], sizes = [8, 32], strides = [1, 1]} : vector<8x96xf32> to vector<8x32xf32>
    %478 = arith.addf %476, %477 : vector<8x32xf32>
    %479 = arith.negf %478 : vector<8x32xf32>
    %480 = math.exp %479 : vector<8x32xf32>
    %cst_78 = arith.constant 1.000000e+00 : f32
    %481 = vector.broadcast %cst_78 : f32 to vector<8x32xf32>
    %482 = arith.addf %481, %480 : vector<8x32xf32>
    %483 = arith.divf %481, %482 : vector<8x32xf32>
    %484 = vector.extract_strided_slice %467 {offsets = [0, 64], sizes = [8, 32], strides = [1, 1]} : vector<8x96xf32> to vector<8x32xf32>
    %485 = vector.extract_strided_slice %430 {offsets = [0, 64], sizes = [8, 32], strides = [1, 1]} : vector<8x96xf32> to vector<8x32xf32>
    %486 = arith.mulf %475, %485 : vector<8x32xf32>
    %487 = arith.addf %484, %486 : vector<8x32xf32>
    %488 = math.tanh %487 : vector<8x32xf32>
    %cst_79 = arith.constant 1.000000e+00 : f32
    %489 = vector.broadcast %cst_79 : f32 to vector<8x32xf32>
    %490 = arith.subf %489, %483 : vector<8x32xf32>
    %491 = arith.mulf %490, %488 : vector<8x32xf32>
    %492 = arith.mulf %483, %425 : vector<8x32xf32>
    %493 = arith.addf %491, %492 : vector<8x32xf32>
    %c7_i32 = arith.constant 7 : i32
    %cst_80 = arith.constant dense<0.000000e+00> : vector<8x128xf32>
    %494 = tpu.matmul %493, %1, %cst_80 {dimension_numbers = #tpu.dot_dimension_numbers<[1], [0], [0], [1], [0, 0, 1, 1], [], []>} : vector<8x32xf32>, vector<32x128xf32>, vector<8x128xf32> -> vector<8x128xf32>
    %495 = vector.broadcast %3 : vector<1x128xf32> to vector<8x128xf32>
    %496 = arith.addf %494, %495 : vector<8x128xf32>
    %497 = vector.extract_strided_slice %496 {offsets = [0, 0], sizes = [8, 32], strides = [1, 1]} : vector<8x128xf32> to vector<8x32xf32>
    %498 = vector.extract_strided_slice %496 {offsets = [0, 32], sizes = [8, 96], strides = [1, 1]} : vector<8x128xf32> to vector<8x96xf32>
    %499 = vector.shape_cast %497 : vector<8x32xf32> to vector<8x1x32xf32>
    %500 = vector.broadcast %499 : vector<8x1x32xf32> to vector<8x8x32xf32>
    %501 = arith.addf %500, %15 : vector<8x8x32xf32>
    %502 = math.tanh %501 : vector<8x8x32xf32>
    %503 = vector.shape_cast %6 : vector<1x32xf32> to vector<1x1x32xf32>
    %504 = vector.broadcast %503 : vector<1x1x32xf32> to vector<8x8x32xf32>
    %505 = arith.mulf %502, %504 : vector<8x8x32xf32>
    %cst_81 = arith.constant dense<0.000000e+00> : vector<8x8xf32>
    %506 = vector.multi_reduction <add>, %505, %cst_81 [2] : vector<8x8x32xf32> to vector<8x8xf32>
    %cst_82 = arith.constant dense<0xFF800000> : vector<8xf32>
    %507 = vector.multi_reduction <maximumf>, %506, %cst_82 [1] : vector<8x8xf32> to vector<8xf32>
    %508 = vector.shape_cast %507 : vector<8xf32> to vector<8x1xf32>
    %509 = vector.broadcast %508 : vector<8x1xf32> to vector<8x8xf32>
    %510 = arith.subf %506, %509 : vector<8x8xf32>
    %511 = math.exp %510 : vector<8x8xf32>
    %cst_83 = arith.constant dense<0.000000e+00> : vector<8xf32>
    %512 = vector.multi_reduction <add>, %511, %cst_83 [1] : vector<8x8xf32> to vector<8xf32>
    %513 = vector.shape_cast %512 : vector<8xf32> to vector<8x1xf32>
    %514 = tpu.reciprocal %513 {approx = true} : vector<8x1xf32> -> vector<8x1xf32>
    %515 = arith.mulf %513, %514 : vector<8x1xf32>
    %cst_84 = arith.constant 2.000000e+00 : f32
    %516 = vector.broadcast %cst_84 : f32 to vector<8x1xf32>
    %517 = arith.subf %516, %515 : vector<8x1xf32>
    %518 = arith.mulf %514, %517 : vector<8x1xf32>
    %519 = vector.broadcast %518 : vector<8x1xf32> to vector<8x8xf32>
    %520 = arith.mulf %511, %519 : vector<8x8xf32>
    %521 = vector.shape_cast %520 : vector<8x8xf32> to vector<8x8x1xf32>
    %522 = vector.broadcast %521 : vector<8x8x1xf32> to vector<8x8x32xf32>
    %523 = arith.mulf %522, %0 : vector<8x8x32xf32>
    %cst_85 = arith.constant dense<0.000000e+00> : vector<8x32xf32>
    %524 = vector.multi_reduction <add>, %523, %cst_85 [1] : vector<8x8x32xf32> to vector<8x32xf32>
    %525 = vector.broadcast %7 : vector<1x32xf32> to vector<8x32xf32>
    %526 = arith.mulf %524, %525 : vector<8x32xf32>
    %cst_86 = arith.constant dense<0.000000e+00> : vector<8xf32>
    %527 = vector.multi_reduction <add>, %526, %cst_86 [1] : vector<8x32xf32> to vector<8xf32>
    %528 = vector.shape_cast %527 : vector<8xf32> to vector<8x1xf32>
    %529 = vector.broadcast %10 : vector<1x1xf32> to vector<8x1xf32>
    %530 = arith.addf %528, %529 : vector<8x1xf32>
    %531 = vector.broadcast %530 : vector<8x1xf32> to vector<8x96xf32>
    %532 = vector.broadcast %4 : vector<1x96xf32> to vector<8x96xf32>
    %533 = arith.mulf %531, %532 : vector<8x96xf32>
    %534 = vector.broadcast %5 : vector<1x96xf32> to vector<8x96xf32>
    %535 = arith.addf %533, %534 : vector<8x96xf32>
    %536 = vector.extract_strided_slice %535 {offsets = [0, 0], sizes = [8, 32], strides = [1, 1]} : vector<8x96xf32> to vector<8x32xf32>
    %537 = vector.extract_strided_slice %498 {offsets = [0, 0], sizes = [8, 32], strides = [1, 1]} : vector<8x96xf32> to vector<8x32xf32>
    %538 = arith.addf %536, %537 : vector<8x32xf32>
    %539 = arith.negf %538 : vector<8x32xf32>
    %540 = math.exp %539 : vector<8x32xf32>
    %cst_87 = arith.constant 1.000000e+00 : f32
    %541 = vector.broadcast %cst_87 : f32 to vector<8x32xf32>
    %542 = arith.addf %541, %540 : vector<8x32xf32>
    %543 = arith.divf %541, %542 : vector<8x32xf32>
    %544 = vector.extract_strided_slice %535 {offsets = [0, 32], sizes = [8, 32], strides = [1, 1]} : vector<8x96xf32> to vector<8x32xf32>
    %545 = vector.extract_strided_slice %498 {offsets = [0, 32], sizes = [8, 32], strides = [1, 1]} : vector<8x96xf32> to vector<8x32xf32>
    %546 = arith.addf %544, %545 : vector<8x32xf32>
    %547 = arith.negf %546 : vector<8x32xf32>
    %548 = math.exp %547 : vector<8x32xf32>
    %cst_88 = arith.constant 1.000000e+00 : f32
    %549 = vector.broadcast %cst_88 : f32 to vector<8x32xf32>
    %550 = arith.addf %549, %548 : vector<8x32xf32>
    %551 = arith.divf %549, %550 : vector<8x32xf32>
    %552 = vector.extract_strided_slice %535 {offsets = [0, 64], sizes = [8, 32], strides = [1, 1]} : vector<8x96xf32> to vector<8x32xf32>
    %553 = vector.extract_strided_slice %498 {offsets = [0, 64], sizes = [8, 32], strides = [1, 1]} : vector<8x96xf32> to vector<8x32xf32>
    %554 = arith.mulf %543, %553 : vector<8x32xf32>
    %555 = arith.addf %552, %554 : vector<8x32xf32>
    %556 = math.tanh %555 : vector<8x32xf32>
    %cst_89 = arith.constant 1.000000e+00 : f32
    %557 = vector.broadcast %cst_89 : f32 to vector<8x32xf32>
    %558 = arith.subf %557, %551 : vector<8x32xf32>
    %559 = arith.mulf %558, %556 : vector<8x32xf32>
    %560 = arith.mulf %551, %493 : vector<8x32xf32>
    %561 = arith.addf %559, %560 : vector<8x32xf32>
    %c0_90 = arith.constant 0 : index
    %c0_91 = arith.constant 0 : index
    %562 = vector.load %arg4[%c0_90, %c0_91] : memref<32x32xf32, #tpu.memory_space<vmem>>, vector<32x32xf32>
    %cst_92 = arith.constant dense<0.000000e+00> : vector<8x32xf32>
    %563 = tpu.matmul %561, %562, %cst_92 {dimension_numbers = #tpu.dot_dimension_numbers<[1], [0], [0], [1], [0, 0, 1, 1], [], []>} : vector<8x32xf32>, vector<32x32xf32>, vector<8x32xf32> -> vector<8x32xf32>
    %c0_93 = arith.constant 0 : index
    %c0_94 = arith.constant 0 : index
    %564 = vector.load %arg5[%c0_93, %c0_94] : memref<32x32xf32, #tpu.memory_space<vmem>>, vector<32x32xf32>
    %cst_95 = arith.constant dense<0.000000e+00> : vector<8x32xf32>
    %565 = tpu.matmul %524, %564, %cst_95 {dimension_numbers = #tpu.dot_dimension_numbers<[1], [0], [0], [1], [0, 0, 1, 1], [], []>} : vector<8x32xf32>, vector<32x32xf32>, vector<8x32xf32> -> vector<8x32xf32>
    %566 = arith.addf %563, %565 : vector<8x32xf32>
    %567 = vector.broadcast %8 : vector<1x32xf32> to vector<8x32xf32>
    %568 = arith.addf %566, %567 : vector<8x32xf32>
    %569 = vector.broadcast %9 : vector<1x32xf32> to vector<8x32xf32>
    %570 = arith.mulf %568, %569 : vector<8x32xf32>
    %cst_96 = arith.constant dense<0.000000e+00> : vector<8xf32>
    %571 = vector.multi_reduction <add>, %570, %cst_96 [1] : vector<8x32xf32> to vector<8xf32>
    %572 = vector.shape_cast %571 : vector<8xf32> to vector<8x1xf32>
    %573 = vector.broadcast %11 : vector<1x1xf32> to vector<8x1xf32>
    %574 = arith.addf %572, %573 : vector<8x1xf32>
    %c0_97 = arith.constant 0 : index
    %c0_98 = arith.constant 0 : index
    %575 = vector.load %arg7[%c0_97, %c0_98] : memref<8x1xf32, #tpu.memory_space<vmem>>, vector<8x1xf32>
    tpu.vector_store %arg7[%c0_97, %c0_98], %574 {strides = array<i32>} : memref<8x1xf32, #tpu.memory_space<vmem>>, vector<8x1xf32>,
    return
  }
  func.func @transform_0(%arg0: i32) -> (i32, i32, i32) {
    %c0_i32 = arith.constant 0 : i32
    %c0_i32_0 = arith.constant 0 : i32
    %c0_i32_1 = arith.constant 0 : i32
    return %arg0, %c0_i32, %c0_i32_0 : i32, i32, i32
  }
  func.func @transform_1(%arg0: i32) -> (i32, i32) {
    %c0_i32 = arith.constant 0 : i32
    %c0_i32_0 = arith.constant 0 : i32
    %c0_i32_1 = arith.constant 0 : i32
    return %c0_i32, %c0_i32_0 : i32, i32
  }
  func.func @transform_2(%arg0: i32) -> (i32, i32) {
    %c0_i32 = arith.constant 0 : i32
    %c0_i32_0 = arith.constant 0 : i32
    %c0_i32_1 = arith.constant 0 : i32
    return %c0_i32, %c0_i32_0 : i32, i32
  }
  func.func @transform_3(%arg0: i32) -> (i32, i32) {
    %c0_i32 = arith.constant 0 : i32
    %c0_i32_0 = arith.constant 0 : i32
    %c0_i32_1 = arith.constant 0 : i32
    return %c0_i32, %c0_i32_0 : i32, i32
  }
  func.func @transform_4(%arg0: i32) -> (i32, i32) {
    %c0_i32 = arith.constant 0 : i32
    %c0_i32_0 = arith.constant 0 : i32
    %c0_i32_1 = arith.constant 0 : i32
    return %c0_i32, %c0_i32_0 : i32, i32
  }
  func.func @transform_5(%arg0: i32) -> (i32, i32) {
    %c0_i32 = arith.constant 0 : i32
    %c0_i32_0 = arith.constant 0 : i32
    %c0_i32_1 = arith.constant 0 : i32
    return %c0_i32, %c0_i32_0 : i32, i32
  }
  func.func @transform_6(%arg0: i32) -> (i32, i32) {
    %c0_i32 = arith.constant 0 : i32
    %c0_i32_0 = arith.constant 0 : i32
    return %arg0, %c0_i32 : i32, i32
  }
}

</mosaic_0001>

<bundles_post_ra>
// kernel: tpu_custom_call.1
= control target key start
LH: loop header
LB: loop body
LE: loop exit
PB: predicated region body
PF: predicated region fallthrough
CT: control target
= control target key end

     0   :  { %11 = vsyncpa [#allocation3], 0  ;;  %s8490_s0 = inlined_call_operand.hbm [shape: f32[8,8,32], index: 0, kind: input, shape index: {}]   ;;  %s8491_s1 = inlined_call_operand.hbm [shape: f32[32,32], index: 1, kind: input, shape index: {}]   ;;  %s8492_s2 = inlined_call_operand.hbm [shape: f32[32,128], index: 2, kind: input, shape index: {}]   ;;  %s8493_s3 = inlined_call_operand.hbm [shape: f32[32,32], index: 3, kind: input, shape index: {}]   ;;  %s8494_s4 = inlined_call_operand.hbm [shape: f32[32,32], index: 4, kind: input, shape index: {}]   ;;  %s8495_s5 = inlined_call_operand.vmem [shape: f32[8,128], index: 5, kind: input, shape index: {}]   ;;  %s8496_s6 = inlined_call_operand.vmem [shape: f32[8,1], index: 6, kind: output, shape index: {}]  }
   0x1   :  { %12 = vsyncpa [#allocation5], 0 }
   0x2   :  { %13 = vsyncpa [#allocation8], 0  ;;  %s6938_s21 = smov [#allocation4]   ;;  %s6939_s23 = smov [#allocation7]  }
   0x3   :  { %s31_s22 = sshll.u32 %s6938_s21, 4  ;;  %s55_s24 = sshll.u32 %s6939_s23, 4  ;;  %s32_s22 = int_to_ptr.vmem [resolvable:$true] %s31_s22  ;;  %s6989_s24 = int_to_ptr.vmem [resolvable:$true] %s55_s24 }
   0x4   :  { %s6822_s27 = scalar_lea.hbm %s8491_s1, 512 }
   0x5   :  { %p6823_p0 = scmp.ne.s32.totalorder %s8491_s1, %s6822_s27  ;;  %p6826_p1 = scmp.lt.u32.totalorder %s6822_s27, %s8491_s1 }
   0x7   :  { %p6828_p2 = pnand %p6826_p1, %p6823_p0 }
   0x9   :  { %6831 = shalt.err (!%p6828_p2)
}
   0xa   :  { %s6832_s8 = scalar_lea.vmem %s32_s22, 512  ;;  %p6837_p4 = scmp.lt.s32.totalorder %s32_s22, %s32_s22 }
   0xb   :  { %p6833_p3 = scmp.ne.s32.totalorder %s32_s22, %s6832_s8  ;;  %p6838_p5 = scmp.lt.s32.totalorder %s6832_s8, %s6832_s8 }
   0xd   :  { %p6839_p6 = por %p6838_p5, %p6837_p4 }
   0xf   :  { %p6840_p7 = pnand %p6839_p6, %p6833_p3 }
  0x11   :  { %6843 = shalt.err (!%p6840_p7)
}
  0x12   :  { %s6940_s9 = smov 128   ;;  %s6941_s10 = smov 8  }
  0x13   :  { %37 = dma.hbm_to_vmem [thread:$0]  %s8491_s1, 512, %s32_s22, [#allocation5], %s6940_s9, %s6940_s9, %s6941_s10  }
  0x14   :  { %s6844_s15 = scalar_lea.hbm %s8493_s3, 512 }
  0x15   :  { %p6845_p8 = scmp.ne.s32.totalorder %s8493_s3, %s6844_s15  ;;  %p6848_p9 = scmp.lt.u32.totalorder %s6844_s15, %s8493_s3 }
  0x17   :  { %p6850_p10 = pnand %p6848_p9, %p6845_p8 }
  0x19   :  { %6853 = shalt.err (!%p6850_p10)
}
  0x1a   :  { %s6854_s20 = scalar_lea.vmem %s6989_s24, 512  ;;  %p6859_p12 = scmp.lt.s32.totalorder %s6989_s24, %s6989_s24 }
  0x1b   :  { %p6855_p11 = scmp.ne.s32.totalorder %s6989_s24, %s6854_s20  ;;  %p6860_p13 = scmp.lt.s32.totalorder %s6854_s20, %s6854_s20 }
  0x1d   :  { %p6861_p0 = por %p6860_p13, %p6859_p12 }
  0x1f   :  { %p6862_p1 = pnand %p6861_p0, %p6855_p11 }
  0x21   :  { %6865 = shalt.err (!%p6862_p1)
}
  0x22   :  { %61 = dma.hbm_to_vmem [thread:$0]  %s8493_s3, 512, %s6989_s24, [#allocation8], %s6940_s9, %s6940_s9, %s6941_s10  }
  0x23   :  { %s6942_s22 = smov [#allocation2]   ;;  %s6943_s25 = smov [#allocation6]  }
  0x24   :  { %s19_s23 = sshll.u32 %s6942_s22, 4  ;;  %s43_s26 = sshll.u32 %s6943_s25, 4  ;;  %s20_s23 = int_to_ptr.vmem [resolvable:$true] %s19_s23  ;;  %s7026_s26 = int_to_ptr.vmem [resolvable:$true] %s43_s26 }
  0x25   :  { %s6866_s29 = scalar_lea.hbm %s8490_s0, 1024 }
  0x26   :  { %p6867_p2 = scmp.ne.s32.totalorder %s8490_s0, %s6866_s29  ;;  %p6870_p3 = scmp.lt.u32.totalorder %s6866_s29, %s8490_s0 }
  0x28   :  { %p6872_p4 = pnand %p6870_p3, %p6867_p2 }
  0x2a   :  { %6875 = shalt.err (!%p6872_p4)
}
  0x2b   :  { %s6876_s3 = scalar_lea.vmem %s20_s23, 1024  ;;  %p6881_p6 = scmp.lt.s32.totalorder %s20_s23, %s20_s23 }
  0x2c   :  { %p6877_p5 = scmp.ne.s32.totalorder %s20_s23, %s6876_s3  ;;  %p6882_p7 = scmp.lt.s32.totalorder %s6876_s3, %s6876_s3 }
  0x2e   :  { %p6883_p8 = por %p6882_p7, %p6881_p6 }
  0x30   :  { %p6884_p9 = pnand %p6883_p8, %p6877_p5 }
  0x32   :  { %6887 = shalt.err (!%p6884_p9)
}
  0x33   :  { %25 = dma.hbm_to_vmem [thread:$0]  %s8490_s0, 1024, %s20_s23, [#allocation3], %s6940_s9, %s6940_s9, %s6941_s10  }
  0x34   :  { %s6888_s15 = scalar_lea.hbm %s8492_s2, 512 }
  0x35   :  { %p6889_p10 = scmp.ne.s32.totalorder %s8492_s2, %s6888_s15  ;;  %p6892_p11 = scmp.lt.u32.totalorder %s6888_s15, %s8492_s2 }
  0x37   :  { %p6894_p12 = pnand %p6892_p11, %p6889_p10 }
  0x39   :  { %6897 = shalt.err (!%p6894_p12)
}
  0x3a   :  { %s6898_s20 = scalar_lea.vmem %s7026_s26, 512  ;;  %p6903_p0 = scmp.lt.s32.totalorder %s7026_s26, %s7026_s26 }
  0x3b   :  { %p6899_p13 = scmp.ne.s32.totalorder %s7026_s26, %s6898_s20  ;;  %p6904_p1 = scmp.lt.s32.totalorder %s6898_s20, %s6898_s20 }
  0x3d   :  { %p6905_p2 = por %p6904_p1, %p6903_p0 }
  0x3f   :  { %p6906_p3 = pnand %p6905_p2, %p6899_p13 }
  0x41   :  { %6909 = shalt.err (!%p6906_p3)
}
  0x42   :  { %49 = dma.hbm_to_vmem [thread:$0]  %s8492_s2, 512, %s7026_s26, [#allocation5], %s6940_s9, %s6940_s9, %s6941_s10  }
  0x43   :  { %s6944_s21 = smov [#allocation9]   ;;  %s6910_s27 = scalar_lea.hbm %s8494_s4, 512 }
  0x44   :  { %s67_s22 = sshll.u32 %s6944_s21, 4  ;;  %p6911_p4 = scmp.ne.s32.totalorder %s8494_s4, %s6910_s27  ;;  %s68_s22 = int_to_ptr.vmem [resolvable:$true] %s67_s22 }
  0x45   :  { %p6914_p5 = scmp.lt.u32.totalorder %s6910_s27, %s8494_s4 }
  0x47   :  { %p6916_p6 = pnand %p6914_p5, %p6911_p4 }
  0x49   :  { %6919 = shalt.err (!%p6916_p6)
}
  0x4a   :  { %s6920_s8 = scalar_lea.vmem %s68_s22, 512  ;;  %p6925_p8 = scmp.lt.s32.totalorder %s68_s22, %s68_s22 }
  0x4b   :  { %p6921_p7 = scmp.ne.s32.totalorder %s68_s22, %s6920_s8  ;;  %p6926_p9 = scmp.lt.s32.totalorder %s6920_s8, %s6920_s8 }
  0x4d   :  { %p6927_p10 = por %p6926_p9, %p6925_p8 }
  0x4f   :  { %p6928_p11 = pnand %p6927_p10, %p6921_p7 }
  0x51   :  { %6931 = shalt.err (!%p6928_p11)
}
  0x52   :  { %73 = dma.hbm_to_vmem [thread:$0]  %s8494_s4, 512, %s68_s22, [#allocation8], %s6940_s9, %s6940_s9, %s6941_s10  }
  0x53   :  { %6932 = dma.done.wait [#allocation3], 1024  }
  0x54   :  { %6933 = vsyncadd [#allocation3], 4294966272 }
  0x55   :  { %6934 = dma.done.wait [#allocation5], 1024  }
  0x56   :  { %6935 = vsyncadd [#allocation5], 4294966272 }
  0x57   :  { %6936 = dma.done.wait [#allocation8], 1024  }
  0x58   :  { %6937 = vsyncadd [#allocation8], 4294966272  ;;  %v8497_v0 = vmov 0.0|0.0   ;;  %vm6946_vm0 = vmmov 0   ;;  %v8499_v1 = vmov 0.0   ;;  %vm108_vm1 = vcmask 261120  }
  0x59   :  { %6327 = vmatprep.subr.bf16.mxu0 %v8497_v0  ;;  %6137 = vmatprep.mubr.msk.f32.mxu0 %vm6946_vm0, %v8499_v1  ;;  %v104_v2 = vld [vmem:[#allocation4] sm:$0xff]  ;;  %v105_v3 = vld [vmem:[#allocation4 + $0x8] sm:$0xff]  ;;  %vm7086_vm2 = vmpackc.low %vm108_vm1, %vm108_vm1  ;;  %v705_v35 = vlaneseq  ;;  %v6948_v37 = vmov 1966171168   ;;  %vm966_vm3 = vcmask 1041409   ;;  %vm968_vm4 = vcmask 1042434  }
  0x5a   :  { %6335 = vmatprep.subr.bf16.mxu1 %v8497_v0  ;;  %6148 = vmatprep.mubr.msk.f32.mxu1 %vm6946_vm0, %v8499_v1  ;;  %v6328_v5 = vpack.c.bf16 %v105_v3, %v104_v2  ;;  %v106_v6 = vld [vmem:[#allocation4 + $0x10] sm:$0xff]  ;;  %v107_v7 = vld [vmem:[#allocation4 + $0x18] sm:$0xff]  ;;  %v7102_v9 = vld [vmem:[#allocation2] sm:$0xff]  ;;  %v785_v38 = vunpack.c.l.s4 %v6948_v37  ;;  %vm970_vm5 = vcmask 1043459   ;;  %vm972_vm6 = vcmask 1044484   ;;  %s6950_s10 = smov 96  }
  0x5b   :  { %v6332_v8 = vpack.c.bf16 %v107_v7, %v106_v6  ;;  %v7104_v10 = vld [vmem:[#allocation2 + $0x8] sm:$0xff]  ;;  %v7126_v11 = vld [vmem:[#allocation2 + $0x10] sm:$0xff]  ;;  %v7128_v12 = vld [vmem:[#allocation2 + $0x18] sm:$0xff]  ;;  %v7218_v36 = vshrl.u32 %v705_v35, 7  ;;  %vm974_vm7 = vcmask 1045509   ;;  %vm976_vm8 = vcmask 1046534  }
  0x5c   :  { %6330 = vmatpush3.bf16.xpose.msk.msra.mxu0 %vm7086_vm2, %v6328_v5  ;;  %6338 = vmatpush3.bf16.xpose.msk.msra.mxu1 %vm7086_vm2, %v6328_v5  ;;  %v7150_v13 = vld [vmem:[#allocation2 + $0x20] sm:$0xff]  ;;  %v7152_v14 = vld [vmem:[#allocation2 + $0x28] sm:$0xff]  ;;  %v7174_v17 = vld [vmem:[#allocation2 + $0x30] sm:$0xff]  ;;  %v786_v44 = vunpack.c.0.s8 %v785_v38  ;;  %vm978_vm9 = vcmask 1047559   ;;  %vm981_vm10 = vcmask 64512   ;;  %s6951_s11 = smov 32  }
  0x5d   :  { %6331 = vmatprep.subr.bf16.mxu0 %v8497_v0  ;;  %6339 = vmatprep.subr.bf16.mxu1 %v8497_v0  ;;  %v99_v15 = vld [vmem:[#allocation6] sm:$0xff]  ;;  %v100_v16 = vld [vmem:[#allocation6 + $0x8] sm:$0xff]  ;;  %v101_v19 = vld [vmem:[#allocation6 + $0x10] sm:$0xff]  ;;  %v7223_v41 = vsub.s32 0, %v7218_v36  ;;  %s6952_s3 = smov 64   ;;  %s6953_s13 = smov 127  }
  0x5e   :  { %v7176_v18 = vpack.c.bf16 %v100_v16, %v99_v15  ;;  %v102_v20 = vld [vmem:[#allocation6 + $0x18] sm:$0xff]  ;;  %v7228_v42 = vld [vmem:[%s8495_s5] sm:$0xff]  ;;  %v7237_v47 = vsub.s32 %v786_v44, %v7218_v36  ;;  %vm5973_vm11 = vcmask 7168  }
  0x5f   :  { %v7178_v21 = vld [vmem:[#allocation2 + $0x38] sm:$0xff]  ;;  %v7183_v22 = vpack.c.bf16 %v102_v20, %v101_v19  ;;  %v7234_v46 = vrot.slane %v7228_v42, %v7223_v41 }
  0x64   :  { %6334 = vmatpush3.bf16.xpose.msk.msra.mxu0 %vm7086_vm2, %v6332_v8  ;;  %6342 = vmatpush3.bf16.xpose.msk.msra.mxu1 %vm7086_vm2, %v6332_v8 }
  0x65   :  { %6343 = vmatprep.subr.bf16.mxu0 %v8497_v0  ;;  %6351 = vmatprep.subr.bf16.mxu1 %v8497_v0 }
  0x6b   :  { %6138 = vmatmul.mubr.msk.f32.vlgmr.msra.gmra.mrb[0].mxu0 %vm108_vm1, %v7102_v9  ;;  %6149 = vmatmul.mubr.msk.f32.vlgmr.msra.gmra.mrb[0].mxu1 %vm108_vm1, %v7104_v10 }
  0x6c   :  { %6346 = vmatpush3.bf16.xpose.msk.msra.mxu0 %vm7086_vm2, %v6328_v5  ;;  %6159 = vmatprep.mubr.msk.f32.mxu0 %vm6946_vm0, %v8499_v1 }
  0x6d   :  { %6347 = vmatprep.subr.bf16.mxu0 %v8497_v0  ;;  %6354 = vmatpush3.bf16.xpose.msk.msra.mxu1 %vm7086_vm2, %v6328_v5 }
  0x6e   :  { %6355 = vmatprep.subr.bf16.mxu1 %v8497_v0  ;;  %6170 = vmatprep.mubr.msk.f32.mxu1 %vm6946_vm0, %v8499_v1 }
  0x74   :  { %6350 = vmatpush3.bf16.xpose.msk.msra.mxu0 %vm7086_vm2, %v6332_v8 }
  0x75   :  { %6359 = vmatprep.subr.bf16.mxu0 %v8497_v0  ;;  %6358 = vmatpush3.bf16.xpose.msk.msra.mxu1 %vm7086_vm2, %v6332_v8 }
  0x76   :  { %6367 = vmatprep.subr.bf16.mxu1 %v8497_v0 }
  0x7b   :  { %6160 = vmatmul.mubr.msk.f32.vlgmr.msra.gmra.mrb[2].mxu0 %vm108_vm1, %v7126_v11 }
  0x7c   :  { %6362 = vmatpush3.bf16.xpose.msk.msra.mxu0 %vm7086_vm2, %v6328_v5  ;;  %6181 = vmatprep.mubr.msk.f32.mxu0 %vm6946_vm0, %v8499_v1 }
  0x7d   :  { %6363 = vmatprep.subr.bf16.mxu0 %v8497_v0  ;;  %6171 = vmatmul.mubr.msk.f32.vlgmr.msra.gmra.mrb[2].mxu1 %vm108_vm1, %v7128_v12 }
  0x7e   :  { %6370 = vmatpush3.bf16.xpose.msk.msra.mxu1 %vm7086_vm2, %v6328_v5  ;;  %6192 = vmatprep.mubr.msk.f32.mxu1 %vm6946_vm0, %v8499_v1 }
  0x7f   :  { %6371 = vmatprep.subr.bf16.mxu1 %v8497_v0 }
  0x84   :  { %6366 = vmatpush3.bf16.xpose.msk.msra.mxu0 %vm7086_vm2, %v6332_v8 }
  0x85   :  { %6375 = vmatprep.subr.bf16.mxu0 %v8497_v0 }
  0x86   :  { %6374 = vmatpush3.bf16.xpose.msk.msra.mxu1 %vm7086_vm2, %v6332_v8 }
  0x87   :  { %6383 = vmatprep.subr.bf16.mxu1 %v8497_v0 }
  0x8b   :  { %6182 = vmatmul.mubr.msk.f32.vlgmr.msra.gmra.mrb[4].mxu0 %vm108_vm1, %v7150_v13 }
  0x8c   :  { %6378 = vmatpush3.bf16.xpose.msk.msra.mxu0 %vm7086_vm2, %v6328_v5  ;;  %6203 = vmatprep.mubr.msk.f32.mxu0 %vm6946_vm0, %v8499_v1 }
  0x8d   :  { %6379 = vmatprep.subr.bf16.mxu0 %v8497_v0  ;;  %6193 = vmatmul.mubr.msk.f32.vlgmr.msra.gmra.mrb[4].mxu1 %vm108_vm1, %v7152_v14 }
  0x8e   :  { %6386 = vmatpush3.bf16.xpose.msk.msra.mxu1 %vm7086_vm2, %v6328_v5  ;;  %6214 = vmatprep.mubr.msk.f32.mxu1 %vm6946_vm0, %v8499_v1 }
  0x8f   :  { %6387 = vmatprep.subr.bf16.mxu1 %v8497_v0 }
  0x94   :  { %6382 = vmatpush3.bf16.xpose.msk.msra.mxu0 %vm7086_vm2, %v6332_v8 }
  0x95   :  { %6391 = vmatprep.subr.bf16.mxu0 %v8497_v0 }
  0x96   :  { %6390 = vmatpush3.bf16.xpose.msk.msra.mxu1 %vm7086_vm2, %v6332_v8 }
  0x97   :  { %6397 = vmatprep.subr.bf16.mxu1 %v8497_v0 }
  0x9b   :  { %6204 = vmatmul.mubr.msk.f32.vlgmr.msra.gmra.mrb[6].mxu0 %vm108_vm1, %v7174_v17 }
  0x9c   :  { %6393 = vmatpush3.bf16.msra.mxu0 %v7176_v18  ;;  %6225 = vmatprep.mubr.msk.f32.mxu0 %vm6946_vm0, %v8499_v1 }
  0x9d   :  { %6394 = vmatprep.subr.bf16.mxu0 %v8497_v0  ;;  %6215 = vmatmul.mubr.msk.f32.vlgmr.msra.gmra.mrb[6].mxu1 %vm108_vm1, %v7178_v21 }
  0x9e   :  { %6399 = vmatpush3.bf16.msra.mxu1 %v7176_v18  ;;  %6236 = vmatprep.mubr.msk.f32.mxu1 %vm6946_vm0, %v8499_v1 }
  0x9f   :  { %6400 = vmatprep.subr.bf16.mxu1 %v8497_v0 }
  0xa0   :  { %6396 = vmatpush3.bf16.msra.mxu0 %v7183_v22 }
  0xa1   :  { %6403 = vmatprep.subr.bf16.mxu0 %v8497_v0 }
  0xa2   :  { %6402 = vmatpush3.bf16.msra.mxu1 %v7183_v22 }
  0xa3   :  { %6226 = vmatmul.mubr.f32.vlgmr.msra.gmra.mrb[8].mxu0 %v8499_v1  ;;  %6409 = vmatprep.subr.bf16.mxu1 %v8497_v0 }
  0xa4   :  { %6405 = vmatpush3.bf16.msra.mxu0 %v7176_v18  ;;  %6247 = vmatprep.mubr.msk.f32.mxu0 %vm6946_vm0, %v8499_v1 }
  0xa5   :  { %6406 = vmatprep.subr.bf16.mxu0 %v8497_v0 }
  0xa8   :  { %6408 = vmatpush3.bf16.msra.mxu0 %v7183_v22 }
  0xa9   :  { %6415 = vmatprep.subr.bf16.mxu0 %v8497_v0 }
 0x13e   :  { %v7205_v23 = vpop.f32.mrb[0].mxu0  ;;  %v7207_v24 = vpop.f32.mrb[0].mxu1 }
 0x13f   :  { %v6139_v25 = vpop.f32.mrb[1].mxu0  ;;  %v6150_v26 = vpop.f32.mrb[1].mxu1 }
 0x14e   :  { %v7209_v27 = vpop.f32.mrb[2].mxu0 }
 0x14f   :  { %v6161_v28 = vpop.f32.mrb[3].mxu0 }
 0x150   :  { %v7211_v29 = vpop.f32.mrb[2].mxu1 }
 0x151   :  { %v6172_v30 = vpop.f32.mrb[3].mxu1 }
 0x152   :  { %v7266_v30 = vsub.s32 3, %v7218_v36 }
 0x154   :  { %v7272_v37 = vrot.slane %v7228_v42, %v7266_v30 }
 0x15e   :  { %v7213_v31 = vpop.f32.mrb[4].mxu0 }
 0x15f   :  { %v6183_v32 = vpop.f32.mrb[5].mxu0 }
 0x160   :  { %v7215_v33 = vpop.f32.mrb[4].mxu1 }
 0x161   :  { %v6194_v34 = vpop.f32.mrb[5].mxu1 }
 0x16e   :  { %v7220_v39 = vpop.f32.mrb[6].mxu0 }
 0x16f   :  { %v6205_v40 = vpop.f32.mrb[7].mxu0 }
 0x170   :  { %v7230_v43 = vpop.f32.mrb[6].mxu1 }
 0x171   :  { %v6216_v45 = vpop.f32.mrb[7].mxu1 }
 0x176   :  { %v778_v48 = vpop.f32.mrb[8].mxu0 }
 0x177   :  { %v7240_v49 = vadd.f32 %v778_v48, %v7234_v46  ;;  %v6227_v50 = vpop.f32.mrb[9].mxu0 }
 0x179   :  { %v783_v51 = vcombine.high %v7240_v49, %v7240_v49  ;;  %v790_v52 = vrot.slane %v7240_v49, %v7237_v47 }
 0x17b   :  { %v797_v53 = vrot.slane %v783_v51, %v7237_v47  ;;  %v798_v54 = vcombine.high %v790_v52, %v790_v52  ;;  %v806_v55 = vrot.slane %v790_v52, %v7237_v47 }
 0x17d   :  { %v799_v56 = vcombine.high %v797_v53, %v797_v53  ;;  %v813_v57 = vrot.slane %v797_v53, %v7237_v47  ;;  %v820_v58 = vrot.slane %v798_v54, %v7237_v47  ;;  %v828_v59 = vcombine.high %v806_v55, %v806_v55 }
 0x17e   :  { %v835_v60 = vrot.slane %v806_v55, %v7223_v41 }
 0x17f   :  { %v827_v61 = vrot.slane %v799_v56, %v7237_v47  ;;  %v829_v62 = vcombine.high %v813_v57, %v813_v57  ;;  %v830_v63 = vcombine.high %v820_v58, %v820_v58  ;;  %v839_v2 = vrot.slane %v820_v58, %v7223_v41 }
 0x180   :  { %v843_v3 = vrot.slane %v828_v59, %v7223_v41  ;;  %v851_v4 = vrot.slane %v813_v57, %v7223_v41  ;;  %v872_v5 = vadd.f32 %v835_v60, %v7205_v23 }
 0x181   :  { %v831_v6 = vcombine.high %v827_v61, %v827_v61  ;;  %v873_v7 = vadd.f32 %v839_v2, %v7207_v24  ;;  %v847_v8 = vrot.slane %v830_v63, %v7223_v41  ;;  %v855_v15 = vrot.slane %v827_v61, %v7223_v41 }
 0x182   :  { %6469 = vtanh.f32 %v872_v5  ;;  %v874_v16 = vadd.f32 %v843_v3, %v7209_v27  ;;  %v876_v19 = vadd.f32 %v851_v4, %v7213_v31  ;;  %v859_v20 = vrot.slane %v829_v62, %v7223_v41 }
 0x183   :  { %6471 = vtanh.f32 %v873_v7  ;;  %v875_v25 = vadd.f32 %v847_v8, %v7211_v29  ;;  %v877_v26 = vadd.f32 %v855_v15, %v7215_v33  ;;  %v863_v28 = vrot.slane %v831_v6, %v7223_v41 }
 0x184   :  { %6473 = vtanh.f32 %v874_v16  ;;  %v878_v32 = vadd.f32 %v859_v20, %v7220_v39  ;;  %v933_v7 = vand.u32 127, %v705_v35 }
 0x185   :  { %6475 = vtanh.f32 %v875_v25  ;;  %v879_v34 = vadd.f32 %v863_v28, %v7230_v43 }
 0x186   :  { %6477 = vtanh.f32 %v876_v19  ;;  %v7292_v15 = vsub.s32 %v933_v7, %v7218_v36 }
 0x187   :  { %6479 = vtanh.f32 %v877_v26 }
 0x188   :  { %6481 = vtanh.f32 %v878_v32 }
 0x189   :  { %6483 = vtanh.f32 %v879_v34 }
 0x18c   :  { %v6470_v38 = vpop.eup %6469 }
 0x18d   :  { %v6472_v40 = vpop.eup %6471  ;;  %v892_v44 = vmul.f32 %v6470_v38, %v7272_v37 }
 0x18e   :  { %v6474_v45 = vpop.eup %6473  ;;  %v893_v52 = vmul.f32 %v6472_v40, %v7272_v37 }
 0x18f   :  { %v6476_v48 = vpop.eup %6475  ;;  %v900_v50 = vsel %vm108_vm1, %v892_v44, 0.0  ;;  %v894_v51 = vmul.f32 %v6474_v45, %v7272_v37 }
 0x190   :  { %v6478_v53 = vpop.eup %6477  ;;  %901 = vadd.xlane.f32.xlu0 %v900_v50  ;;  %v895_v55 = vmul.f32 %v6476_v48, %v7272_v37  ;;  %v903_v57 = vsel %vm108_vm1, %v893_v52, 0.0 }
 0x191   :  { %v906_v54 = vsel %vm108_vm1, %v894_v51, 0.0  ;;  %v6480_v56 = vpop.eup %6479  ;;  %v896_v58 = vmul.f32 %v6478_v53, %v7272_v37 }
 0x192   :  { %907 = vadd.xlane.f32.xlu1 %v906_v54  ;;  %v6482_v59 = vpop.eup %6481  ;;  %v909_v60 = vsel %vm108_vm1, %v895_v55, 0.0  ;;  %v897_v61 = vmul.f32 %v6480_v56, %v7272_v37 }
 0x193   :  { %v6484_v62 = vpop.eup %6483  ;;  %v912_v63 = vsel %vm108_vm1, %v896_v58, 0.0  ;;  %v898_v2 = vmul.f32 %v6482_v59, %v7272_v37  ;;  %v6949_v59 = vmov 0  }
 0x194   :  { %904 = vadd.xlane.f32.xlu0 %v903_v57  ;;  %v915_v3 = vsel %vm108_vm1, %v897_v61, 0.0  ;;  %v899_v4 = vmul.f32 %v6484_v62, %v7272_v37  ;;  %6467 = vset.pattern.permute.xlu1 %v6949_v59  ;;  %v7314_v61 = vsub.s32 2, %v7218_v36 }
 0x195   :  { %v918_v5 = vsel %vm108_vm1, %v898_v2, 0.0  ;;  %6468 = vset.pattern.permute.xlu0 %v6949_v59 }
 0x196   :  { %910 = vadd.xlane.f32.xlu1 %v909_v60  ;;  %v921_v6 = vsel %vm108_vm1, %v899_v4, 0.0  ;;  %v7311_v60 = vsub.s32 1, %v7218_v36 }
 0x198   :  { %913 = vadd.xlane.f32.xlu0 %v912_v63 }
 0x19a   :  { %916 = vadd.xlane.f32.xlu1 %v915_v3 }
 0x19c   :  { %919 = vadd.xlane.f32.xlu0 %v918_v5 }
 0x19e   :  { %922 = vadd.xlane.f32.xlu1 %v921_v6  ;;  %v7320_v6 = vsub.s32 4, %v7218_v36 }
 0x21d   :  { %v902_v8 = vpop.xlane.xlu0 %901 }
 0x21e   :  { %v937_v20 = vrot.slane %v902_v8, %v7292_v15 }
 0x21f   :  { %v908_v16 = vpop.xlane.xlu1 %907 }
 0x220   :  { %v945_v26 = vrot.slane %v908_v16, %v7292_v15 }
 0x221   :  { %v905_v19 = vpop.xlane.xlu0 %904 }
 0x222   :  { %v941_v25 = vrot.slane %v905_v19, %v7292_v15 }
 0x223   :  { %v911_v28 = vpop.xlane.xlu1 %910 }
 0x224   :  { %v967_v32 = vsel %vm966_vm3, %v941_v25, %v937_v20  ;;  %v949_v35 = vrot.slane %v911_v28, %v7292_v15 }
 0x225   :  { %v969_v34 = vsel %vm968_vm4, %v945_v26, %v967_v32  ;;  %v914_v38 = vpop.xlane.xlu0 %913  ;;  %v7324_v32 = vsub.s32 5, %v7218_v36 }
 0x226   :  { %v971_v40 = vsel %vm970_vm5, %v949_v35, %v969_v34  ;;  %v953_v44 = vrot.slane %v914_v38, %v7292_v15 }
 0x227   :  { %v917_v45 = vpop.xlane.xlu1 %916 }
 0x228   :  { %v973_v48 = vsel %vm972_vm6, %v953_v44, %v971_v40  ;;  %v957_v50 = vrot.slane %v917_v45, %v7292_v15 }
 0x229   :  { %v920_v51 = vpop.xlane.xlu0 %919 }
 0x22a   :  { %v961_v52 = vrot.slane %v920_v51, %v7292_v15  ;;  %v975_v53 = vsel %vm974_vm7, %v957_v50, %v973_v48 }
 0x22b   :  { %v923_v54 = vpop.xlane.xlu1 %922 }
 0x22c   :  { %v965_v55 = vrot.slane %v923_v54, %v7292_v15  ;;  %v977_v56 = vsel %vm976_vm8, %v961_v52, %v975_v53 }
 0x22e   :  { %v979_v57 = vsel %vm978_vm9, %v965_v55, %v977_v56 }
 0x22f   :  { %v982_v58 = vsel %vm981_vm10, %v979_v57, -inf }
 0x230   :  { %983 = vmax.xlane.f32.xlu0 %v982_v58 }
 0x2bd   :  { %v984_v62 = vpop.xlane.xlu0 %983 }
 0x2be   :  { %v989_v63 = vrot.slane %v984_v62, %v7223_v41  ;;  %v993_v2 = vrot.slane %v984_v62, %v7311_v60  ;;  %v997_v3 = vrot.slane %v984_v62, %v7314_v61  ;;  %v1001_v7 = vrot.slane %v984_v62, %v7266_v30 }
 0x2bf   :  { %v1005_v35 = vrot.slane %v984_v62, %v7320_v6 }
 0x2c0   :  { %v1027_v4 = vsub.f32 %v905_v19, %v993_v2  ;;  %v1026_v5 = vsub.f32 %v902_v8, %v989_v63  ;;  %v1028_v20 = vsub.f32 %v908_v16, %v997_v3  ;;  %v1029_v40 = vsub.f32 %v911_v28, %v1001_v7 }
 0x2c1   :  { %v7328_v19 = vsub.s32 6, %v7218_v36  ;;  %v1009_v8 = vrot.slane %v984_v62, %v7324_v32  ;;  %v1030_v48 = vsub.f32 %v914_v38, %v1005_v35  ;;  %v7332_v16 = vsub.s32 7, %v7218_v36 }
 0x2c2   :  { %v1036_v25 = vmul.f32 1.442695, %v1027_v4  ;;  %v1034_v26 = vmul.f32 1.442695, %v1026_v5  ;;  %v1038_v34 = vmul.f32 1.442695, %v1028_v20 }
 0x2c3   :  { %v1040_v44 = vmul.f32 1.442695, %v1029_v40  ;;  %v1013_v50 = vrot.slane %v984_v62, %v7328_v19  ;;  %v1042_v52 = vmul.f32 1.442695, %v1030_v48  ;;  %v1031_v53 = vsub.f32 %v917_v45, %v1009_v8 }
 0x2c4   :  { %6485 = vpow2.f32 %v1036_v25  ;;  %v1017_v28 = vrot.slane %v984_v62, %v7332_v16 }
 0x2c5   :  { %6487 = vpow2.f32 %v1034_v26  ;;  %v1044_v57 = vmul.f32 1.442695, %v1031_v53  ;;  %v1032_v58 = vsub.f32 %v920_v51, %v1013_v50 }
 0x2c6   :  { %6489 = vpow2.f32 %v1038_v34  ;;  %v1033_v59 = vsub.f32 %v923_v54, %v1017_v28 }
 0x2c7   :  { %6491 = vpow2.f32 %v1040_v44  ;;  %v1046_v36 = vmul.f32 1.442695, %v1032_v58 }
 0x2c8   :  { %6493 = vpow2.f32 %v1042_v52  ;;  %v1048_v45 = vmul.f32 1.442695, %v1033_v59 }
 0x2c9   :  { %6495 = vpow2.f32 %v1044_v57 }
 0x2ca   :  { %6497 = vpow2.f32 %v1046_v36 }
 0x2cb   :  { %6499 = vpow2.f32 %v1048_v45 }
 0x2ce   :  { %v6486_v55 = vpop.eup %6485 }
 0x2cf   :  { %v7335_v56 = vpop.eup %6487  ;;  %1062 = vperm.xlu0 %6468, %v6486_v55  }
 0x2d0   :  { %1059 = vperm.xlu1 %6467, %v7335_v56   ;;  %v6490_v38 = vpop.eup %6489 }
 0x2d1   :  { %v6492_v63 = vpop.eup %6491 }
 0x2d2   :  { %v6494_v2 = vpop.eup %6493 }
 0x2d3   :  { %v6496_v3 = vpop.eup %6495 }
 0x2d4   :  { %1065 = vperm.xlu1 %6467, %v6490_v38   ;;  %v6498_v4 = vpop.eup %6497 }
 0x2d5   :  { %v6500_v62 = vpop.eup %6499 }
 0x2d8   :  { %1068 = vperm.xlu1 %6467, %v6492_v63  }
 0x2dc   :  { %1071 = vperm.xlu1 %6467, %v6494_v2  }
 0x2e0   :  { %1074 = vperm.xlu1 %6467, %v6496_v3  }
 0x2e4   :  { %1077 = vperm.xlu1 %6467, %v6498_v4  }
 0x2e8   :  { %1080 = vperm.xlu1 %6467, %v6500_v62  }
 0x34e   :  { %v1063_v25 = vpop.permute.xlu0 %1062 }
 0x34f   :  { %v1060_v5 = vpop.permute.xlu1 %1059  ;;  %v1089_v54 = vrot.slane %v1063_v25, %v7292_v15 }
 0x350   :  { %v1085_v35 = vrot.slane %v1060_v5, %v7292_v15 }
 0x352   :  { %v1114_v48 = vsel %vm966_vm3, %v1089_v54, %v1085_v35 }
 0x353   :  { %v1066_v51 = vpop.permute.xlu1 %1065 }
 0x354   :  { %v1093_v34 = vrot.slane %v1066_v51, %v7292_v15 }
 0x356   :  { %v1115_v52 = vsel %vm968_vm4, %v1093_v34, %v1114_v48 }
 0x357   :  { %v1069_v7 = vpop.permute.xlu1 %1068 }
 0x358   :  { %v1097_v40 = vrot.slane %v1069_v7, %v7292_v15 }
 0x35a   :  { %v1116_v28 = vsel %vm970_vm5, %v1097_v40, %v1115_v52 }
 0x35b   :  { %v1072_v20 = vpop.permute.xlu1 %1071 }
 0x35c   :  { %v1101_v8 = vrot.slane %v1072_v20, %v7292_v15 }
 0x35e   :  { %v1117_v57 = vsel %vm972_vm6, %v1101_v8, %v1116_v28 }
 0x35f   :  { %v1075_v26 = vpop.permute.xlu1 %1074 }
 0x360   :  { %v1105_v50 = vrot.slane %v1075_v26, %v7292_v15 }
 0x362   :  { %v1118_v59 = vsel %vm974_vm7, %v1105_v50, %v1117_v57 }
 0x363   :  { %v1078_v44 = vpop.permute.xlu1 %1077 }
 0x364   :  { %v1109_v53 = vrot.slane %v1078_v44, %v7292_v15 }
 0x366   :  { %v1119_v45 = vsel %vm976_vm8, %v1109_v53, %v1118_v59 }
 0x367   :  { %v1081_v58 = vpop.permute.xlu1 %1080 }
 0x368   :  { %v1113_v36 = vrot.slane %v1081_v58, %v7292_v15 }
 0x36a   :  { %v1120_v5 = vsel %vm978_vm9, %v1113_v36, %v1119_v45 }
 0x36b   :  { %v1122_v51 = vsel %vm981_vm10, %v1120_v5, 0.0 }
 0x36c   :  { %1123 = vadd.xlane.f32.xlu1 %v1122_v51 }
 0x3f9   :  { %v1124_v7 = vpop.xlane.xlu1 %1123 }
 0x3fa   :  { %6501 = vrcp.f32 %v1124_v7 }
 0x404   :  { %v6502_v20 = vpop.eup %6501 }
 0x405   :  { %v1126_v25 = vmul.f32 %v6502_v20, %v1124_v7 }
 0x407   :  { %v1127_v26 = vsub.f32 2.0, %v1126_v25 }
 0x409   :  { %v1128_v54 = vmul.f32 %v6502_v20, %v1127_v26 }
 0x40b   :  { %v1137_v35 = vrot.slane %v1128_v54, %v7311_v60  ;;  %v1141_v40 = vrot.slane %v1128_v54, %v7314_v61  ;;  %v1133_v44 = vrot.slane %v1128_v54, %v7223_v41  ;;  %v1145_v50 = vrot.slane %v1128_v54, %v7266_v30 }
 0x40c   :  { %v1149_v53 = vrot.slane %v1128_v54, %v7320_v6  ;;  %v1153_v57 = vrot.slane %v1128_v54, %v7324_v32  ;;  %v1157_v58 = vrot.slane %v1128_v54, %v7328_v19  ;;  %v1161_v36 = vrot.slane %v1128_v54, %v7332_v16 }
 0x40d   :  { %v1171_v34 = vmul.f32 %v6486_v55, %v1137_v35  ;;  %v1172_v8 = vmul.f32 %v6490_v38, %v1141_v40  ;;  %v1170_v48 = vmul.f32 %v7335_v56, %v1133_v44  ;;  %v1173_v52 = vmul.f32 %v6492_v63, %v1145_v50 }
 0x40e   :  { %v1174_v28 = vmul.f32 %v6494_v2, %v1149_v53  ;;  %v1175_v55 = vmul.f32 %v6496_v3, %v1153_v57  ;;  %v1176_v38 = vmul.f32 %v6498_v4, %v1157_v58  ;;  %v1177_v56 = vmul.f32 %v6500_v62, %v1161_v36 }
 0x40f   :  { %1185 = vperm.xlu0 %6468, %v1171_v34  }
 0x413   :  { %1190 = vperm.xlu0 %6468, %v1172_v8  }
 0x417   :  { %1180 = vperm.xlu0 %6468, %v1170_v48  }
 0x41b   :  { %1195 = vperm.xlu0 %6468, %v1173_v52  }
 0x41f   :  { %1200 = vperm.xlu0 %6468, %v1174_v28  }
 0x423   :  { %1205 = vperm.xlu0 %6468, %v1175_v55  }
 0x427   :  { %1210 = vperm.xlu0 %6468, %v1176_v38  }
 0x42b   :  { %1215 = vperm.xlu0 %6468, %v1177_v56  }
 0x48e   :  { %v1186_v59 = vpop.permute.xlu0 %1185 }
 0x48f   :  { %v1219_v63 = vmul.f32 %v1186_v59, %v7104_v10 }
 0x491   :  { %v1233_v2 = vsel %vm108_vm1, %v1219_v63, 0.0 }
 0x492   :  { %v1191_v45 = vpop.permute.xlu0 %1190  ;;  %v1234_v7 = vrot.slane %v1233_v2, 4 }
 0x493   :  { %v1220_v5 = vmul.f32 %v1191_v45, %v7126_v11 }
 0x494   :  { %v1235_v35 = vadd.f32 %v1234_v7, %v1233_v2 }
 0x495   :  { %v1240_v20 = vsel %vm108_vm1, %v1220_v5, 0.0 }
 0x496   :  { %v1181_v51 = vpop.permute.xlu0 %1180  ;;  %v1241_v62 = vrot.slane %v1240_v20, 4 }
 0x497   :  { %v1218_v3 = vmul.f32 %v1181_v51, %v7102_v9  ;;  %v1236_v9 = vrot.slane %v1235_v35, 2 }
 0x498   :  { %v1242_v8 = vadd.f32 %v1241_v62, %v1240_v20 }
 0x499   :  { %v1226_v4 = vsel %vm108_vm1, %v1218_v3, 0.0  ;;  %v1237_v58 = vadd.f32 %v1236_v9, %v1235_v35 }
 0x49a   :  { %v1227_v25 = vrot.slane %v1226_v4, 4  ;;  %v1196_v26 = vpop.permute.xlu0 %1195  ;;  %v1243_v55 = vrot.slane %v1242_v8, 2 }
 0x49b   :  { %v1221_v54 = vmul.f32 %v1196_v26, %v7128_v12  ;;  %v1238_v51 = vrot.slane %v1237_v58, 1 }
 0x49c   :  { %v1228_v10 = vadd.f32 %v1227_v25, %v1226_v4  ;;  %v1244_v5 = vadd.f32 %v1243_v55, %v1242_v8 }
 0x49d   :  { %v1247_v34 = vsel %vm108_vm1, %v1221_v54, 0.0 }
 0x49e   :  { %v1248_v11 = vrot.slane %v1247_v34, 4  ;;  %v1201_v40 = vpop.permute.xlu0 %1200  ;;  %v1229_v50 = vrot.slane %v1228_v10, 2  ;;  %v1245_v54 = vrot.slane %v1244_v5, 1 }
 0x49f   :  { %v1222_v44 = vmul.f32 %v1201_v40, %v7150_v13 }
 0x4a0   :  { %v1249_v48 = vadd.f32 %v1248_v11, %v1247_v34  ;;  %v1230_v36 = vadd.f32 %v1229_v50, %v1228_v10  ;;  %v7381_v34 = vrot.slane %v7228_v42, %v7320_v6  ;;  %v1239_v11 = vadd.f32 %v1238_v51, %v1237_v58 }
 0x4a1   :  { %v1254_v52 = vsel %vm108_vm1, %v1222_v44, 0.0 }
 0x4a2   :  { %v1250_v53 = vrot.slane %v1249_v48, 2  ;;  %v1255_v28 = vrot.slane %v1254_v52, 4  ;;  %v1206_v57 = vpop.permute.xlu0 %1205  ;;  %v1231_v20 = vrot.slane %v1230_v36, 1 }
 0x4a3   :  { %v1223_v12 = vmul.f32 %v1206_v57, %v7152_v14  ;;  %v1287_v57 = vmul.f32 %v7381_v34, %v1239_v11 }
 0x4a4   :  { %v1256_v38 = vadd.f32 %v1255_v28, %v1254_v52  ;;  %v1251_v59 = vadd.f32 %v1250_v53, %v1249_v48  ;;  %v1232_v8 = vadd.f32 %v1231_v20, %v1230_v36  ;;  %v1246_v53 = vadd.f32 %v1245_v54, %v1244_v5 }
 0x4a5   :  { %v1261_v56 = vsel %vm108_vm1, %v1223_v12, 0.0 }
 0x4a6   :  { %v1257_v63 = vrot.slane %v1256_v38, 2  ;;  %v1262_v45 = vrot.slane %v1261_v56, 4  ;;  %v1211_v13 = vpop.permute.xlu0 %1210  ;;  %v1252_v25 = vrot.slane %v1251_v59, 1  ;;  %v1288_v36 = vmul.f32 %v7381_v34, %v1246_v53 }
 0x4a7   :  { %v1224_v2 = vmul.f32 %v1211_v13, %v7174_v17  ;;  %v7411_v53 = vrot.slane %v7228_v42, %v7311_v60 }
 0x4a8   :  { %v1258_v3 = vadd.f32 %v1257_v63, %v1256_v38  ;;  %v1263_v7 = vadd.f32 %v1262_v45, %v1261_v56  ;;  %v1253_v9 = vadd.f32 %v1252_v25, %v1251_v59  ;;  %v1286_v38 = vmul.f32 %v7381_v34, %v1232_v8 }
 0x4a9   :  { %v1268_v4 = vsel %vm108_vm1, %v1224_v2, 0.0  ;;  %v1302_v45 = vrot.slane %v1287_v57, 7 }
 0x4aa   :  { %v1264_v14 = vrot.slane %v1263_v7, 2  ;;  %v1269_v26 = vrot.slane %v1268_v4, 4  ;;  %v1216_v62 = vpop.permute.xlu0 %1215  ;;  %v1259_v35 = vrot.slane %v1258_v3, 1  ;;  %v1289_v58 = vmul.f32 %v7381_v34, %v1253_v9 }
 0x4ab   :  { %v1225_v10 = vmul.f32 %v1216_v62, %v7178_v21  ;;  %v1303_v20 = vsel %vm966_vm3, %v1302_v45, %v1286_v38 }
 0x4ac   :  { %v1265_v17 = vadd.f32 %v1264_v14, %v1263_v7  ;;  %v1270_v40 = vadd.f32 %v1269_v26, %v1268_v4  ;;  %v1260_v28 = vadd.f32 %v1259_v35, %v1258_v3  ;;  %v1306_v51 = vrot.slane %v1289_v58, 5 }
 0x4ad   :  { %v1275_v44 = vsel %vm108_vm1, %v1225_v10, 0.0  ;;  %v1304_v4 = vrot.slane %v1288_v36, 6 }
 0x4ae   :  { %v1266_v48 = vrot.slane %v1265_v17, 1  ;;  %v1271_v50 = vrot.slane %v1270_v40, 2  ;;  %v1276_v52 = vrot.slane %v1275_v44, 4  ;;  %v1290_v59 = vmul.f32 %v7381_v34, %v1260_v28 }
 0x4af   :  { %v1305_v62 = vsel %vm968_vm4, %v1304_v4, %v1303_v20  ;;  %v7415_v28 = vrot.slane %v7228_v42, %v7314_v61 }
 0x4b0   :  { %v1267_v55 = vadd.f32 %v1266_v48, %v1265_v17  ;;  %v1272_v21 = vadd.f32 %v1271_v50, %v1270_v40  ;;  %v1277_v12 = vadd.f32 %v1276_v52, %v1275_v44  ;;  %v1308_v25 = vrot.slane %v1290_v59, 4 }
 0x4b1   :  { %v1307_v10 = vsel %vm970_vm5, %v1306_v51, %v1305_v62  ;;  %v7404_v48 = vrot.slane %v7228_v42, %v7332_v16 }
 0x4b2   :  { %v1273_v56 = vrot.slane %v1272_v21, 1  ;;  %v1278_v63 = vrot.slane %v1277_v12, 2  ;;  %v1291_v13 = vmul.f32 %v7381_v34, %v1267_v55  ;;  %v1309_v11 = vsel %vm972_vm6, %v1308_v25, %v1307_v10 }
 0x4b4   :  { %v1274_v5 = vadd.f32 %v1273_v56, %v1272_v21  ;;  %v1279_v2 = vadd.f32 %v1278_v63, %v1277_v12  ;;  %v1310_v26 = vrot.slane %v1291_v13, 3 }
 0x4b6   :  { %v1280_v3 = vrot.slane %v1279_v2, 1  ;;  %v1292_v7 = vmul.f32 %v7381_v34, %v1274_v5  ;;  %v1311_v17 = vsel %vm974_vm7, %v1310_v26, %v1309_v11 }
 0x4b8   :  { %v1281_v14 = vadd.f32 %v1280_v3, %v1279_v2  ;;  %v1312_v54 = vrot.slane %v1292_v7, 2 }
 0x4ba   :  { %v1293_v35 = vmul.f32 %v7381_v34, %v1281_v14  ;;  %v1313_v8 = vsel %vm976_vm8, %v1312_v54, %v1311_v17 }
 0x4bc   :  { %v1314_v40 = vrot.slane %v1293_v35, 1 }
 0x4be   :  { %v1315_v44 = vsel %vm978_vm9, %v1314_v40, %v1313_v8 }
 0x4bf   :  { %v1317_v9 = vsel %vm108_vm1, %v1315_v44, 0.0 }
 0x4c0   :  { %1318 = vadd.xlane.f32.xlu1 %v1317_v9 }
 0x4d1   :  { %1340 = vrot.lane.b32.xlu1 %v7240_v49, %s6950_s10 }
 0x54d   :  { %v1319_v50 = vpop.xlane.xlu1 %1318 }
 0x54e   :  { %v1324_v52 = vadd.f32 %v7404_v48, %v1319_v50 }
 0x550   :  { %1327 = vperm.xlu0 %6468, %v1324_v52  }
 0x551   :  { %v1341_v12 = vpop.permute.xlu1 %1340 }
 0x554   :  { %1350 = vrot.lane.b32.xlu0 %v7240_v49, %s6951_s11 }
 0x5cf   :  { %v1328_v57 = vpop.permute.xlu0 %1327 }
 0x5d0   :  { %v1334_v55 = vmul.f32 %v7411_v53, %v1328_v57 }
 0x5d2   :  { %v1339_v21 = vadd.f32 %v7415_v28, %v1334_v55 }
 0x5d3   :  { %v1351_v36 = vpop.permute.xlu0 %1350 }
 0x5d4   :  { %v1343_v38 = vadd.f32 %v1341_v12, %v1339_v21 }
 0x5d6   :  { %v6022_v58 = vmul.f32 -1.442695, %v1343_v38 }
 0x5d8   :  { %6503 = vpow2.f32 %v6022_v58 }
 0x5e2   :  { %v6504_v56 = vpop.eup %6503 }
 0x5e3   :  { %v1347_v63 = vadd.f32 1.0, %v6504_v56 }
 0x5e5   :  { %6505 = vrcp.f32 %v1347_v63 }
 0x5ef   :  { %v6506_v49 = vpop.eup %6505 }
 0x5f0   :  { %v1353_v59 = vmul.f32 %v6506_v49, %v1351_v36  ;;  %v1360_v5 = vsub.f32 1.0, %v6506_v49  ;;  %v1366_v51 = vmul.f32 0.0, %v6506_v49 }
 0x5f2   :  { %1355 = vrot.lane.b32.xlu0 %v1353_v59, %s6952_s3 }
 0x664   :  { %v1356_v42 = vpop.permute.xlu0 %1355 }
 0x665   :  { %v1358_v45 = vadd.f32 %v1356_v42, %v1339_v21 }
 0x667   :  { %6507 = vtanh.f32 %v1358_v45 }
 0x671   :  { %v6508_v13 = vpop.eup %6507 }
 0x672   :  { %1362 = vrot.lane.b32.xlu0 %v6508_v13, %s6950_s10 }
 0x6e4   :  { %v1363_v2 = vpop.permute.xlu0 %1362 }
 0x6e5   :  { %v1365_v3 = vmul.f32 %v1363_v2, %v1360_v5 }
 0x6e7   :  { %v7421_v7 = vadd.f32 %v1366_v51, %v1365_v3 }
 0x6e9   :  { %1369 = vrot.lane.b32.xlu0 %v7421_v7, %s6950_s10 }
 0x75b   :  { %v1370_v20 = vpop.permute.xlu0 %1369 }
 0x75c   :  { %6237 = vmatmul.mubr.msk.f32.vlgmr.msra.gmra.mrb[8].mxu1 %vm108_vm1, %v1370_v20 }
 0x75d   :  { %6411 = vmatpush3.bf16.msra.mxu1 %v7176_v18  ;;  %6258 = vmatprep.mubr.msk.f32.mxu1 %vm6946_vm0, %v8499_v1 }
 0x75e   :  { %6412 = vmatprep.subr.bf16.mxu1 %v8497_v0 }
 0x761   :  { %6414 = vmatpush3.bf16.msra.mxu1 %v7183_v22 }
 0x762   :  { %6421 = vmatprep.subr.bf16.mxu1 %v8497_v0 }
 0x82f   :  { %v1439_v4 = vpop.f32.mrb[8].mxu1 }
 0x830   :  { %v7433_v25 = vadd.f32 %v1439_v4, %v7234_v46  ;;  %v6238_v14 = vpop.f32.mrb[9].mxu1 }
 0x832   :  { %v1444_v26 = vcombine.high %v7433_v25, %v7433_v25  ;;  %v1451_v62 = vrot.slane %v7433_v25, %v7237_v47 }
 0x834   :  { %v1458_v54 = vrot.slane %v1444_v26, %v7237_v47  ;;  %v1459_v35 = vcombine.high %v1451_v62, %v1451_v62  ;;  %v1467_v10 = vrot.slane %v1451_v62, %v7237_v47 }
 0x836   :  { %v1460_v11 = vcombine.high %v1458_v54, %v1458_v54  ;;  %v1474_v17 = vrot.slane %v1458_v54, %v7237_v47  ;;  %v1481_v40 = vrot.slane %v1459_v35, %v7237_v47  ;;  %v1489_v8 = vcombine.high %v1467_v10, %v1467_v10 }
 0x837   :  { %v1496_v44 = vrot.slane %v1467_v10, %v7223_v41 }
 0x838   :  { %v1488_v9 = vrot.slane %v1460_v11, %v7237_v47  ;;  %v1490_v50 = vcombine.high %v1474_v17, %v1474_v17  ;;  %v1491_v52 = vcombine.high %v1481_v40, %v1481_v40  ;;  %v1500_v57 = vrot.slane %v1481_v40, %v7223_v41 }
 0x839   :  { %v1504_v55 = vrot.slane %v1489_v8, %v7223_v41  ;;  %v1512_v21 = vrot.slane %v1474_v17, %v7223_v41  ;;  %v1533_v12 = vadd.f32 %v1496_v44, %v7205_v23 }
 0x83a   :  { %v1492_v38 = vcombine.high %v1488_v9, %v1488_v9  ;;  %v1534_v58 = vadd.f32 %v1500_v57, %v7207_v24  ;;  %v1508_v56 = vrot.slane %v1491_v52, %v7223_v41  ;;  %v1516_v63 = vrot.slane %v1488_v9, %v7223_v41 }
 0x83b   :  { %6509 = vtanh.f32 %v1533_v12  ;;  %v1535_v49 = vadd.f32 %v1504_v55, %v7209_v27  ;;  %v1537_v36 = vadd.f32 %v1512_v21, %v7213_v31  ;;  %v1520_v59 = vrot.slane %v1490_v50, %v7223_v41 }
 0x83c   :  { %6511 = vtanh.f32 %v1534_v58  ;;  %v1536_v42 = vadd.f32 %v1508_v56, %v7211_v29  ;;  %v1538_v45 = vadd.f32 %v1516_v63, %v7215_v33  ;;  %v1524_v13 = vrot.slane %v1492_v38, %v7223_v41 }
 0x83d   :  { %6513 = vtanh.f32 %v1535_v49  ;;  %v1539_v2 = vadd.f32 %v1520_v59, %v7220_v39 }
 0x83e   :  { %6515 = vtanh.f32 %v1536_v42  ;;  %v1540_v5 = vadd.f32 %v1524_v13, %v7230_v43 }
 0x83f   :  { %6517 = vtanh.f32 %v1538_v45 }
 0x840   :  { %6519 = vtanh.f32 %v1537_v36 }
 0x841   :  { %6521 = vtanh.f32 %v1540_v5 }
 0x842   :  { %6523 = vtanh.f32 %v1539_v2 }
 0x845   :  { %v6510_v51 = vpop.eup %6509 }
 0x846   :  { %v6512_v3 = vpop.eup %6511  ;;  %v1549_v20 = vmul.f32 %v6510_v51, %v7272_v37 }
 0x847   :  { %v6514_v4 = vpop.eup %6513  ;;  %v1550_v14 = vmul.f32 %v6512_v3, %v7272_v37 }
 0x848   :  { %v6516_v26 = vpop.eup %6515  ;;  %v1557_v62 = vsel %vm108_vm1, %v1549_v20, 0.0  ;;  %v1551_v11 = vmul.f32 %v6514_v4, %v7272_v37 }
 0x849   :  { %v6518_v54 = vpop.eup %6517  ;;  %1558 = vadd.xlane.f32.xlu1 %v1557_v62  ;;  %v1560_v35 = vsel %vm108_vm1, %v1550_v14, 0.0  ;;  %v1552_v10 = vmul.f32 %v6516_v26, %v7272_v37 }
 0x84a   :  { %v6520_v17 = vpop.eup %6519  ;;  %1561 = vadd.xlane.f32.xlu0 %v1560_v35  ;;  %v1554_v8 = vmul.f32 %v6518_v54, %v7272_v37  ;;  %v1563_v9 = vsel %vm108_vm1, %v1551_v11, 0.0 }
 0x84b   :  { %v1566_v40 = vsel %vm108_vm1, %v1552_v10, 0.0  ;;  %v6522_v44 = vpop.eup %6521  ;;  %v1553_v50 = vmul.f32 %v6520_v17, %v7272_v37 }
 0x84c   :  { %v6524_v52 = vpop.eup %6523  ;;  %v1572_v57 = vsel %vm108_vm1, %v1554_v8, 0.0  ;;  %v1556_v55 = vmul.f32 %v6522_v44, %v7272_v37 }
 0x84d   :  { %1567 = vadd.xlane.f32.xlu1 %v1566_v40  ;;  %v1569_v21 = vsel %vm108_vm1, %v1553_v50, 0.0  ;;  %v1555_v12 = vmul.f32 %v6524_v52, %v7272_v37 }
 0x84e   :  { %1564 = vadd.xlane.f32.xlu0 %v1563_v9  ;;  %v1578_v38 = vsel %vm108_vm1, %v1556_v55, 0.0 }
 0x84f   :  { %v1575_v58 = vsel %vm108_vm1, %v1555_v12, 0.0 }
 0x851   :  { %1573 = vadd.xlane.f32.xlu1 %v1572_v57 }
 0x852   :  { %1570 = vadd.xlane.f32.xlu0 %v1569_v21 }
 0x855   :  { %1579 = vadd.xlane.f32.xlu1 %v1578_v38 }
 0x856   :  { %1576 = vadd.xlane.f32.xlu0 %v1575_v58 }
 0x8d6   :  { %v1559_v56 = vpop.xlane.xlu1 %1558 }
 0x8d7   :  { %v1562_v63 = vpop.xlane.xlu0 %1561  ;;  %v1592_v59 = vrot.slane %v1559_v56, %v7292_v15 }
 0x8d8   :  { %v1596_v49 = vrot.slane %v1562_v63, %v7292_v15 }
 0x8da   :  { %v1568_v36 = vpop.xlane.xlu1 %1567  ;;  %v1621_v13 = vsel %vm966_vm3, %v1596_v49, %v1592_v59 }
 0x8db   :  { %v1565_v42 = vpop.xlane.xlu0 %1564  ;;  %v1604_v51 = vrot.slane %v1568_v36, %v7292_v15 }
 0x8dc   :  { %v1600_v45 = vrot.slane %v1565_v42, %v7292_v15 }
 0x8de   :  { %v1622_v5 = vsel %vm968_vm4, %v1600_v45, %v1621_v13  ;;  %v1574_v2 = vpop.xlane.xlu1 %1573 }
 0x8df   :  { %v1571_v3 = vpop.xlane.xlu0 %1570  ;;  %v1623_v4 = vsel %vm970_vm5, %v1604_v51, %v1622_v5  ;;  %v1612_v62 = vrot.slane %v1574_v2, %v7292_v15 }
 0x8e0   :  { %v1608_v20 = vrot.slane %v1571_v3, %v7292_v15 }
 0x8e2   :  { %v1624_v14 = vsel %vm972_vm6, %v1608_v20, %v1623_v4  ;;  %v1580_v26 = vpop.xlane.xlu1 %1579 }
 0x8e3   :  { %v1577_v54 = vpop.xlane.xlu0 %1576  ;;  %v1620_v10 = vrot.slane %v1580_v26, %v7292_v15  ;;  %v1625_v11 = vsel %vm974_vm7, %v1612_v62, %v1624_v14 }
 0x8e4   :  { %v1616_v35 = vrot.slane %v1577_v54, %v7292_v15 }
 0x8e6   :  { %v1626_v17 = vsel %vm976_vm8, %v1616_v35, %v1625_v11 }
 0x8e7   :  { %v1627_v40 = vsel %vm978_vm9, %v1620_v10, %v1626_v17 }
 0x8e8   :  { %v1629_v8 = vsel %vm981_vm10, %v1627_v40, -inf }
 0x8e9   :  { %1630 = vmax.xlane.f32.xlu0 %v1629_v8 }
 0x976   :  { %v1631_v44 = vpop.xlane.xlu0 %1630 }
 0x977   :  { %v1636_v9 = vrot.slane %v1631_v44, %v7223_v41  ;;  %v1640_v50 = vrot.slane %v1631_v44, %v7311_v60  ;;  %v1644_v52 = vrot.slane %v1631_v44, %v7314_v61  ;;  %v1652_v57 = vrot.slane %v1631_v44, %v7320_v6 }
 0x978   :  { %v1660_v55 = vrot.slane %v1631_v44, %v7328_v19  ;;  %v1648_v38 = vrot.slane %v1631_v44, %v7266_v30  ;;  %v1656_v51 = vrot.slane %v1631_v44, %v7324_v32  ;;  %v1664_v62 = vrot.slane %v1631_v44, %v7332_v16 }
 0x979   :  { %v1674_v21 = vsub.f32 %v1562_v63, %v1640_v50  ;;  %v1673_v12 = vsub.f32 %v1559_v56, %v1636_v9  ;;  %v1677_v58 = vsub.f32 %v1571_v3, %v1652_v57  ;;  %v1675_v49 = vsub.f32 %v1565_v42, %v1644_v52 }
 0x97a   :  { %v1679_v5 = vsub.f32 %v1577_v54, %v1660_v55  ;;  %v1676_v4 = vsub.f32 %v1568_v36, %v1648_v38  ;;  %v1678_v63 = vsub.f32 %v1574_v2, %v1656_v51  ;;  %v1680_v3 = vsub.f32 %v1580_v26, %v1664_v62 }
 0x97b   :  { %v1683_v59 = vmul.f32 1.442695, %v1674_v21  ;;  %v1681_v45 = vmul.f32 1.442695, %v1673_v12  ;;  %v1689_v13 = vmul.f32 1.442695, %v1677_v58 }
 0x97c   :  { %v1685_v20 = vmul.f32 1.442695, %v1675_v49  ;;  %v1693_v14 = vmul.f32 1.442695, %v1679_v5  ;;  %v1687_v56 = vmul.f32 1.442695, %v1676_v4 }
 0x97d   :  { %6525 = vpow2.f32 %v1683_v59  ;;  %v1691_v42 = vmul.f32 1.442695, %v1678_v63  ;;  %v1695_v54 = vmul.f32 1.442695, %v1680_v3 }
 0x97e   :  { %6527 = vpow2.f32 %v1681_v45 }
 0x97f   :  { %6529 = vpow2.f32 %v1689_v13 }
 0x980   :  { %6531 = vpow2.f32 %v1685_v20 }
 0x981   :  { %6533 = vpow2.f32 %v1693_v14 }
 0x982   :  { %6535 = vpow2.f32 %v1687_v56 }
 0x983   :  { %6537 = vpow2.f32 %v1691_v42 }
 0x984   :  { %6539 = vpow2.f32 %v1695_v54 }
 0x987   :  { %v6526_v35 = vpop.eup %6525 }
 0x988   :  { %v6528_v10 = vpop.eup %6527  ;;  %1709 = vperm.xlu0 %6468, %v6526_v35  }
 0x989   :  { %1706 = vperm.xlu1 %6467, %v6528_v10   ;;  %v6530_v11 = vpop.eup %6529 }
 0x98a   :  { %v6532_v17 = vpop.eup %6531 }
 0x98b   :  { %v6534_v36 = vpop.eup %6533 }
 0x98c   :  { %1718 = vperm.xlu0 %6468, %v6530_v11   ;;  %v6536_v40 = vpop.eup %6535 }
 0x98d   :  { %1712 = vperm.xlu1 %6467, %v6532_v17   ;;  %v6538_v2 = vpop.eup %6537 }
 0x98e   :  { %v6540_v8 = vpop.eup %6539 }
 0x990   :  { %1724 = vperm.xlu0 %6468, %v6534_v36  }
 0x991   :  { %1715 = vperm.xlu1 %6467, %v6536_v40  }
 0x995   :  { %1721 = vperm.xlu1 %6467, %v6538_v2  }
 0x999   :  { %1727 = vperm.xlu1 %6467, %v6540_v8  }
 0xa07   :  { %v1710_v44 = vpop.permute.xlu0 %1709 }
 0xa08   :  { %v1707_v26 = vpop.permute.xlu1 %1706  ;;  %v1736_v50 = vrot.slane %v1710_v44, %v7292_v15 }
 0xa09   :  { %v1732_v52 = vrot.slane %v1707_v26, %v7292_v15 }
 0xa0b   :  { %v1719_v55 = vpop.permute.xlu0 %1718  ;;  %v1761_v12 = vsel %vm966_vm3, %v1736_v50, %v1732_v52 }
 0xa0c   :  { %v1713_v9 = vpop.permute.xlu1 %1712  ;;  %v1748_v59 = vrot.slane %v1719_v55, %v7292_v15 }
 0xa0d   :  { %v1740_v57 = vrot.slane %v1713_v9, %v7292_v15 }
 0xa0f   :  { %v1762_v58 = vsel %vm968_vm4, %v1740_v57, %v1761_v12  ;;  %v1725_v13 = vpop.permute.xlu0 %1724 }
 0xa10   :  { %v1716_v21 = vpop.permute.xlu1 %1715  ;;  %v1756_v4 = vrot.slane %v1725_v13, %v7292_v15 }
 0xa11   :  { %v1744_v38 = vrot.slane %v1716_v21, %v7292_v15 }
 0xa13   :  { %v1763_v49 = vsel %vm970_vm5, %v1744_v38, %v1762_v58 }
 0xa14   :  { %v1722_v45 = vpop.permute.xlu1 %1721  ;;  %v1764_v51 = vsel %vm972_vm6, %v1748_v59, %v1763_v49 }
 0xa15   :  { %v1752_v5 = vrot.slane %v1722_v45, %v7292_v15 }
 0xa17   :  { %v1765_v20 = vsel %vm974_vm7, %v1752_v5, %v1764_v51 }
 0xa18   :  { %v1728_v14 = vpop.permute.xlu1 %1727  ;;  %v1766_v56 = vsel %vm976_vm8, %v1756_v4, %v1765_v20  ;;  %v7524_v20 = vld [vmem:[#allocation2 + $0x8] sm:$0xff] }
 0xa19   :  { %v1760_v62 = vrot.slane %v1728_v14, %v7292_v15 }
 0xa1b   :  { %v1767_v63 = vsel %vm978_vm9, %v1760_v62, %v1766_v56  ;;  %v7531_v56 = vld [vmem:[#allocation2] sm:$0xff] }
 0xa1c   :  { %v1769_v42 = vsel %vm981_vm10, %v1767_v63, 0.0 }
 0xa1d   :  { %1770 = vadd.xlane.f32.xlu0 %v1769_v42 }
 0xaaa   :  { %v1771_v3 = vpop.xlane.xlu0 %1770 }
 0xaab   :  { %6541 = vrcp.f32 %v1771_v3 }
 0xab5   :  { %v6542_v54 = vpop.eup %6541 }
 0xab6   :  { %v1773_v26 = vmul.f32 %v6542_v54, %v1771_v3 }
 0xab8   :  { %v1774_v44 = vsub.f32 2.0, %v1773_v26 }
 0xaba   :  { %v1775_v9 = vmul.f32 %v6542_v54, %v1774_v44  ;;  %v7536_v44 = vld [vmem:[#allocation2 + $0x18] sm:$0xff] }
 0xabb   :  { %8518 = vst [vmem:[#allocation13_spill] sm:$0xff] %v7536_v44 }
 0xabc   :  { %v1784_v50 = vrot.slane %v1775_v9, %v7311_v60  ;;  %v1788_v57 = vrot.slane %v1775_v9, %v7314_v61  ;;  %v1780_v21 = vrot.slane %v1775_v9, %v7223_v41  ;;  %v1792_v38 = vrot.slane %v1775_v9, %v7266_v30 }
 0xabd   :  { %v1796_v49 = vrot.slane %v1775_v9, %v7320_v6  ;;  %v1800_v45 = vrot.slane %v1775_v9, %v7324_v32  ;;  %v1804_v13 = vrot.slane %v1775_v9, %v7328_v19  ;;  %v1808_v5 = vrot.slane %v1775_v9, %v7332_v16 }
 0xabe   :  { %v1818_v52 = vmul.f32 %v6526_v35, %v1784_v50  ;;  %v1819_v55 = vmul.f32 %v6532_v17, %v1788_v57  ;;  %v1817_v12 = vmul.f32 %v6528_v10, %v1780_v21  ;;  %v1820_v58 = vmul.f32 %v6536_v40, %v1792_v38  ;;  %v7540_v38 = vld [vmem:[#allocation2 + $0x20] sm:$0xff] }
 0xabf   :  { %v1821_v59 = vmul.f32 %v6530_v11, %v1796_v49  ;;  %v1822_v35 = vmul.f32 %v6538_v2, %v1800_v45  ;;  %v1823_v17 = vmul.f32 %v6534_v36, %v1804_v13  ;;  %v1824_v10 = vmul.f32 %v6540_v8, %v1808_v5  ;;  %v7527_v11 = vld [vmem:[#allocation2 + $0x10] sm:$0xff]  ;;  %8519 = vst [vmem:[#allocation14_spill] sm:$0xff] %v7540_v38 }
 0xac0   :  { %1832 = vperm.xlu1 %6467, %v1818_v52  }
 0xac4   :  { %1837 = vperm.xlu1 %6467, %v1819_v55  }
 0xac8   :  { %1827 = vperm.xlu1 %6467, %v1817_v12  }
 0xacc   :  { %1842 = vperm.xlu1 %6467, %v1820_v58  }
 0xad0   :  { %1847 = vperm.xlu1 %6467, %v1821_v59  }
 0xad4   :  { %1852 = vperm.xlu1 %6467, %v1822_v35  }
 0xad8   :  { %1857 = vperm.xlu1 %6467, %v1823_v17  }
 0xadc   :  { %1862 = vperm.xlu1 %6467, %v1824_v10  }
 0xb3f   :  { %v1833_v51 = vpop.permute.xlu1 %1832 }
 0xb40   :  { %v1866_v40 = vmul.f32 %v7524_v20, %v1833_v51  ;;  %v7544_v51 = vld [vmem:[#allocation2 + $0x28] sm:$0xff] }
 0xb41   :  { %8520 = vst [vmem:[#allocation15_spill] sm:$0xff] %v7544_v51 }
 0xb42   :  { %v1880_v2 = vsel %vm108_vm1, %v1866_v40, 0.0 }
 0xb43   :  { %v1838_v4 = vpop.permute.xlu1 %1837  ;;  %v1881_v63 = vrot.slane %v1880_v2, 4 }
 0xb44   :  { %v1867_v14 = vmul.f32 %v7527_v11, %v1838_v4 }
 0xb45   :  { %v1882_v50 = vadd.f32 %v1881_v63, %v1880_v2 }
 0xb46   :  { %v1887_v8 = vsel %vm108_vm1, %v1867_v14, 0.0 }
 0xb47   :  { %v1828_v62 = vpop.permute.xlu1 %1827  ;;  %v1888_v26 = vrot.slane %v1887_v8, 4  ;;  %v1883_v49 = vrot.slane %v1882_v50, 2 }
 0xb48   :  { %v1865_v36 = vmul.f32 %v7531_v56, %v1828_v62 }
 0xb49   :  { %v1889_v12 = vadd.f32 %v1888_v26, %v1887_v8  ;;  %v1884_v4 = vadd.f32 %v1883_v49, %v1882_v50 }
 0xb4a   :  { %v1873_v42 = vsel %vm108_vm1, %v1865_v36, 0.0 }
 0xb4b   :  { %v1874_v3 = vrot.slane %v1873_v42, 4  ;;  %v1843_v54 = vpop.permute.xlu1 %1842  ;;  %v1890_v10 = vrot.slane %v1889_v12, 2 }
 0xb4c   :  { %v1868_v9 = vmul.f32 %v7536_v44, %v1843_v54  ;;  %v7548_v54 = vld [vmem:[#allocation2 + $0x30] sm:$0xff] }
 0xb4d   :  { %v1875_v52 = vadd.f32 %v1874_v3, %v1873_v42  ;;  %v1891_v3 = vadd.f32 %v1890_v10, %v1889_v12  ;;  %8521 = vst [vmem:[#allocation16_spill] sm:$0xff] %v7548_v54 }
 0xb4e   :  { %v1894_v57 = vsel %vm108_vm1, %v1868_v9, 0.0  ;;  %v1885_v9 = vrot.slane %v1884_v4, 1 }
 0xb4f   :  { %v1895_v55 = vrot.slane %v1894_v57, 4  ;;  %v1848_v21 = vpop.permute.xlu1 %1847  ;;  %v1876_v45 = vrot.slane %v1875_v52, 2 }
 0xb50   :  { %v1869_v58 = vmul.f32 %v7540_v38, %v1848_v21 }
 0xb51   :  { %v1896_v59 = vadd.f32 %v1895_v55, %v1894_v57  ;;  %v1877_v2 = vadd.f32 %v1876_v45, %v1875_v52 }
 0xb52   :  { %v1901_v35 = vsel %vm108_vm1, %v1869_v58, 0.0 }
 0xb53   :  { %v1897_v13 = vrot.slane %v1896_v59, 2  ;;  %v1902_v17 = vrot.slane %v1901_v35, 4  ;;  %v1853_v5 = vpop.permute.xlu1 %1852  ;;  %v1878_v21 = vrot.slane %v1877_v2, 1 }
 0xb54   :  { %v1870_v40 = vmul.f32 %v7544_v51, %v1853_v5 }
 0xb55   :  { %v1903_v14 = vadd.f32 %v1902_v17, %v1901_v35  ;;  %v1898_v36 = vadd.f32 %v1897_v13, %v1896_v59  ;;  %v1892_v35 = vrot.slane %v1891_v3, 1  ;;  %v7552_v13 = vld [vmem:[#allocation2 + $0x38] sm:$0xff]  ;;  %v1886_v17 = vadd.f32 %v1885_v9, %v1884_v4 }
 0xb56   :  { %v1908_v62 = vsel %vm108_vm1, %v1870_v40, 0.0  ;;  %v1879_v40 = vadd.f32 %v1878_v21, %v1877_v2 }
 0xb57   :  { %v1904_v63 = vrot.slane %v1903_v14, 2  ;;  %v1909_v8 = vrot.slane %v1908_v62, 4  ;;  %v1858_v42 = vpop.permute.xlu1 %1857  ;;  %v1899_v50 = vrot.slane %v1898_v36, 1  ;;  %v1930_v1 = vmul.f32 %v1886_v17, %v7381_v34 }
 0xb58   :  { %v1871_v26 = vmul.f32 %v7548_v54, %v1858_v42  ;;  %v1929_v44 = vmul.f32 %v1879_v40, %v7381_v34 }
 0xb59   :  { %v1905_v57 = vadd.f32 %v1904_v63, %v1903_v14  ;;  %v1910_v55 = vadd.f32 %v1909_v8, %v1908_v62  ;;  %v1900_v62 = vadd.f32 %v1899_v50, %v1898_v36  ;;  %v1945_v21 = vrot.slane %v1930_v1, 7 }
 0xb5a   :  { %v1915_v58 = vsel %vm108_vm1, %v1871_v26, 0.0  ;;  %v1893_v26 = vadd.f32 %v1892_v35, %v1891_v3 }
 0xb5b   :  { %v1911_v49 = vrot.slane %v1910_v55, 2  ;;  %v1916_v52 = vrot.slane %v1915_v58, 4  ;;  %v1863_v45 = vpop.permute.xlu1 %1862  ;;  %v1906_v59 = vrot.slane %v1905_v57, 1  ;;  %v1932_v4 = vmul.f32 %v1900_v62, %v7381_v34 }
 0xb5c   :  { %v1872_v12 = vmul.f32 %v7552_v13, %v1863_v45  ;;  %v1931_v2 = vmul.f32 %v1893_v26, %v7381_v34  ;;  %v1946_v45 = vsel %vm966_vm3, %v1945_v21, %v1929_v44 }
 0xb5d   :  { %v1912_v5 = vadd.f32 %v1911_v49, %v1910_v55  ;;  %v1917_v10 = vadd.f32 %v1916_v52, %v1915_v58  ;;  %v1907_v0 = vadd.f32 %v1906_v59, %v1905_v57  ;;  %v1949_v50 = vrot.slane %v1932_v4, 5 }
 0xb5e   :  { %v1922_v14 = vsel %vm108_vm1, %v1872_v12, 0.0  ;;  %v1947_v35 = vrot.slane %v1931_v2, 6 }
 0xb5f   :  { %v1913_v63 = vrot.slane %v1912_v5, 1  ;;  %v1918_v8 = vrot.slane %v1917_v10, 2  ;;  %v1923_v42 = vrot.slane %v1922_v14, 4  ;;  %v1933_v36 = vmul.f32 %v1907_v0, %v7381_v34 }
 0xb61   :  { %v1914_v54 = vadd.f32 %v1913_v63, %v1912_v5  ;;  %v1919_v51 = vadd.f32 %v1918_v8, %v1917_v10  ;;  %v1924_v38 = vadd.f32 %v1923_v42, %v1922_v14  ;;  %v1951_v59 = vrot.slane %v1933_v36, 4 }
 0xb62   :  { %v1948_v5 = vsel %vm968_vm4, %v1947_v35, %v1946_v45 }
 0xb63   :  { %v1920_v9 = vrot.slane %v1919_v51, 1  ;;  %v1925_v55 = vrot.slane %v1924_v38, 2  ;;  %v1934_v58 = vmul.f32 %v1914_v54, %v7381_v34  ;;  %v1950_v1 = vsel %vm970_vm5, %v1949_v50, %v1948_v5 }
 0xb64   :  { %v8523_v5 = vmov 0.0|0.0  }
 0xb65   :  { %v1921_v3 = vadd.f32 %v1920_v9, %v1919_v51  ;;  %v1926_v57 = vadd.f32 %v1925_v55, %v1924_v38  ;;  %v1953_v17 = vrot.slane %v1934_v58, 3  ;;  %v1952_v51 = vsel %vm972_vm6, %v1951_v59, %v1950_v1 }
 0xb67   :  { %v1927_v49 = vrot.slane %v1926_v57, 1  ;;  %v1935_v52 = vmul.f32 %v1921_v3, %v7381_v34  ;;  %v1954_v38 = vsel %vm974_vm7, %v1953_v17, %v1952_v51  ;;  %v8522_v17 = vmov 0.0  }
 0xb69   :  { %v1928_v12 = vadd.f32 %v1927_v49, %v1926_v57  ;;  %v1955_v10 = vrot.slane %v1935_v52, 2 }
 0xb6b   :  { %v1936_v0 = vmul.f32 %v1928_v12, %v7381_v34  ;;  %v1956_v40 = vsel %vm976_vm8, %v1955_v10, %v1954_v38 }
 0xb6d   :  { %v1957_v54 = vrot.slane %v1936_v0, 1 }
 0xb6f   :  { %v1958_v44 = vsel %vm978_vm9, %v1957_v54, %v1956_v40 }
 0xb70   :  { %v1960_v14 = vsel %vm108_vm1, %v1958_v44, 0.0 }
 0xb71   :  { %1961 = vadd.xlane.f32.xlu0 %v1960_v14 }
 0xb87   :  { %1971 = vrot.lane.b32.xlu0 %v7433_v25, %s6950_s10 }
 0xbfe   :  { %v1962_v62 = vpop.xlane.xlu0 %1961 }
 0xbff   :  { %v1963_v63 = vadd.f32 %v1962_v62, %v7404_v48 }
 0xc01   :  { %1966 = vperm.xlu1 %6467, %v1963_v63  }
 0xc02   :  { %v1972_v4 = vpop.permute.xlu0 %1971 }
 0xc05   :  { %1981 = vrot.lane.b32.xlu1 %v7433_v25, %s6951_s11 }
 0xc80   :  { %v1967_v8 = vpop.permute.xlu1 %1966 }
 0xc81   :  { %v1969_v42 = vmul.f32 %v1967_v8, %v7411_v53 }
 0xc83   :  { %v1970_v26 = vadd.f32 %v1969_v42, %v7415_v28 }
 0xc84   :  { %v1982_v58 = vpop.permute.xlu1 %1981 }
 0xc85   :  { %v1974_v9 = vadd.f32 %v1972_v4, %v1970_v26 }
 0xc87   :  { %v6024_v55 = vmul.f32 -1.442695, %v1974_v9 }
 0xc89   :  { %6543 = vpow2.f32 %v6024_v55 }
 0xc93   :  { %v6544_v2 = vpop.eup %6543 }
 0xc94   :  { %v1978_v36 = vadd.f32 1.0, %v6544_v2 }
 0xc96   :  { %6545 = vrcp.f32 %v1978_v36 }
 0xca0   :  { %v6546_v21 = vpop.eup %6545 }
 0xca1   :  { %v1984_v3 = vmul.f32 %v6546_v21, %v1982_v58  ;;  %v1991_v49 = vsub.f32 1.0, %v6546_v21  ;;  %v1997_v45 = vmul.f32 %v6546_v21, %v7421_v7 }
 0xca3   :  { %1986 = vrot.lane.b32.xlu1 %v1984_v3, %s6952_s3 }
 0xd15   :  { %v1987_v57 = vpop.permute.xlu1 %1986 }
 0xd16   :  { %v1989_v50 = vadd.f32 %v1987_v57, %v1970_v26 }
 0xd18   :  { %6547 = vtanh.f32 %v1989_v50 }
 0xd22   :  { %v6548_v25 = vpop.eup %6547 }
 0xd23   :  { %1993 = vrot.lane.b32.xlu1 %v6548_v25, %s6950_s10 }
 0xd95   :  { %v1994_v52 = vpop.permute.xlu1 %1993 }
 0xd96   :  { %v1996_v35 = vmul.f32 %v1994_v52, %v1991_v49 }
 0xd98   :  { %v7582_v59 = vadd.f32 %v1997_v45, %v1996_v35 }
 0xd9a   :  { %2000 = vrot.lane.b32.xlu1 %v7582_v59, %s6950_s10 }
 0xe0c   :  { %v2001_v12 = vpop.permute.xlu1 %2000 }
 0xe0d   :  { %6248 = vmatmul.mubr.msk.f32.vlgmr.msra.gmra.mrb[10].mxu0 %vm108_vm1, %v2001_v12 }
 0xe0e   :  { %6417 = vmatpush3.bf16.msra.mxu0 %v7176_v18  ;;  %6269 = vmatprep.mubr.msk.f32.mxu0 %vm6946_vm0, %v8522_v17 }
 0xe0f   :  { %6418 = vmatprep.subr.bf16.mxu0 %v8523_v5 }
 0xe12   :  { %6420 = vmatpush3.bf16.msra.mxu0 %v7183_v22 }
 0xe13   :  { %6427 = vmatprep.subr.bf16.mxu0 %v8523_v5 }
 0xee0   :  { %v2070_v7 = vpop.f32.mrb[10].mxu0 }
 0xee1   :  { %v7594_v10 = vadd.f32 %v2070_v7, %v7234_v46  ;;  %v6249_v0 = vpop.f32.mrb[11].mxu0 }
 0xee3   :  { %v2075_v1 = vcombine.high %v7594_v10, %v7594_v10  ;;  %v2082_v51 = vrot.slane %v7594_v10, %v7237_v47 }
 0xee5   :  { %v2089_v38 = vrot.slane %v2075_v1, %v7237_v47  ;;  %v2090_v54 = vcombine.high %v2082_v51, %v2082_v51  ;;  %v2098_v40 = vrot.slane %v2082_v51, %v7237_v47 }
 0xee7   :  { %v2091_v44 = vcombine.high %v2089_v38, %v2089_v38  ;;  %v2105_v14 = vrot.slane %v2089_v38, %v7237_v47  ;;  %v2112_v62 = vrot.slane %v2090_v54, %v7237_v47  ;;  %v2120_v63 = vcombine.high %v2098_v40, %v2098_v40 }
 0xee8   :  { %v2127_v8 = vrot.slane %v2098_v40, %v7223_v41 }
 0xee9   :  { %v2119_v42 = vrot.slane %v2091_v44, %v7237_v47  ;;  %v2121_v26 = vcombine.high %v2105_v14, %v2105_v14  ;;  %v2122_v4 = vcombine.high %v2112_v62, %v2112_v62  ;;  %v2131_v9 = vrot.slane %v2112_v62, %v7223_v41 }
 0xeea   :  { %v2135_v55 = vrot.slane %v2120_v63, %v7223_v41  ;;  %v2143_v2 = vrot.slane %v2105_v14, %v7223_v41  ;;  %v2164_v36 = vadd.f32 %v2127_v8, %v7205_v23 }
 0xeeb   :  { %v2123_v21 = vcombine.high %v2119_v42, %v2119_v42  ;;  %v2165_v58 = vadd.f32 %v2131_v9, %v7207_v24  ;;  %v2139_v3 = vrot.slane %v2122_v4, %v7223_v41  ;;  %v2147_v57 = vrot.slane %v2119_v42, %v7223_v41 }
 0xeec   :  { %6549 = vtanh.f32 %v2164_v36  ;;  %v2166_v50 = vadd.f32 %v2135_v55, %v7209_v27  ;;  %v2168_v25 = vadd.f32 %v2143_v2, %v7213_v31  ;;  %v2151_v49 = vrot.slane %v2121_v26, %v7223_v41 }
 0xeed   :  { %6551 = vtanh.f32 %v2165_v58  ;;  %v2167_v52 = vadd.f32 %v2139_v3, %v7211_v29  ;;  %v2169_v45 = vadd.f32 %v2147_v57, %v7215_v33  ;;  %v2155_v35 = vrot.slane %v2123_v21, %v7223_v41 }
 0xeee   :  { %6553 = vtanh.f32 %v2166_v50  ;;  %v2170_v7 = vadd.f32 %v2151_v49, %v7220_v39 }
 0xeef   :  { %6555 = vtanh.f32 %v2167_v52  ;;  %v2171_v12 = vadd.f32 %v2155_v35, %v7230_v43 }
 0xef0   :  { %6557 = vtanh.f32 %v2169_v45 }
 0xef1   :  { %6559 = vtanh.f32 %v2168_v25 }
 0xef2   :  { %6561 = vtanh.f32 %v2171_v12 }
 0xef3   :  { %6563 = vtanh.f32 %v2170_v7 }
 0xef6   :  { %v6550_v0 = vpop.eup %6549 }
 0xef7   :  { %v6552_v1 = vpop.eup %6551  ;;  %v2180_v51 = vmul.f32 %v6550_v0, %v7272_v37 }
 0xef8   :  { %v6554_v38 = vpop.eup %6553  ;;  %v2181_v54 = vmul.f32 %v6552_v1, %v7272_v37 }
 0xef9   :  { %v6556_v40 = vpop.eup %6555  ;;  %v2188_v44 = vsel %vm108_vm1, %v2180_v51, 0.0  ;;  %v2182_v8 = vmul.f32 %v6554_v38, %v7272_v37 }
 0xefa   :  { %v6558_v14 = vpop.eup %6557  ;;  %2189 = vadd.xlane.f32.xlu1 %v2188_v44  ;;  %v2191_v62 = vsel %vm108_vm1, %v2181_v54, 0.0  ;;  %v2183_v63 = vmul.f32 %v6556_v40, %v7272_v37 }
 0xefb   :  { %v6560_v42 = vpop.eup %6559  ;;  %2192 = vadd.xlane.f32.xlu0 %v2191_v62  ;;  %v2185_v4 = vmul.f32 %v6558_v14, %v7272_v37  ;;  %v2194_v55 = vsel %vm108_vm1, %v2182_v8, 0.0 }
 0xefc   :  { %v2197_v26 = vsel %vm108_vm1, %v2183_v63, 0.0  ;;  %v6562_v9 = vpop.eup %6561  ;;  %v2184_v2 = vmul.f32 %v6560_v42, %v7272_v37 }
 0xefd   :  { %v6564_v36 = vpop.eup %6563  ;;  %v2203_v21 = vsel %vm108_vm1, %v2185_v4, 0.0  ;;  %v2187_v58 = vmul.f32 %v6562_v9, %v7272_v37 }
 0xefe   :  { %2198 = vadd.xlane.f32.xlu1 %v2197_v26  ;;  %v2200_v3 = vsel %vm108_vm1, %v2184_v2, 0.0  ;;  %v2186_v57 = vmul.f32 %v6564_v36, %v7272_v37 }
 0xeff   :  { %2195 = vadd.xlane.f32.xlu0 %v2194_v55  ;;  %v2209_v50 = vsel %vm108_vm1, %v2187_v58, 0.0 }
 0xf00   :  { %v2206_v25 = vsel %vm108_vm1, %v2186_v57, 0.0 }
 0xf02   :  { %2204 = vadd.xlane.f32.xlu1 %v2203_v21 }
 0xf03   :  { %2201 = vadd.xlane.f32.xlu0 %v2200_v3 }
 0xf06   :  { %2210 = vadd.xlane.f32.xlu1 %v2209_v50 }
 0xf07   :  { %2207 = vadd.xlane.f32.xlu0 %v2206_v25 }
 0xf87   :  { %v2190_v49 = vpop.xlane.xlu1 %2189 }
 0xf88   :  { %v2193_v52 = vpop.xlane.xlu0 %2192  ;;  %v2223_v12 = vrot.slane %v2190_v49, %v7292_v15 }
 0xf89   :  { %v2227_v45 = vrot.slane %v2193_v52, %v7292_v15 }
 0xf8b   :  { %v2199_v35 = vpop.xlane.xlu1 %2198  ;;  %v2252_v1 = vsel %vm966_vm3, %v2227_v45, %v2223_v12 }
 0xf8c   :  { %v2196_v7 = vpop.xlane.xlu0 %2195  ;;  %v2235_v54 = vrot.slane %v2199_v35, %v7292_v15 }
 0xf8d   :  { %v2231_v0 = vrot.slane %v2196_v7, %v7292_v15 }
 0xf8f   :  { %v2253_v51 = vsel %vm968_vm4, %v2231_v0, %v2252_v1  ;;  %v2205_v38 = vpop.xlane.xlu1 %2204 }
 0xf90   :  { %v2202_v40 = vpop.xlane.xlu0 %2201  ;;  %v2254_v14 = vsel %vm970_vm5, %v2235_v54, %v2253_v51  ;;  %v2243_v8 = vrot.slane %v2205_v38, %v7292_v15 }
 0xf91   :  { %v2239_v44 = vrot.slane %v2202_v40, %v7292_v15 }
 0xf93   :  { %v2255_v62 = vsel %vm972_vm6, %v2239_v44, %v2254_v14  ;;  %v2211_v63 = vpop.xlane.xlu1 %2210 }
 0xf94   :  { %v2208_v42 = vpop.xlane.xlu0 %2207  ;;  %v2251_v4 = vrot.slane %v2211_v63, %v7292_v15  ;;  %v2256_v9 = vsel %vm974_vm7, %v2243_v8, %v2255_v62 }
 0xf95   :  { %v2247_v26 = vrot.slane %v2208_v42, %v7292_v15 }
 0xf97   :  { %v2257_v55 = vsel %vm976_vm8, %v2247_v26, %v2256_v9 }
 0xf98   :  { %v2258_v2 = vsel %vm978_vm9, %v2251_v4, %v2257_v55 }
 0xf99   :  { %v2260_v36 = vsel %vm981_vm10, %v2258_v2, -inf }
 0xf9a   :  { %2261 = vmax.xlane.f32.xlu0 %v2260_v36 }
0x1027   :  { %v2262_v21 = vpop.xlane.xlu0 %2261 }
0x1028   :  { %v2267_v58 = vrot.slane %v2262_v21, %v7223_v41  ;;  %v2271_v3 = vrot.slane %v2262_v21, %v7311_v60  ;;  %v2275_v57 = vrot.slane %v2262_v21, %v7314_v61  ;;  %v2283_v50 = vrot.slane %v2262_v21, %v7320_v6 }
0x1029   :  { %v2291_v25 = vrot.slane %v2262_v21, %v7328_v19  ;;  %v2279_v0 = vrot.slane %v2262_v21, %v7266_v30  ;;  %v2287_v8 = vrot.slane %v2262_v21, %v7324_v32  ;;  %v2295_v55 = vrot.slane %v2262_v21, %v7332_v16 }
0x102a   :  { %v2305_v45 = vsub.f32 %v2193_v52, %v2271_v3  ;;  %v2304_v12 = vsub.f32 %v2190_v49, %v2267_v58  ;;  %v2308_v1 = vsub.f32 %v2202_v40, %v2283_v50  ;;  %v2306_v51 = vsub.f32 %v2196_v7, %v2275_v57 }
0x102b   :  { %v2310_v62 = vsub.f32 %v2208_v42, %v2291_v25  ;;  %v2307_v4 = vsub.f32 %v2199_v35, %v2279_v0  ;;  %v2309_v52 = vsub.f32 %v2205_v38, %v2287_v8  ;;  %v2311_v40 = vsub.f32 %v2211_v63, %v2295_v55 }
0x102c   :  { %v2314_v54 = vmul.f32 1.442695, %v2305_v45  ;;  %v2312_v44 = vmul.f32 1.442695, %v2304_v12  ;;  %v2320_v14 = vmul.f32 1.442695, %v2308_v1 }
0x102d   :  { %v2316_v26 = vmul.f32 1.442695, %v2306_v51  ;;  %v2324_v9 = vmul.f32 1.442695, %v2310_v62  ;;  %v2318_v49 = vmul.f32 1.442695, %v2307_v4 }
0x102e   :  { %6565 = vpow2.f32 %v2314_v54  ;;  %v2322_v7 = vmul.f32 1.442695, %v2309_v52  ;;  %v2326_v42 = vmul.f32 1.442695, %v2311_v40 }
0x102f   :  { %6567 = vpow2.f32 %v2312_v44 }
0x1030   :  { %6569 = vpow2.f32 %v2320_v14 }
0x1031   :  { %6571 = vpow2.f32 %v2316_v26 }
0x1032   :  { %6573 = vpow2.f32 %v2324_v9 }
0x1033   :  { %6575 = vpow2.f32 %v2318_v49 }
0x1034   :  { %6577 = vpow2.f32 %v2322_v7 }
0x1035   :  { %6579 = vpow2.f32 %v2326_v42 }
0x1038   :  { %v6566_v2 = vpop.eup %6565 }
0x1039   :  { %v6568_v36 = vpop.eup %6567  ;;  %2340 = vperm.xlu0 %6468, %v6566_v2  }
0x103a   :  { %2337 = vperm.xlu1 %6467, %v6568_v36   ;;  %v6570_v58 = vpop.eup %6569 }
0x103b   :  { %v6572_v3 = vpop.eup %6571 }
0x103c   :  { %v6574_v35 = vpop.eup %6573 }
0x103d   :  { %2349 = vperm.xlu0 %6468, %v6570_v58   ;;  %v6576_v21 = vpop.eup %6575 }
0x103e   :  { %2343 = vperm.xlu1 %6467, %v6572_v3   ;;  %v6578_v38 = vpop.eup %6577 }
0x103f   :  { %v6580_v57 = vpop.eup %6579 }
0x1041   :  { %2355 = vperm.xlu0 %6468, %v6574_v35  }
0x1042   :  { %2346 = vperm.xlu1 %6467, %v6576_v21  }
0x1046   :  { %2352 = vperm.xlu1 %6467, %v6578_v38  }
0x104a   :  { %2358 = vperm.xlu1 %6467, %v6580_v57  }
0x10b8   :  { %v2341_v50 = vpop.permute.xlu0 %2340 }
0x10b9   :  { %v2338_v63 = vpop.permute.xlu1 %2337  ;;  %v2367_v45 = vrot.slane %v2341_v50, %v7292_v15 }
0x10ba   :  { %v2363_v12 = vrot.slane %v2338_v63, %v7292_v15 }
0x10bc   :  { %v2350_v1 = vpop.permute.xlu0 %2349  ;;  %v2392_v54 = vsel %vm966_vm3, %v2367_v45, %v2363_v12 }
0x10bd   :  { %v2344_v25 = vpop.permute.xlu1 %2343  ;;  %v2379_v8 = vrot.slane %v2350_v1, %v7292_v15 }
0x10be   :  { %v2371_v0 = vrot.slane %v2344_v25, %v7292_v15 }
0x10c0   :  { %v2393_v14 = vsel %vm968_vm4, %v2371_v0, %v2392_v54  ;;  %v2356_v4 = vpop.permute.xlu0 %2355 }
0x10c1   :  { %v2347_v51 = vpop.permute.xlu1 %2346  ;;  %v2387_v52 = vrot.slane %v2356_v4, %v7292_v15 }
0x10c2   :  { %v2375_v44 = vrot.slane %v2347_v51, %v7292_v15 }
0x10c4   :  { %v2394_v62 = vsel %vm970_vm5, %v2375_v44, %v2393_v14 }
0x10c5   :  { %v2353_v26 = vpop.permute.xlu1 %2352  ;;  %v2395_v55 = vsel %vm972_vm6, %v2379_v8, %v2394_v62 }
0x10c6   :  { %v2383_v9 = vrot.slane %v2353_v26, %v7292_v15 }
0x10c8   :  { %v2396_v49 = vsel %vm974_vm7, %v2383_v9, %v2395_v55 }
0x10c9   :  { %v2359_v7 = vpop.permute.xlu1 %2358  ;;  %v2397_v42 = vsel %vm976_vm8, %v2387_v52, %v2396_v49 }
0x10ca   :  { %v2391_v40 = vrot.slane %v2359_v7, %v7292_v15 }
0x10cc   :  { %v2398_v63 = vsel %vm978_vm9, %v2391_v40, %v2397_v42 }
0x10cd   :  { %v2400_v50 = vsel %vm981_vm10, %v2398_v63, 0.0 }
0x10ce   :  { %2401 = vadd.xlane.f32.xlu0 %v2400_v50 }
0x115b   :  { %v2402_v25 = vpop.xlane.xlu0 %2401 }
0x115c   :  { %6581 = vrcp.f32 %v2402_v25 }
0x1166   :  { %v6582_v45 = vpop.eup %6581 }
0x1167   :  { %v2404_v12 = vmul.f32 %v6582_v45, %v2402_v25 }
0x1169   :  { %v2405_v0 = vsub.f32 2.0, %v2404_v12 }
0x116b   :  { %v2406_v1 = vmul.f32 %v6582_v45, %v2405_v0 }
0x116d   :  { %v2415_v51 = vrot.slane %v2406_v1, %v7311_v60  ;;  %v2419_v44 = vrot.slane %v2406_v1, %v7314_v61  ;;  %v2411_v62 = vrot.slane %v2406_v1, %v7223_v41  ;;  %v2423_v26 = vrot.slane %v2406_v1, %v7266_v30 }
0x116e   :  { %v2427_v9 = vrot.slane %v2406_v1, %v7320_v6  ;;  %v2431_v49 = vrot.slane %v2406_v1, %v7324_v32  ;;  %v2435_v52 = vrot.slane %v2406_v1, %v7328_v19  ;;  %v2439_v7 = vrot.slane %v2406_v1, %v7332_v16  ;;  %v8524_v1 = vld [vmem:[#allocation13_spill] sm:$0xff] }
0x116f   :  { %v2449_v54 = vmul.f32 %v6566_v2, %v2415_v51  ;;  %v2450_v14 = vmul.f32 %v6572_v3, %v2419_v44  ;;  %v2448_v8 = vmul.f32 %v6568_v36, %v2411_v62  ;;  %v2451_v4 = vmul.f32 %v6576_v21, %v2423_v26 }
0x1170   :  { %v2452_v55 = vmul.f32 %v6570_v58, %v2427_v9  ;;  %v2453_v2 = vmul.f32 %v6578_v38, %v2431_v49  ;;  %v2454_v3 = vmul.f32 %v6574_v35, %v2435_v52  ;;  %v2455_v36 = vmul.f32 %v6580_v57, %v2439_v7  ;;  %v8526_v7 = vld [vmem:[#allocation15_spill] sm:$0xff] }
0x1171   :  { %2463 = vperm.xlu1 %6467, %v2449_v54  }
0x1175   :  { %2468 = vperm.xlu1 %6467, %v2450_v14  }
0x1179   :  { %2458 = vperm.xlu1 %6467, %v2448_v8   ;;  %v8525_v8 = vld [vmem:[#allocation14_spill] sm:$0xff] }
0x117d   :  { %2473 = vperm.xlu1 %6467, %v2451_v4  }
0x1181   :  { %2478 = vperm.xlu1 %6467, %v2452_v55  }
0x1185   :  { %2483 = vperm.xlu1 %6467, %v2453_v2  }
0x1189   :  { %2488 = vperm.xlu1 %6467, %v2454_v3  }
0x118d   :  { %2493 = vperm.xlu1 %6467, %v2455_v36  }
0x11f0   :  { %v2464_v40 = vpop.permute.xlu1 %2463 }
0x11f1   :  { %v2497_v21 = vmul.f32 %v7524_v20, %v2464_v40 }
0x11f3   :  { %v2511_v58 = vsel %vm108_vm1, %v2497_v21, 0.0 }
0x11f4   :  { %v2469_v42 = vpop.permute.xlu1 %2468  ;;  %v2512_v25 = vrot.slane %v2511_v58, 4 }
0x11f5   :  { %v2498_v63 = vmul.f32 %v7527_v11, %v2469_v42 }
0x11f6   :  { %v2513_v54 = vadd.f32 %v2512_v25, %v2511_v58 }
0x11f7   :  { %v2518_v45 = vsel %vm108_vm1, %v2498_v63, 0.0 }
0x11f8   :  { %v2459_v50 = vpop.permute.xlu1 %2458  ;;  %v2519_v57 = vrot.slane %v2518_v45, 4 }
0x11f9   :  { %v2496_v38 = vmul.f32 %v7531_v56, %v2459_v50  ;;  %v2514_v56 = vrot.slane %v2513_v54, 2 }
0x11fa   :  { %v2520_v62 = vadd.f32 %v2519_v57, %v2518_v45 }
0x11fb   :  { %v2504_v35 = vsel %vm108_vm1, %v2496_v38, 0.0  ;;  %v2515_v40 = vadd.f32 %v2514_v56, %v2513_v54 }
0x11fc   :  { %v2505_v12 = vrot.slane %v2504_v35, 4  ;;  %v2474_v0 = vpop.permute.xlu1 %2473  ;;  %v2521_v3 = vrot.slane %v2520_v62, 2 }
0x11fd   :  { %v2499_v51 = vmul.f32 %v8524_v1, %v2474_v0  ;;  %v2516_v0 = vrot.slane %v2515_v40, 1 }
0x11fe   :  { %v2506_v20 = vadd.f32 %v2505_v12, %v2504_v35  ;;  %v2522_v45 = vadd.f32 %v2521_v3, %v2520_v62  ;;  %v8527_v35 = vld [vmem:[#allocation16_spill] sm:$0xff] }
0x11ff   :  { %v2525_v44 = vsel %vm108_vm1, %v2499_v51, 0.0 }
0x1200   :  { %v2526_v11 = vrot.slane %v2525_v44, 4  ;;  %v2479_v14 = vpop.permute.xlu1 %2478  ;;  %v2507_v9 = vrot.slane %v2506_v20, 2 }
0x1201   :  { %v2500_v26 = vmul.f32 %v8525_v8, %v2479_v14 }
0x1202   :  { %v2527_v4 = vadd.f32 %v2526_v11, %v2525_v44  ;;  %v2508_v42 = vadd.f32 %v2507_v9, %v2506_v20  ;;  %v2523_v20 = vrot.slane %v2522_v45, 1 }
0x1203   :  { %v2532_v55 = vsel %vm108_vm1, %v2500_v26, 0.0 }
0x1204   :  { %v2528_v49 = vrot.slane %v2527_v4, 2  ;;  %v2533_v2 = vrot.slane %v2532_v55, 4  ;;  %v2484_v52 = vpop.permute.xlu1 %2483  ;;  %v2509_v51 = vrot.slane %v2508_v42, 1 }
0x1205   :  { %v2501_v36 = vmul.f32 %v8526_v7, %v2484_v52 }
0x1206   :  { %v2534_v21 = vadd.f32 %v2533_v2, %v2532_v55  ;;  %v2529_v58 = vadd.f32 %v2528_v49, %v2527_v4  ;;  %v2517_v4 = vadd.f32 %v2516_v0, %v2515_v40  ;;  %v2510_v62 = vadd.f32 %v2509_v51, %v2508_v42 }
0x1207   :  { %v2539_v63 = vsel %vm108_vm1, %v2501_v36, 0.0  ;;  %v2524_v36 = vadd.f32 %v2523_v20, %v2522_v45 }
0x1208   :  { %v2535_v50 = vrot.slane %v2534_v21, 2  ;;  %v2540_v38 = vrot.slane %v2539_v63, 4  ;;  %v2489_v25 = vpop.permute.xlu1 %2488  ;;  %v2530_v11 = vrot.slane %v2529_v58, 1 }
0x1209   :  { %v2502_v12 = vmul.f32 %v8527_v35, %v2489_v25  ;;  %v2560_v35 = vmul.f32 %v2510_v62, %v7381_v34  ;;  %v2562_v42 = vmul.f32 %v2524_v36, %v7381_v34 }
0x120a   :  { %v2536_v57 = vadd.f32 %v2535_v50, %v2534_v21  ;;  %v2541_v1 = vadd.f32 %v2540_v38, %v2539_v63  ;;  %v2531_v2 = vadd.f32 %v2530_v11, %v2529_v58  ;;  %v2561_v63 = vmul.f32 %v2517_v4, %v7381_v34 }
0x120b   :  { %v2546_v44 = vsel %vm108_vm1, %v2502_v12, 0.0 }
0x120c   :  { %v2542_v14 = vrot.slane %v2541_v1, 2  ;;  %v2547_v54 = vrot.slane %v2546_v44, 4  ;;  %v2494_v8 = vpop.permute.xlu1 %2493  ;;  %v2537_v26 = vrot.slane %v2536_v57, 1  ;;  %v2576_v0 = vrot.slane %v2561_v63, 7 }
0x120d   :  { %v2503_v56 = vmul.f32 %v7552_v13, %v2494_v8  ;;  %v2563_v13 = vmul.f32 %v2531_v2, %v7381_v34 }
0x120e   :  { %v2543_v9 = vadd.f32 %v2542_v14, %v2541_v1  ;;  %v2548_v55 = vadd.f32 %v2547_v54, %v2546_v44  ;;  %v2538_v21 = vadd.f32 %v2537_v26, %v2536_v57  ;;  %v2577_v14 = vsel %vm966_vm3, %v2576_v0, %v2560_v35 }
0x120f   :  { %v2553_v49 = vsel %vm108_vm1, %v2503_v56, 0.0  ;;  %v2580_v51 = vrot.slane %v2563_v13, 5  ;;  %v2578_v54 = vrot.slane %v2562_v42, 6 }
0x1210   :  { %v2544_v52 = vrot.slane %v2543_v9, 1  ;;  %v2549_v3 = vrot.slane %v2548_v55, 2  ;;  %v2554_v7 = vrot.slane %v2553_v49, 4  ;;  %v2564_v58 = vmul.f32 %v2538_v21, %v7381_v34 }
0x1211   :  { %v2579_v56 = vsel %vm968_vm4, %v2578_v54, %v2577_v14 }
0x1212   :  { %v2545_v50 = vadd.f32 %v2544_v52, %v2543_v9  ;;  %v2550_v38 = vadd.f32 %v2549_v3, %v2548_v55  ;;  %v2555_v25 = vadd.f32 %v2554_v7, %v2553_v49  ;;  %v2582_v8 = vrot.slane %v2564_v58, 4 }
0x1213   :  { %v2581_v55 = vsel %vm970_vm5, %v2580_v51, %v2579_v56 }
0x1214   :  { %v2551_v40 = vrot.slane %v2550_v38, 1  ;;  %v2556_v12 = vrot.slane %v2555_v25, 2  ;;  %v2565_v1 = vmul.f32 %v2545_v50, %v7381_v34  ;;  %v2583_v62 = vsel %vm972_vm6, %v2582_v8, %v2581_v55 }
0x1216   :  { %v2552_v45 = vadd.f32 %v2551_v40, %v2550_v38  ;;  %v2557_v57 = vadd.f32 %v2556_v12, %v2555_v25  ;;  %v2584_v26 = vrot.slane %v2565_v1, 3 }
0x1218   :  { %v2558_v44 = vrot.slane %v2557_v57, 1  ;;  %v2566_v11 = vmul.f32 %v2552_v45, %v7381_v34  ;;  %v2585_v49 = vsel %vm974_vm7, %v2584_v26, %v2583_v62 }
0x121a   :  { %v2559_v20 = vadd.f32 %v2558_v44, %v2557_v57  ;;  %v2586_v4 = vrot.slane %v2566_v11, 2 }
0x121c   :  { %v2567_v9 = vmul.f32 %v2559_v20, %v7381_v34  ;;  %v2587_v52 = vsel %vm976_vm8, %v2586_v4, %v2585_v49 }
0x121e   :  { %v2588_v2 = vrot.slane %v2567_v9, 1 }
0x1220   :  { %v2589_v3 = vsel %vm978_vm9, %v2588_v2, %v2587_v52 }
0x1221   :  { %v2591_v7 = vsel %vm108_vm1, %v2589_v3, 0.0 }
0x1222   :  { %2592 = vadd.xlane.f32.xlu0 %v2591_v7 }
0x1238   :  { %2602 = vrot.lane.b32.xlu0 %v7594_v10, %s6950_s10 }
0x12af   :  { %v2593_v36 = vpop.xlane.xlu0 %2592 }
0x12b0   :  { %v2594_v21 = vadd.f32 %v2593_v36, %v7404_v48 }
0x12b2   :  { %2597 = vperm.xlu1 %6467, %v2594_v21  }
0x12b3   :  { %v2603_v25 = vpop.permute.xlu0 %2602 }
0x12b6   :  { %2612 = vrot.lane.b32.xlu1 %v7594_v10, %s6951_s11 }
0x1331   :  { %v2598_v63 = vpop.permute.xlu1 %2597 }
0x1332   :  { %v2600_v50 = vmul.f32 %v2598_v63, %v7411_v53 }
0x1334   :  { %v2601_v38 = vadd.f32 %v2600_v50, %v7415_v28 }
0x1335   :  { %v2613_v58 = vpop.permute.xlu1 %2612 }
0x1336   :  { %v2605_v35 = vadd.f32 %v2603_v25, %v2601_v38 }
0x1338   :  { %v6026_v13 = vmul.f32 -1.442695, %v2605_v35 }
0x133a   :  { %6583 = vpow2.f32 %v6026_v13 }
0x1344   :  { %v6584_v40 = vpop.eup %6583 }
0x1345   :  { %v2609_v12 = vadd.f32 1.0, %v6584_v40 }
0x1347   :  { %6585 = vrcp.f32 %v2609_v12 }
0x1351   :  { %v6586_v42 = vpop.eup %6585 }
0x1352   :  { %v2615_v0 = vmul.f32 %v6586_v42, %v2613_v58  ;;  %v2622_v57 = vsub.f32 1.0, %v6586_v42  ;;  %v2628_v44 = vmul.f32 %v6586_v42, %v7582_v59 }
0x1354   :  { %2617 = vrot.lane.b32.xlu1 %v2615_v0, %s6952_s3 }
0x13c6   :  { %v2618_v1 = vpop.permute.xlu1 %2617 }
0x13c7   :  { %v2620_v45 = vadd.f32 %v2618_v1, %v2601_v38 }
0x13c9   :  { %6587 = vtanh.f32 %v2620_v45 }
0x13d3   :  { %v6588_v10 = vpop.eup %6587 }
0x13d4   :  { %2624 = vrot.lane.b32.xlu1 %v6588_v10, %s6950_s10 }
0x1446   :  { %v2625_v51 = vpop.permute.xlu1 %2624 }
0x1447   :  { %v2627_v11 = vmul.f32 %v2625_v51, %v2622_v57 }
0x1449   :  { %v7727_v14 = vadd.f32 %v2628_v44, %v2627_v11 }
0x144b   :  { %2631 = vrot.lane.b32.xlu1 %v7727_v14, %s6950_s10 }
0x14bd   :  { %v2632_v54 = vpop.permute.xlu1 %2631 }
0x14be   :  { %6259 = vmatmul.mubr.msk.f32.vlgmr.msra.gmra.mrb[10].mxu1 %vm108_vm1, %v2632_v54 }
0x14bf   :  { %6423 = vmatpush3.bf16.msra.mxu1 %v7176_v18  ;;  %6280 = vmatprep.mubr.msk.f32.mxu1 %vm6946_vm0, %v8522_v17 }
0x14c0   :  { %6424 = vmatprep.subr.bf16.mxu1 %v8523_v5 }
0x14c3   :  { %6426 = vmatpush3.bf16.msra.mxu1 %v7183_v22 }
0x14c4   :  { %6433 = vmatprep.subr.bf16.mxu1 %v8523_v5 }
0x1591   :  { %v2701_v59 = vpop.f32.mrb[10].mxu1 }
0x1592   :  { %v7739_v8 = vadd.f32 %v2701_v59, %v7234_v46  ;;  %v6260_v20 = vpop.f32.mrb[11].mxu1 }
0x1594   :  { %v2706_v26 = vcombine.high %v7739_v8, %v7739_v8  ;;  %v2713_v56 = vrot.slane %v7739_v8, %v7237_v47 }
0x1596   :  { %v2720_v4 = vrot.slane %v2706_v26, %v7237_v47  ;;  %v2721_v9 = vcombine.high %v2713_v56, %v2713_v56  ;;  %v2729_v55 = vrot.slane %v2713_v56, %v7237_v47 }
0x1598   :  { %v2722_v62 = vcombine.high %v2720_v4, %v2720_v4  ;;  %v2736_v49 = vrot.slane %v2720_v4, %v7237_v47  ;;  %v2743_v2 = vrot.slane %v2721_v9, %v7237_v47  ;;  %v2751_v52 = vcombine.high %v2729_v55, %v2729_v55 }
0x1599   :  { %v2758_v3 = vrot.slane %v2729_v55, %v7223_v41 }
0x159a   :  { %v2750_v7 = vrot.slane %v2722_v62, %v7237_v47  ;;  %v2752_v36 = vcombine.high %v2736_v49, %v2736_v49  ;;  %v2753_v21 = vcombine.high %v2743_v2, %v2743_v2  ;;  %v2762_v63 = vrot.slane %v2743_v2, %v7223_v41 }
0x159b   :  { %v2766_v50 = vrot.slane %v2751_v52, %v7223_v41  ;;  %v2774_v38 = vrot.slane %v2736_v49, %v7223_v41  ;;  %v2795_v25 = vadd.f32 %v2758_v3, %v7205_v23 }
0x159c   :  { %v2754_v35 = vcombine.high %v2750_v7, %v2750_v7  ;;  %v2770_v13 = vrot.slane %v2753_v21, %v7223_v41  ;;  %v2778_v40 = vrot.slane %v2750_v7, %v7223_v41  ;;  %v2796_v12 = vadd.f32 %v2762_v63, %v7207_v24 }
0x159d   :  { %6589 = vtanh.f32 %v2795_v25  ;;  %v2797_v42 = vadd.f32 %v2766_v50, %v7209_v27  ;;  %v2799_v58 = vadd.f32 %v2774_v38, %v7213_v31  ;;  %v2782_v0 = vrot.slane %v2752_v36, %v7223_v41 }
0x159e   :  { %6591 = vtanh.f32 %v2796_v12  ;;  %v2798_v1 = vadd.f32 %v2770_v13, %v7211_v29  ;;  %v2800_v45 = vadd.f32 %v2778_v40, %v7215_v33  ;;  %v2786_v10 = vrot.slane %v2754_v35, %v7223_v41 }
0x159f   :  { %6593 = vtanh.f32 %v2797_v42  ;;  %v2801_v51 = vadd.f32 %v2782_v0, %v7220_v39 }
0x15a0   :  { %6595 = vtanh.f32 %v2798_v1  ;;  %v2802_v57 = vadd.f32 %v2786_v10, %v7230_v43 }
0x15a1   :  { %6597 = vtanh.f32 %v2800_v45 }
0x15a2   :  { %6599 = vtanh.f32 %v2799_v58 }
0x15a3   :  { %6601 = vtanh.f32 %v2802_v57 }
0x15a4   :  { %6603 = vtanh.f32 %v2801_v51 }
0x15a7   :  { %v6590_v44 = vpop.eup %6589 }
0x15a8   :  { %v6592_v11 = vpop.eup %6591  ;;  %v2811_v54 = vmul.f32 %v6590_v44, %v7272_v37 }
0x15a9   :  { %v6594_v59 = vpop.eup %6593  ;;  %v2812_v20 = vmul.f32 %v6592_v11, %v7272_v37 }
0x15aa   :  { %v6596_v26 = vpop.eup %6595  ;;  %v2819_v56 = vsel %vm108_vm1, %v2811_v54, 0.0  ;;  %v2813_v62 = vmul.f32 %v6594_v59, %v7272_v37 }
0x15ab   :  { %v6598_v4 = vpop.eup %6597  ;;  %2820 = vadd.xlane.f32.xlu1 %v2819_v56  ;;  %v2822_v9 = vsel %vm108_vm1, %v2812_v20, 0.0  ;;  %v2814_v55 = vmul.f32 %v6596_v26, %v7272_v37 }
0x15ac   :  { %v6600_v49 = vpop.eup %6599  ;;  %2823 = vadd.xlane.f32.xlu0 %v2822_v9  ;;  %v2816_v52 = vmul.f32 %v6598_v4, %v7272_v37  ;;  %v2825_v7 = vsel %vm108_vm1, %v2813_v62, 0.0 }
0x15ad   :  { %v2828_v2 = vsel %vm108_vm1, %v2814_v55, 0.0  ;;  %v6602_v3 = vpop.eup %6601  ;;  %v2815_v36 = vmul.f32 %v6600_v49, %v7272_v37 }
0x15ae   :  { %v6604_v21 = vpop.eup %6603  ;;  %v2834_v63 = vsel %vm108_vm1, %v2816_v52, 0.0  ;;  %v2818_v50 = vmul.f32 %v6602_v3, %v7272_v37 }
0x15af   :  { %2829 = vadd.xlane.f32.xlu1 %v2828_v2  ;;  %v2831_v38 = vsel %vm108_vm1, %v2815_v36, 0.0  ;;  %v2817_v25 = vmul.f32 %v6604_v21, %v7272_v37 }
0x15b0   :  { %2826 = vadd.xlane.f32.xlu0 %v2825_v7  ;;  %v2840_v35 = vsel %vm108_vm1, %v2818_v50, 0.0 }
0x15b1   :  { %v2837_v13 = vsel %vm108_vm1, %v2817_v25, 0.0 }
0x15b3   :  { %2835 = vadd.xlane.f32.xlu1 %v2834_v63 }
0x15b4   :  { %2832 = vadd.xlane.f32.xlu0 %v2831_v38 }
0x15b7   :  { %2841 = vadd.xlane.f32.xlu1 %v2840_v35 }
0x15b8   :  { %2838 = vadd.xlane.f32.xlu0 %v2837_v13 }
0x1638   :  { %v2821_v40 = vpop.xlane.xlu1 %2820 }
0x1639   :  { %v2824_v12 = vpop.xlane.xlu0 %2823  ;;  %v2854_v0 = vrot.slane %v2821_v40, %v7292_v15 }
0x163a   :  { %v2858_v42 = vrot.slane %v2824_v12, %v7292_v15 }
0x163c   :  { %v2830_v58 = vpop.xlane.xlu1 %2829  ;;  %v2883_v10 = vsel %vm966_vm3, %v2858_v42, %v2854_v0 }
0x163d   :  { %v2827_v1 = vpop.xlane.xlu0 %2826  ;;  %v2866_v44 = vrot.slane %v2830_v58, %v7292_v15 }
0x163e   :  { %v2862_v45 = vrot.slane %v2827_v1, %v7292_v15 }
0x1640   :  { %v2884_v57 = vsel %vm968_vm4, %v2862_v45, %v2883_v10  ;;  %v2836_v51 = vpop.xlane.xlu1 %2835 }
0x1641   :  { %v2833_v11 = vpop.xlane.xlu0 %2832  ;;  %v2885_v59 = vsel %vm970_vm5, %v2866_v44, %v2884_v57  ;;  %v2874_v56 = vrot.slane %v2836_v51, %v7292_v15 }
0x1642   :  { %v2870_v54 = vrot.slane %v2833_v11, %v7292_v15 }
0x1644   :  { %v2886_v20 = vsel %vm972_vm6, %v2870_v54, %v2885_v59  ;;  %v2842_v26 = vpop.xlane.xlu1 %2841 }
0x1645   :  { %v2839_v4 = vpop.xlane.xlu0 %2838  ;;  %v2882_v55 = vrot.slane %v2842_v26, %v7292_v15  ;;  %v2887_v62 = vsel %vm974_vm7, %v2874_v56, %v2886_v20 }
0x1646   :  { %v2878_v9 = vrot.slane %v2839_v4, %v7292_v15 }
0x1648   :  { %v2888_v49 = vsel %vm976_vm8, %v2878_v9, %v2887_v62 }
0x1649   :  { %v2889_v2 = vsel %vm978_vm9, %v2882_v55, %v2888_v49 }
0x164a   :  { %v2891_v52 = vsel %vm981_vm10, %v2889_v2, -inf }
0x164b   :  { %2892 = vmax.xlane.f32.xlu0 %v2891_v52 }
0x16d8   :  { %v2893_v3 = vpop.xlane.xlu0 %2892 }
0x16d9   :  { %v2898_v7 = vrot.slane %v2893_v3, %v7223_v41  ;;  %v2902_v36 = vrot.slane %v2893_v3, %v7311_v60  ;;  %v2906_v21 = vrot.slane %v2893_v3, %v7314_v61  ;;  %v2910_v63 = vrot.slane %v2893_v3, %v7266_v30 }
0x16da   :  { %v2914_v25 = vrot.slane %v2893_v3, %v7320_v6  ;;  %v2918_v42 = vrot.slane %v2893_v3, %v7324_v32  ;;  %v2922_v10 = vrot.slane %v2893_v3, %v7328_v19  ;;  %v2926_v54 = vrot.slane %v2893_v3, %v7332_v16 }
0x16db   :  { %v2935_v50 = vsub.f32 %v2821_v40, %v2898_v7  ;;  %v2937_v38 = vsub.f32 %v2827_v1, %v2906_v21  ;;  %v2936_v35 = vsub.f32 %v2824_v12, %v2902_v36  ;;  %v2938_v0 = vsub.f32 %v2830_v58, %v2910_v63 }
0x16dc   :  { %v2939_v44 = vsub.f32 %v2833_v11, %v2914_v25  ;;  %v2940_v59 = vsub.f32 %v2836_v51, %v2918_v42  ;;  %v2941_v1 = vsub.f32 %v2839_v4, %v2922_v10  ;;  %v2942_v56 = vsub.f32 %v2842_v26, %v2926_v54 }
0x16dd   :  { %v2943_v13 = vmul.f32 1.442695, %v2935_v50  ;;  %v2947_v45 = vmul.f32 1.442695, %v2937_v38  ;;  %v2945_v57 = vmul.f32 1.442695, %v2936_v35 }
0x16de   :  { %v2949_v20 = vmul.f32 1.442695, %v2938_v0  ;;  %v2951_v40 = vmul.f32 1.442695, %v2939_v44  ;;  %v2953_v12 = vmul.f32 1.442695, %v2940_v59 }
0x16df   :  { %6605 = vpow2.f32 %v2943_v13  ;;  %v2955_v9 = vmul.f32 1.442695, %v2941_v1  ;;  %v2957_v55 = vmul.f32 1.442695, %v2942_v56 }
0x16e0   :  { %6607 = vpow2.f32 %v2947_v45 }
0x16e1   :  { %6609 = vpow2.f32 %v2945_v57 }
0x16e2   :  { %6611 = vpow2.f32 %v2949_v20 }
0x16e3   :  { %6613 = vpow2.f32 %v2951_v40 }
0x16e4   :  { %6615 = vpow2.f32 %v2953_v12 }
0x16e5   :  { %6617 = vpow2.f32 %v2955_v9 }
0x16e6   :  { %6619 = vpow2.f32 %v2957_v55 }
0x16e9   :  { %v6606_v58 = vpop.eup %6605 }
0x16ea   :  { %2968 = vperm.xlu1 %6467, %v6606_v58   ;;  %v6608_v62 = vpop.eup %6607 }
0x16eb   :  { %v6610_v11 = vpop.eup %6609 }
0x16ec   :  { %2971 = vperm.xlu0 %6468, %v6610_v11   ;;  %v6612_v51 = vpop.eup %6611 }
0x16ed   :  { %v6614_v49 = vpop.eup %6613 }
0x16ee   :  { %2974 = vperm.xlu1 %6467, %v6608_v62   ;;  %v6616_v4 = vpop.eup %6615 }
0x16ef   :  { %v6618_v26 = vpop.eup %6617 }
0x16f0   :  { %2980 = vperm.xlu0 %6468, %v6614_v49   ;;  %v6620_v2 = vpop.eup %6619 }
0x16f2   :  { %2977 = vperm.xlu1 %6467, %v6612_v51  }
0x16f4   :  { %2986 = vperm.xlu0 %6468, %v6618_v26  }
0x16f6   :  { %2983 = vperm.xlu1 %6467, %v6616_v4  }
0x16fa   :  { %2989 = vperm.xlu1 %6467, %v6620_v2  }
0x1769   :  { %v2969_v52 = vpop.permute.xlu1 %2968 }
0x176a   :  { %v2994_v36 = vrot.slane %v2969_v52, %v7292_v15 }
0x176b   :  { %v2972_v7 = vpop.permute.xlu0 %2971 }
0x176c   :  { %v2998_v21 = vrot.slane %v2972_v7, %v7292_v15 }
0x176d   :  { %v2975_v3 = vpop.permute.xlu1 %2974 }
0x176e   :  { %v3002_v63 = vrot.slane %v2975_v3, %v7292_v15  ;;  %v3023_v38 = vsel %vm966_vm3, %v2998_v21, %v2994_v36 }
0x176f   :  { %v2981_v25 = vpop.permute.xlu0 %2980 }
0x1770   :  { %v3024_v13 = vsel %vm968_vm4, %v3002_v63, %v3023_v38  ;;  %v3010_v0 = vrot.slane %v2981_v25, %v7292_v15 }
0x1771   :  { %v2978_v50 = vpop.permute.xlu1 %2977 }
0x1772   :  { %v3006_v35 = vrot.slane %v2978_v50, %v7292_v15 }
0x1773   :  { %v2987_v10 = vpop.permute.xlu0 %2986 }
0x1774   :  { %v3025_v42 = vsel %vm970_vm5, %v3006_v35, %v3024_v13  ;;  %v3018_v59 = vrot.slane %v2987_v10, %v7292_v15 }
0x1775   :  { %v2984_v45 = vpop.permute.xlu1 %2983  ;;  %v3026_v44 = vsel %vm972_vm6, %v3010_v0, %v3025_v42 }
0x1776   :  { %v3014_v57 = vrot.slane %v2984_v45, %v7292_v15 }
0x1778   :  { %v3027_v54 = vsel %vm974_vm7, %v3014_v57, %v3026_v44 }
0x1779   :  { %v2990_v20 = vpop.permute.xlu1 %2989  ;;  %v3028_v1 = vsel %vm976_vm8, %v3018_v59, %v3027_v54  ;;  %v7830_v54 = vld [vmem:[#allocation2 + $0x8] sm:$0xff] }
0x177a   :  { %v3022_v40 = vrot.slane %v2990_v20, %v7292_v15 }
0x177c   :  { %v3029_v56 = vsel %vm978_vm9, %v3022_v40, %v3028_v1  ;;  %v7837_v1 = vld [vmem:[#allocation2] sm:$0xff] }
0x177d   :  { %v3031_v12 = vsel %vm981_vm10, %v3029_v56, 0.0  ;;  %8529 = vst [vmem:[#allocation14_spill] sm:$0xff] %v7837_v1 }
0x177e   :  { %3032 = vadd.xlane.f32.xlu0 %v3031_v12 }
0x180b   :  { %v3033_v9 = vpop.xlane.xlu0 %3032 }
0x180c   :  { %6621 = vrcp.f32 %v3033_v9 }
0x1816   :  { %v6622_v55 = vpop.eup %6621 }
0x1817   :  { %v3035_v52 = vmul.f32 %v6622_v55, %v3033_v9 }
0x1819   :  { %v3036_v3 = vsub.f32 2.0, %v3035_v52 }
0x181b   :  { %v3037_v7 = vmul.f32 %v6622_v55, %v3036_v3  ;;  %v7842_v3 = vld [vmem:[#allocation2 + $0x18] sm:$0xff] }
0x181c   :  { %8530 = vst [vmem:[#allocation15_spill] sm:$0xff] %v7842_v3 }
0x181d   :  { %v3046_v36 = vrot.slane %v3037_v7, %v7311_v60  ;;  %v3050_v63 = vrot.slane %v3037_v7, %v7314_v61  ;;  %v3042_v38 = vrot.slane %v3037_v7, %v7223_v41  ;;  %v3054_v35 = vrot.slane %v3037_v7, %v7266_v30 }
0x181e   :  { %v3058_v42 = vrot.slane %v3037_v7, %v7320_v6  ;;  %v3062_v45 = vrot.slane %v3037_v7, %v7324_v32  ;;  %v3066_v10 = vrot.slane %v3037_v7, %v7328_v19  ;;  %v3070_v57 = vrot.slane %v3037_v7, %v7332_v16 }
0x181f   :  { %v3080_v21 = vmul.f32 %v6610_v11, %v3046_v36  ;;  %v3081_v50 = vmul.f32 %v6608_v62, %v3050_v63  ;;  %v3079_v25 = vmul.f32 %v6606_v58, %v3042_v38  ;;  %v3082_v13 = vmul.f32 %v6612_v51, %v3054_v35  ;;  %v7846_v35 = vld [vmem:[#allocation2 + $0x20] sm:$0xff] }
0x1820   :  { %v3083_v0 = vmul.f32 %v6614_v49, %v3058_v42  ;;  %v3084_v11 = vmul.f32 %v6616_v4, %v3062_v45  ;;  %v3085_v62 = vmul.f32 %v6618_v26, %v3066_v10  ;;  %v3086_v58 = vmul.f32 %v6620_v2, %v3070_v57  ;;  %v7833_v49 = vld [vmem:[#allocation2 + $0x10] sm:$0xff]  ;;  %8531 = vst [vmem:[#allocation16_spill] sm:$0xff] %v7846_v35 }
0x1821   :  { %3094 = vperm.xlu1 %6467, %v3080_v21   ;;  %8528 = vst [vmem:[#allocation13_spill] sm:$0xff] %v7833_v49 }
0x1825   :  { %3099 = vperm.xlu1 %6467, %v3081_v50  }
0x1829   :  { %3089 = vperm.xlu1 %6467, %v3079_v25  }
0x182d   :  { %3104 = vperm.xlu1 %6467, %v3082_v13  }
0x1831   :  { %3109 = vperm.xlu1 %6467, %v3083_v0  }
0x1835   :  { %3114 = vperm.xlu1 %6467, %v3084_v11  }
0x1839   :  { %3119 = vperm.xlu1 %6467, %v3085_v62  }
0x183d   :  { %3124 = vperm.xlu1 %6467, %v3086_v58  }
0x18a0   :  { %v3095_v44 = vpop.permute.xlu1 %3094 }
0x18a1   :  { %v3128_v51 = vmul.f32 %v7830_v54, %v3095_v44  ;;  %v7850_v44 = vld [vmem:[#allocation2 + $0x28] sm:$0xff] }
0x18a2   :  { %8532 = vst [vmem:[#allocation17_spill] sm:$0xff] %v7850_v44 }
0x18a3   :  { %v3142_v4 = vsel %vm108_vm1, %v3128_v51, 0.0 }
0x18a4   :  { %v3100_v59 = vpop.permute.xlu1 %3099  ;;  %v3143_v56 = vrot.slane %v3142_v4, 4 }
0x18a5   :  { %v3129_v20 = vmul.f32 %v7833_v49, %v3100_v59 }
0x18a6   :  { %v3144_v36 = vadd.f32 %v3143_v56, %v3142_v4 }
0x18a7   :  { %v3149_v2 = vsel %vm108_vm1, %v3129_v20, 0.0 }
0x18a8   :  { %v3090_v40 = vpop.permute.xlu1 %3089  ;;  %v3150_v52 = vrot.slane %v3149_v2, 4  ;;  %v3145_v42 = vrot.slane %v3144_v36, 2 }
0x18a9   :  { %v3127_v26 = vmul.f32 %v7837_v1, %v3090_v40 }
0x18aa   :  { %v3151_v25 = vadd.f32 %v3150_v52, %v3149_v2  ;;  %v3146_v59 = vadd.f32 %v3145_v42, %v3144_v36 }
0x18ab   :  { %v3135_v12 = vsel %vm108_vm1, %v3127_v26, 0.0 }
0x18ac   :  { %v3136_v9 = vrot.slane %v3135_v12, 4  ;;  %v3105_v55 = vpop.permute.xlu1 %3104  ;;  %v3152_v58 = vrot.slane %v3151_v25, 2 }
0x18ad   :  { %v3130_v7 = vmul.f32 %v7842_v3, %v3105_v55  ;;  %v7854_v55 = vld [vmem:[#allocation2 + $0x30] sm:$0xff] }
0x18ae   :  { %v3137_v21 = vadd.f32 %v3136_v9, %v3135_v12  ;;  %v3153_v9 = vadd.f32 %v3152_v58, %v3151_v25  ;;  %8533 = vst [vmem:[#allocation18_spill] sm:$0xff] %v7854_v55 }
0x18af   :  { %v3156_v63 = vsel %vm108_vm1, %v3130_v7, 0.0  ;;  %v3147_v7 = vrot.slane %v3146_v59, 1 }
0x18b0   :  { %v3157_v50 = vrot.slane %v3156_v63, 4  ;;  %v3110_v38 = vpop.permute.xlu1 %3109  ;;  %v3138_v45 = vrot.slane %v3137_v21, 2 }
0x18b1   :  { %v3131_v13 = vmul.f32 %v7846_v35, %v3110_v38 }
0x18b2   :  { %v3158_v0 = vadd.f32 %v3157_v50, %v3156_v63  ;;  %v3139_v4 = vadd.f32 %v3138_v45, %v3137_v21 }
0x18b3   :  { %v3163_v11 = vsel %vm108_vm1, %v3131_v13, 0.0 }
0x18b4   :  { %v3159_v10 = vrot.slane %v3158_v0, 2  ;;  %v3164_v62 = vrot.slane %v3163_v11, 4  ;;  %v3115_v57 = vpop.permute.xlu1 %3114  ;;  %v3140_v38 = vrot.slane %v3139_v4, 1 }
0x18b5   :  { %v3132_v51 = vmul.f32 %v7850_v44, %v3115_v57 }
0x18b6   :  { %v3165_v20 = vadd.f32 %v3164_v62, %v3163_v11  ;;  %v3160_v26 = vadd.f32 %v3159_v10, %v3158_v0  ;;  %v3154_v11 = vrot.slane %v3153_v9, 1  ;;  %v7858_v10 = vld [vmem:[#allocation2 + $0x38] sm:$0xff]  ;;  %v3148_v62 = vadd.f32 %v3147_v7, %v3146_v59 }
0x18b7   :  { %v3170_v40 = vsel %vm108_vm1, %v3132_v51, 0.0  ;;  %v3141_v51 = vadd.f32 %v3140_v38, %v3139_v4 }
0x18b8   :  { %v3166_v56 = vrot.slane %v3165_v20, 2  ;;  %v3171_v2 = vrot.slane %v3170_v40, 4  ;;  %v3120_v12 = vpop.permute.xlu1 %3119  ;;  %v3161_v36 = vrot.slane %v3160_v26, 1  ;;  %v3192_v44 = vmul.f32 %v3148_v62, %v7381_v34 }
0x18b9   :  { %v3133_v52 = vmul.f32 %v7854_v55, %v3120_v12  ;;  %v3191_v49 = vmul.f32 %v3141_v51, %v7381_v34 }
0x18ba   :  { %v3167_v63 = vadd.f32 %v3166_v56, %v3165_v20  ;;  %v3172_v50 = vadd.f32 %v3171_v2, %v3170_v40  ;;  %v3162_v40 = vadd.f32 %v3161_v36, %v3160_v26  ;;  %v3207_v38 = vrot.slane %v3192_v44, 7 }
0x18bb   :  { %v3177_v13 = vsel %vm108_vm1, %v3133_v52, 0.0  ;;  %v3155_v52 = vadd.f32 %v3154_v11, %v3153_v9 }
0x18bc   :  { %v3173_v42 = vrot.slane %v3172_v50, 2  ;;  %v3178_v21 = vrot.slane %v3177_v13, 4  ;;  %v3125_v45 = vpop.permute.xlu1 %3124  ;;  %v3168_v0 = vrot.slane %v3167_v63, 1  ;;  %v3194_v59 = vmul.f32 %v3162_v40, %v7381_v34 }
0x18bd   :  { %v3134_v25 = vmul.f32 %v7858_v10, %v3125_v45  ;;  %v3193_v4 = vmul.f32 %v3155_v52, %v7381_v34  ;;  %v3208_v36 = vsel %vm966_vm3, %v3207_v38, %v3191_v49 }
0x18be   :  { %v3174_v57 = vadd.f32 %v3173_v42, %v3172_v50  ;;  %v3179_v58 = vadd.f32 %v3178_v21, %v3177_v13  ;;  %v3169_v55 = vadd.f32 %v3168_v0, %v3167_v63  ;;  %v3211_v42 = vrot.slane %v3194_v59, 5 }
0x18bf   :  { %v3184_v20 = vsel %vm108_vm1, %v3134_v25, 0.0  ;;  %v3209_v11 = vrot.slane %v3193_v4, 6 }
0x18c0   :  { %v3175_v56 = vrot.slane %v3174_v57, 1  ;;  %v3180_v2 = vrot.slane %v3179_v58, 2  ;;  %v3185_v12 = vrot.slane %v3184_v20, 4  ;;  %v3195_v26 = vmul.f32 %v3169_v55, %v7381_v34 }
0x18c2   :  { %v3176_v35 = vadd.f32 %v3175_v56, %v3174_v57  ;;  %v3181_v3 = vadd.f32 %v3180_v2, %v3179_v58  ;;  %v3186_v1 = vadd.f32 %v3185_v12, %v3184_v20  ;;  %v3213_v0 = vrot.slane %v3195_v26, 4 }
0x18c3   :  { %v3210_v57 = vsel %vm968_vm4, %v3209_v11, %v3208_v36 }
0x18c4   :  { %v3182_v7 = vrot.slane %v3181_v3, 1  ;;  %v3187_v50 = vrot.slane %v3186_v1, 2  ;;  %v3196_v13 = vmul.f32 %v3176_v35, %v7381_v34  ;;  %v3212_v44 = vsel %vm970_vm5, %v3211_v42, %v3210_v57 }
0x18c6   :  { %v3183_v9 = vadd.f32 %v3182_v7, %v3181_v3  ;;  %v3188_v63 = vadd.f32 %v3187_v50, %v3186_v1  ;;  %v3215_v25 = vrot.slane %v3196_v13, 3  ;;  %v3214_v3 = vsel %vm972_vm6, %v3213_v0, %v3212_v44 }
0x18c8   :  { %v3189_v21 = vrot.slane %v3188_v63, 1  ;;  %v3197_v45 = vmul.f32 %v3183_v9, %v7381_v34  ;;  %v3216_v1 = vsel %vm974_vm7, %v3215_v25, %v3214_v3 }
0x18ca   :  { %v3190_v62 = vadd.f32 %v3189_v21, %v3188_v63  ;;  %v3217_v58 = vrot.slane %v3197_v45, 2 }
0x18cc   :  { %v3198_v55 = vmul.f32 %v3190_v62, %v7381_v34  ;;  %v3218_v35 = vsel %vm976_vm8, %v3217_v58, %v3216_v1 }
0x18ce   :  { %v3219_v49 = vrot.slane %v3198_v55, 1 }
0x18d0   :  { %v3220_v51 = vsel %vm978_vm9, %v3219_v49, %v3218_v35 }
0x18d1   :  { %v3222_v20 = vsel %vm108_vm1, %v3220_v51, 0.0 }
0x18d2   :  { %3223 = vadd.xlane.f32.xlu0 %v3222_v20 }
0x18e8   :  { %3233 = vrot.lane.b32.xlu0 %v7739_v8, %s6950_s10 }
0x195f   :  { %v3224_v40 = vpop.xlane.xlu0 %3223 }
0x1960   :  { %v3225_v56 = vadd.f32 %v3224_v40, %v7404_v48 }
0x1962   :  { %3228 = vperm.xlu1 %6467, %v3225_v56  }
0x1963   :  { %v3234_v59 = vpop.permute.xlu0 %3233 }
0x1966   :  { %3243 = vrot.lane.b32.xlu1 %v7739_v8, %s6951_s11 }
0x19e1   :  { %v3229_v2 = vpop.permute.xlu1 %3228 }
0x19e2   :  { %v3231_v12 = vmul.f32 %v3229_v2, %v7411_v53 }
0x19e4   :  { %v3232_v52 = vadd.f32 %v3231_v12, %v7415_v28 }
0x19e5   :  { %v3244_v13 = vpop.permute.xlu1 %3243 }
0x19e6   :  { %v3236_v7 = vadd.f32 %v3234_v59, %v3232_v52 }
0x19e8   :  { %v6028_v50 = vmul.f32 -1.442695, %v3236_v7 }
0x19ea   :  { %6623 = vpow2.f32 %v6028_v50 }
0x19f4   :  { %v6624_v4 = vpop.eup %6623 }
0x19f5   :  { %v3240_v26 = vadd.f32 1.0, %v6624_v4 }
0x19f7   :  { %6625 = vrcp.f32 %v3240_v26 }
0x1a01   :  { %v6626_v38 = vpop.eup %6625 }
0x1a02   :  { %v3246_v9 = vmul.f32 %v6626_v38, %v3244_v13  ;;  %v3253_v42 = vsub.f32 1.0, %v6626_v38  ;;  %v3259_v45 = vmul.f32 %v6626_v38, %v7727_v14 }
0x1a04   :  { %3248 = vrot.lane.b32.xlu1 %v3246_v9, %s6952_s3 }
0x1a76   :  { %v3249_v63 = vpop.permute.xlu1 %3248 }
0x1a77   :  { %v3251_v36 = vadd.f32 %v3249_v63, %v3232_v52 }
0x1a79   :  { %6627 = vtanh.f32 %v3251_v36 }
0x1a83   :  { %v6628_v8 = vpop.eup %6627 }
0x1a84   :  { %3255 = vrot.lane.b32.xlu1 %v6628_v8, %s6950_s10 }
0x1af6   :  { %v3256_v21 = vpop.permute.xlu1 %3255 }
0x1af7   :  { %v3258_v11 = vmul.f32 %v3256_v21, %v3253_v42 }
0x1af9   :  { %v7888_v0 = vadd.f32 %v3259_v45, %v3258_v11 }
0x1afb   :  { %3262 = vrot.lane.b32.xlu1 %v7888_v0, %s6950_s10 }
0x1b6d   :  { %v3263_v25 = vpop.permute.xlu1 %3262 }
0x1b6e   :  { %6270 = vmatmul.mubr.msk.f32.vlgmr.msra.gmra.mrb[12].mxu0 %vm108_vm1, %v3263_v25 }
0x1b6f   :  { %6429 = vmatpush3.bf16.msra.mxu0 %v7176_v18  ;;  %6291 = vmatprep.mubr.msk.f32.mxu0 %vm6946_vm0, %v8522_v17 }
0x1b70   :  { %6430 = vmatprep.subr.bf16.mxu0 %v8523_v5 }
0x1b73   :  { %6432 = vmatpush3.bf16.msra.mxu0 %v7183_v22 }
0x1b74   :  { %6439 = vmatprep.subr.bf16.mxu0 %v8523_v5 }
0x1c41   :  { %v3332_v14 = vpop.f32.mrb[12].mxu0 }
0x1c42   :  { %v7900_v62 = vadd.f32 %v3332_v14, %v7234_v46  ;;  %v6271_v57 = vpop.f32.mrb[13].mxu0 }
0x1c44   :  { %v3337_v58 = vcombine.high %v7900_v62, %v7900_v62  ;;  %v3344_v55 = vrot.slane %v7900_v62, %v7237_v47 }
0x1c46   :  { %v3351_v44 = vrot.slane %v3337_v58, %v7237_v47  ;;  %v3352_v3 = vcombine.high %v3344_v55, %v3344_v55  ;;  %v3360_v1 = vrot.slane %v3344_v55, %v7237_v47 }
0x1c48   :  { %v3353_v49 = vcombine.high %v3351_v44, %v3351_v44  ;;  %v3367_v35 = vrot.slane %v3351_v44, %v7237_v47  ;;  %v3374_v51 = vrot.slane %v3352_v3, %v7237_v47  ;;  %v3382_v20 = vcombine.high %v3360_v1, %v3360_v1 }
0x1c49   :  { %v3389_v40 = vrot.slane %v3360_v1, %v7223_v41 }
0x1c4a   :  { %v3381_v56 = vrot.slane %v3353_v49, %v7237_v47  ;;  %v3384_v2 = vcombine.high %v3374_v51, %v3374_v51  ;;  %v3393_v12 = vrot.slane %v3374_v51, %v7223_v41  ;;  %v3383_v52 = vcombine.high %v3367_v35, %v3367_v35 }
0x1c4b   :  { %v3397_v59 = vrot.slane %v3382_v20, %v7223_v41  ;;  %v3405_v7 = vrot.slane %v3367_v35, %v7223_v41  ;;  %v3426_v50 = vadd.f32 %v3389_v40, %v7205_v23 }
0x1c4c   :  { %v3385_v4 = vcombine.high %v3381_v56, %v3381_v56  ;;  %v3401_v26 = vrot.slane %v3384_v2, %v7223_v41  ;;  %v3409_v38 = vrot.slane %v3381_v56, %v7223_v41  ;;  %v3427_v13 = vadd.f32 %v3393_v12, %v7207_v24 }
0x1c4d   :  { %6629 = vtanh.f32 %v3426_v50  ;;  %v3428_v9 = vadd.f32 %v3397_v59, %v7209_v27  ;;  %v3413_v42 = vrot.slane %v3383_v52, %v7223_v41  ;;  %v3430_v21 = vadd.f32 %v3405_v7, %v7213_v31 }
0x1c4e   :  { %v3429_v63 = vadd.f32 %v3401_v26, %v7211_v29  ;;  %v3431_v36 = vadd.f32 %v3409_v38, %v7215_v33  ;;  %v3417_v8 = vrot.slane %v3385_v4, %v7223_v41  ;;  %6631 = vtanh.f32 %v3427_v13 }
0x1c4f   :  { %v3432_v11 = vadd.f32 %v3413_v42, %v7220_v39 }
0x1c50   :  { %6633 = vtanh.f32 %v3429_v63  ;;  %v3433_v45 = vadd.f32 %v3417_v8, %v7230_v43 }
0x1c51   :  { %6635 = vtanh.f32 %v3428_v9 }
0x1c52   :  { %6637 = vtanh.f32 %v3431_v36 }
0x1c53   :  { %6639 = vtanh.f32 %v3430_v21 }
0x1c54   :  { %6641 = vtanh.f32 %v3433_v45 }
0x1c55   :  { %6643 = vtanh.f32 %v3432_v11 }
0x1c57   :  { %v6630_v25 = vpop.eup %6629 }
0x1c58   :  { %v3442_v14 = vmul.f32 %v6630_v25, %v7272_v37  ;;  %v6632_v57 = vpop.eup %6631 }
0x1c59   :  { %v3443_v44 = vmul.f32 %v6632_v57, %v7272_v37 }
0x1c5a   :  { %v6634_v58 = vpop.eup %6633  ;;  %v3450_v55 = vsel %vm108_vm1, %v3442_v14, 0.0 }
0x1c5b   :  { %v6636_v3 = vpop.eup %6635  ;;  %3451 = vadd.xlane.f32.xlu1 %v3450_v55  ;;  %v3445_v1 = vmul.f32 %v6634_v58, %v7272_v37  ;;  %v3453_v35 = vsel %vm108_vm1, %v3443_v44, 0.0 }
0x1c5c   :  { %v6638_v49 = vpop.eup %6637  ;;  %v3444_v51 = vmul.f32 %v6636_v3, %v7272_v37  ;;  %3454 = vadd.xlane.f32.xlu0 %v3453_v35 }
0x1c5d   :  { %v6640_v20 = vpop.eup %6639  ;;  %v3459_v40 = vsel %vm108_vm1, %v3445_v1, 0.0  ;;  %v3447_v56 = vmul.f32 %v6638_v49, %v7272_v37 }
0x1c5e   :  { %v6642_v2 = vpop.eup %6641  ;;  %v3456_v12 = vsel %vm108_vm1, %v3444_v51, 0.0  ;;  %v3446_v52 = vmul.f32 %v6640_v20, %v7272_v37 }
0x1c5f   :  { %3460 = vadd.xlane.f32.xlu1 %v3459_v40  ;;  %v6644_v59 = vpop.eup %6643  ;;  %v3465_v7 = vsel %vm108_vm1, %v3447_v56, 0.0  ;;  %v3449_v50 = vmul.f32 %v6642_v2, %v7272_v37 }
0x1c60   :  { %3457 = vadd.xlane.f32.xlu0 %v3456_v12  ;;  %v3462_v4 = vsel %vm108_vm1, %v3446_v52, 0.0  ;;  %v3448_v26 = vmul.f32 %v6644_v59, %v7272_v37 }
0x1c61   :  { %v3471_v38 = vsel %vm108_vm1, %v3449_v50, 0.0 }
0x1c62   :  { %v3468_v13 = vsel %vm108_vm1, %v3448_v26, 0.0 }
0x1c63   :  { %3466 = vadd.xlane.f32.xlu1 %v3465_v7 }
0x1c64   :  { %3463 = vadd.xlane.f32.xlu0 %v3462_v4 }
0x1c67   :  { %3472 = vadd.xlane.f32.xlu1 %v3471_v38 }
0x1c68   :  { %3469 = vadd.xlane.f32.xlu0 %v3468_v13 }
0x1ce8   :  { %v3452_v9 = vpop.xlane.xlu1 %3451 }
0x1ce9   :  { %v3455_v63 = vpop.xlane.xlu0 %3454  ;;  %v3485_v42 = vrot.slane %v3452_v9, %v7292_v15 }
0x1cea   :  { %v3489_v36 = vrot.slane %v3455_v63, %v7292_v15 }
0x1cec   :  { %v3461_v8 = vpop.xlane.xlu1 %3460  ;;  %v3514_v11 = vsel %vm966_vm3, %v3489_v36, %v3485_v42 }
0x1ced   :  { %v3458_v21 = vpop.xlane.xlu0 %3457  ;;  %v3497_v57 = vrot.slane %v3461_v8, %v7292_v15 }
0x1cee   :  { %v3493_v45 = vrot.slane %v3458_v21, %v7292_v15 }
0x1cf0   :  { %v3467_v25 = vpop.xlane.xlu1 %3466  ;;  %v3515_v14 = vsel %vm968_vm4, %v3493_v45, %v3514_v11 }
0x1cf1   :  { %v3464_v58 = vpop.xlane.xlu0 %3463  ;;  %v3516_v44 = vsel %vm970_vm5, %v3497_v57, %v3515_v14  ;;  %v3505_v49 = vrot.slane %v3467_v25, %v7292_v15 }
0x1cf2   :  { %v3501_v55 = vrot.slane %v3464_v58, %v7292_v15 }
0x1cf4   :  { %v3517_v3 = vsel %vm972_vm6, %v3501_v55, %v3516_v44  ;;  %v3473_v1 = vpop.xlane.xlu1 %3472 }
0x1cf5   :  { %v3470_v35 = vpop.xlane.xlu0 %3469  ;;  %v3513_v20 = vrot.slane %v3473_v1, %v7292_v15  ;;  %v3518_v40 = vsel %vm974_vm7, %v3505_v49, %v3517_v3 }
0x1cf6   :  { %v3509_v51 = vrot.slane %v3470_v35, %v7292_v15 }
0x1cf8   :  { %v3519_v56 = vsel %vm976_vm8, %v3509_v51, %v3518_v40 }
0x1cf9   :  { %v3520_v2 = vsel %vm978_vm9, %v3513_v20, %v3519_v56 }
0x1cfa   :  { %v3522_v12 = vsel %vm981_vm10, %v3520_v2, -inf }
0x1cfb   :  { %3523 = vmax.xlane.f32.xlu0 %v3522_v12 }
0x1d88   :  { %v3524_v52 = vpop.xlane.xlu0 %3523 }
0x1d89   :  { %v3529_v59 = vrot.slane %v3524_v52, %v7223_v41  ;;  %v3533_v7 = vrot.slane %v3524_v52, %v7311_v60  ;;  %v3537_v50 = vrot.slane %v3524_v52, %v7314_v61  ;;  %v3549_v4 = vrot.slane %v3524_v52, %v7324_v32 }
0x1d8a   :  { %v3541_v26 = vrot.slane %v3524_v52, %v7266_v30  ;;  %v3557_v42 = vrot.slane %v3524_v52, %v7332_v16  ;;  %v3545_v57 = vrot.slane %v3524_v52, %v7320_v6  ;;  %v3553_v51 = vrot.slane %v3524_v52, %v7328_v19 }
0x1d8b   :  { %v3566_v38 = vsub.f32 %v3452_v9, %v3529_v59  ;;  %v3567_v13 = vsub.f32 %v3455_v63, %v3533_v7  ;;  %v3568_v36 = vsub.f32 %v3458_v21, %v3537_v50  ;;  %v3571_v45 = vsub.f32 %v3467_v25, %v3549_v4 }
0x1d8c   :  { %v3569_v55 = vsub.f32 %v3461_v8, %v3541_v26  ;;  %v3573_v3 = vsub.f32 %v3473_v1, %v3557_v42  ;;  %v3570_v20 = vsub.f32 %v3464_v58, %v3545_v57  ;;  %v3572_v21 = vsub.f32 %v3470_v35, %v3553_v51 }
0x1d8d   :  { %v3574_v11 = vmul.f32 1.442695, %v3566_v38  ;;  %v3576_v14 = vmul.f32 1.442695, %v3567_v13  ;;  %v3578_v44 = vmul.f32 1.442695, %v3568_v36 }
0x1d8e   :  { %v3584_v49 = vmul.f32 1.442695, %v3571_v45  ;;  %v3580_v9 = vmul.f32 1.442695, %v3569_v55  ;;  %v3588_v63 = vmul.f32 1.442695, %v3573_v3 }
0x1d8f   :  { %6645 = vpow2.f32 %v3574_v11  ;;  %v3582_v25 = vmul.f32 1.442695, %v3570_v20  ;;  %v3586_v8 = vmul.f32 1.442695, %v3572_v21 }
0x1d90   :  { %6647 = vpow2.f32 %v3576_v14 }
0x1d91   :  { %6649 = vpow2.f32 %v3578_v44 }
0x1d92   :  { %6651 = vpow2.f32 %v3584_v49 }
0x1d93   :  { %6653 = vpow2.f32 %v3580_v9 }
0x1d94   :  { %6655 = vpow2.f32 %v3588_v63 }
0x1d95   :  { %6657 = vpow2.f32 %v3582_v25 }
0x1d96   :  { %6659 = vpow2.f32 %v3586_v8 }
0x1d99   :  { %v6646_v40 = vpop.eup %6645 }
0x1d9a   :  { %v6648_v56 = vpop.eup %6647  ;;  %3599 = vperm.xlu1 %6467, %v6646_v40  }
0x1d9b   :  { %3602 = vperm.xlu0 %6468, %v6648_v56   ;;  %v6650_v1 = vpop.eup %6649 }
0x1d9c   :  { %v6652_v2 = vpop.eup %6651 }
0x1d9d   :  { %v6654_v58 = vpop.eup %6653 }
0x1d9e   :  { %3605 = vperm.xlu1 %6467, %v6650_v1   ;;  %v6656_v12 = vpop.eup %6655 }
0x1d9f   :  { %3614 = vperm.xlu0 %6468, %v6652_v2   ;;  %v6658_v52 = vpop.eup %6657 }
0x1da0   :  { %v6660_v35 = vpop.eup %6659 }
0x1da2   :  { %3608 = vperm.xlu1 %6467, %v6654_v58  }
0x1da3   :  { %3620 = vperm.xlu0 %6468, %v6656_v12  }
0x1da6   :  { %3611 = vperm.xlu1 %6467, %v6658_v52  }
0x1daa   :  { %3617 = vperm.xlu1 %6467, %v6660_v35  }
0x1e19   :  { %v3600_v59 = vpop.permute.xlu1 %3599 }
0x1e1a   :  { %v3603_v7 = vpop.permute.xlu0 %3602  ;;  %v3625_v26 = vrot.slane %v3600_v59, %v7292_v15 }
0x1e1b   :  { %v3629_v4 = vrot.slane %v3603_v7, %v7292_v15 }
0x1e1d   :  { %v3606_v50 = vpop.permute.xlu1 %3605  ;;  %v3654_v45 = vsel %vm966_vm3, %v3629_v4, %v3625_v26 }
0x1e1e   :  { %v3615_v13 = vpop.permute.xlu0 %3614  ;;  %v3633_v36 = vrot.slane %v3606_v50, %v7292_v15 }
0x1e1f   :  { %v3645_v49 = vrot.slane %v3615_v13, %v7292_v15 }
0x1e20   :  { %v3655_v14 = vsel %vm968_vm4, %v3633_v36, %v3654_v45 }
0x1e21   :  { %v3609_v38 = vpop.permute.xlu1 %3608 }
0x1e22   :  { %v3637_v42 = vrot.slane %v3609_v38, %v7292_v15  ;;  %v3621_v44 = vpop.permute.xlu0 %3620 }
0x1e23   :  { %v3653_v9 = vrot.slane %v3621_v44, %v7292_v15 }
0x1e24   :  { %v3656_v55 = vsel %vm970_vm5, %v3637_v42, %v3655_v14 }
0x1e25   :  { %v3612_v11 = vpop.permute.xlu1 %3611 }
0x1e26   :  { %v3641_v57 = vrot.slane %v3612_v11, %v7292_v15 }
0x1e28   :  { %v3657_v3 = vsel %vm972_vm6, %v3641_v57, %v3656_v55 }
0x1e29   :  { %v3618_v51 = vpop.permute.xlu1 %3617  ;;  %v3658_v63 = vsel %vm974_vm7, %v3645_v49, %v3657_v3 }
0x1e2a   :  { %v3649_v20 = vrot.slane %v3618_v51, %v7292_v15 }
0x1e2c   :  { %v3659_v21 = vsel %vm976_vm8, %v3649_v20, %v3658_v63  ;;  %v8534_v63 = vld [vmem:[#allocation13_spill] sm:$0xff] }
0x1e2d   :  { %v3660_v25 = vsel %vm978_vm9, %v3653_v9, %v3659_v21 }
0x1e2e   :  { %v3662_v8 = vsel %vm981_vm10, %v3660_v25, 0.0 }
0x1e2f   :  { %3663 = vadd.xlane.f32.xlu1 %v3662_v8  ;;  %v8535_v8 = vld [vmem:[#allocation14_spill] sm:$0xff] }
0x1ebc   :  { %v3664_v59 = vpop.xlane.xlu1 %3663 }
0x1ebd   :  { %6661 = vrcp.f32 %v3664_v59 }
0x1ec7   :  { %v6662_v7 = vpop.eup %6661 }
0x1ec8   :  { %v3666_v50 = vmul.f32 %v6662_v7, %v3664_v59 }
0x1eca   :  { %v3667_v4 = vsub.f32 2.0, %v3666_v50 }
0x1ecc   :  { %v3668_v26 = vmul.f32 %v6662_v7, %v3667_v4 }
0x1ece   :  { %v3677_v38 = vrot.slane %v3668_v26, %v7311_v60  ;;  %v3681_v36 = vrot.slane %v3668_v26, %v7314_v61  ;;  %v3673_v45 = vrot.slane %v3668_v26, %v7223_v41  ;;  %v3685_v14 = vrot.slane %v3668_v26, %v7266_v30 }
0x1ecf   :  { %v3689_v55 = vrot.slane %v3668_v26, %v7320_v6  ;;  %v3693_v3 = vrot.slane %v3668_v26, %v7324_v32  ;;  %v3697_v49 = vrot.slane %v3668_v26, %v7328_v19  ;;  %v3701_v51 = vrot.slane %v3668_v26, %v7332_v16  ;;  %v8536_v26 = vld [vmem:[#allocation15_spill] sm:$0xff] }
0x1ed0   :  { %v3711_v13 = vmul.f32 %v6648_v56, %v3677_v38  ;;  %v3712_v42 = vmul.f32 %v6650_v1, %v3681_v36  ;;  %v3710_v11 = vmul.f32 %v6646_v40, %v3673_v45  ;;  %v3713_v57 = vmul.f32 %v6654_v58, %v3685_v14  ;;  %v8537_v14 = vld [vmem:[#allocation16_spill] sm:$0xff] }
0x1ed1   :  { %v3714_v44 = vmul.f32 %v6658_v52, %v3689_v55  ;;  %v3715_v56 = vmul.f32 %v6652_v2, %v3693_v3  ;;  %v3716_v1 = vmul.f32 %v6660_v35, %v3697_v49  ;;  %v3717_v40 = vmul.f32 %v6656_v12, %v3701_v51 }
0x1ed2   :  { %3725 = vperm.xlu0 %6468, %v3711_v13  }
0x1ed6   :  { %3730 = vperm.xlu0 %6468, %v3712_v42  }
0x1eda   :  { %3720 = vperm.xlu0 %6468, %v3710_v11  }
0x1ede   :  { %3735 = vperm.xlu0 %6468, %v3713_v57  }
0x1ee2   :  { %3740 = vperm.xlu0 %6468, %v3714_v44  }
0x1ee6   :  { %3745 = vperm.xlu0 %6468, %v3715_v56  }
0x1eea   :  { %3750 = vperm.xlu0 %6468, %v3716_v1  }
0x1eee   :  { %3755 = vperm.xlu0 %6468, %v3717_v40  }
0x1f51   :  { %v3726_v20 = vpop.permute.xlu0 %3725 }
0x1f52   :  { %v3759_v58 = vmul.f32 %v7830_v54, %v3726_v20  ;;  %v8538_v20 = vld [vmem:[#allocation17_spill] sm:$0xff] }
0x1f54   :  { %v3773_v52 = vsel %vm108_vm1, %v3759_v58, 0.0 }
0x1f55   :  { %v3731_v9 = vpop.permute.xlu0 %3730  ;;  %v3774_v59 = vrot.slane %v3773_v52, 4 }
0x1f56   :  { %v3760_v21 = vmul.f32 %v8534_v63, %v3731_v9 }
0x1f57   :  { %v3775_v13 = vadd.f32 %v3774_v59, %v3773_v52 }
0x1f58   :  { %v3780_v7 = vsel %vm108_vm1, %v3760_v21, 0.0 }
0x1f59   :  { %v3721_v25 = vpop.permute.xlu0 %3720  ;;  %v3781_v12 = vrot.slane %v3780_v7, 4  ;;  %v3776_v55 = vrot.slane %v3775_v13, 2 }
0x1f5a   :  { %v3758_v2 = vmul.f32 %v8535_v8, %v3721_v25 }
0x1f5b   :  { %v3782_v11 = vadd.f32 %v3781_v12, %v3780_v7  ;;  %v3777_v9 = vadd.f32 %v3776_v55, %v3775_v13 }
0x1f5c   :  { %v3766_v35 = vsel %vm108_vm1, %v3758_v2, 0.0 }
0x1f5d   :  { %v3767_v50 = vrot.slane %v3766_v35, 4  ;;  %v3736_v4 = vpop.permute.xlu0 %3735  ;;  %v3783_v40 = vrot.slane %v3782_v11, 2 }
0x1f5e   :  { %v3761_v38 = vmul.f32 %v8536_v26, %v3736_v4  ;;  %v3778_v4 = vrot.slane %v3777_v9, 1 }
0x1f5f   :  { %v3768_v54 = vadd.f32 %v3767_v50, %v3766_v35  ;;  %v3784_v7 = vadd.f32 %v3783_v40, %v3782_v11  ;;  %v8539_v35 = vld [vmem:[#allocation18_spill] sm:$0xff] }
0x1f60   :  { %v3787_v36 = vsel %vm108_vm1, %v3761_v38, 0.0 }
0x1f61   :  { %v3788_v42 = vrot.slane %v3787_v36, 4  ;;  %v3741_v45 = vpop.permute.xlu0 %3740  ;;  %v3769_v3 = vrot.slane %v3768_v54, 2 }
0x1f62   :  { %v3762_v57 = vmul.f32 %v8537_v14, %v3741_v45 }
0x1f63   :  { %v3789_v44 = vadd.f32 %v3788_v42, %v3787_v36  ;;  %v3770_v21 = vadd.f32 %v3769_v3, %v3768_v54  ;;  %v3785_v54 = vrot.slane %v3784_v7, 1 }
0x1f64   :  { %v3794_v56 = vsel %vm108_vm1, %v3762_v57, 0.0 }
0x1f65   :  { %v3790_v49 = vrot.slane %v3789_v44, 2  ;;  %v3795_v1 = vrot.slane %v3794_v56, 4  ;;  %v3746_v51 = vpop.permute.xlu0 %3745  ;;  %v3771_v38 = vrot.slane %v3770_v21, 1 }
0x1f66   :  { %v3763_v58 = vmul.f32 %v8538_v20, %v3746_v51 }
0x1f67   :  { %v3796_v63 = vadd.f32 %v3795_v1, %v3794_v56  ;;  %v3791_v25 = vadd.f32 %v3790_v49, %v3789_v44  ;;  %v3779_v44 = vadd.f32 %v3778_v4, %v3777_v9  ;;  %v3772_v11 = vadd.f32 %v3771_v38, %v3770_v21 }
0x1f68   :  { %v3801_v52 = vsel %vm108_vm1, %v3763_v58, 0.0  ;;  %v3786_v58 = vadd.f32 %v3785_v54, %v3784_v7 }
0x1f69   :  { %v3797_v8 = vrot.slane %v3796_v63, 2  ;;  %v3802_v2 = vrot.slane %v3801_v52, 4  ;;  %v3751_v59 = vpop.permute.xlu0 %3750  ;;  %v3792_v42 = vrot.slane %v3791_v25, 1 }
0x1f6a   :  { %v3764_v50 = vmul.f32 %v8539_v35, %v3751_v59  ;;  %v3822_v35 = vmul.f32 %v3772_v11, %v7381_v34  ;;  %v3824_v21 = vmul.f32 %v3786_v58, %v7381_v34 }
0x1f6b   :  { %v3798_v12 = vadd.f32 %v3797_v8, %v3796_v63  ;;  %v3803_v26 = vadd.f32 %v3802_v2, %v3801_v52  ;;  %v3793_v1 = vadd.f32 %v3792_v42, %v3791_v25  ;;  %v3823_v52 = vmul.f32 %v3779_v44, %v7381_v34 }
0x1f6c   :  { %v3808_v36 = vsel %vm108_vm1, %v3764_v50, 0.0 }
0x1f6d   :  { %v3804_v45 = vrot.slane %v3803_v26, 2  ;;  %v3809_v13 = vrot.slane %v3808_v36, 4  ;;  %v3756_v14 = vpop.permute.xlu0 %3755  ;;  %v3799_v57 = vrot.slane %v3798_v12, 1  ;;  %v3838_v4 = vrot.slane %v3823_v52, 7 }
0x1f6e   :  { %v3765_v55 = vmul.f32 %v7858_v10, %v3756_v14  ;;  %v3825_v10 = vmul.f32 %v3793_v1, %v7381_v34 }
0x1f6f   :  { %v3805_v3 = vadd.f32 %v3804_v45, %v3803_v26  ;;  %v3810_v56 = vadd.f32 %v3809_v13, %v3808_v36  ;;  %v3800_v63 = vadd.f32 %v3799_v57, %v3798_v12  ;;  %v3839_v38 = vsel %vm966_vm3, %v3838_v4, %v3822_v35 }
0x1f70   :  { %v3815_v49 = vsel %vm108_vm1, %v3765_v55, 0.0  ;;  %v3842_v36 = vrot.slane %v3825_v10, 5  ;;  %v3840_v13 = vrot.slane %v3824_v21, 6 }
0x1f71   :  { %v3806_v51 = vrot.slane %v3805_v3, 1  ;;  %v3811_v40 = vrot.slane %v3810_v56, 2  ;;  %v3816_v20 = vrot.slane %v3815_v49, 4  ;;  %v3826_v25 = vmul.f32 %v3800_v63, %v7381_v34 }
0x1f72   :  { %v3841_v55 = vsel %vm968_vm4, %v3840_v13, %v3839_v38 }
0x1f73   :  { %v3807_v8 = vadd.f32 %v3806_v51, %v3805_v3  ;;  %v3812_v2 = vadd.f32 %v3811_v40, %v3810_v56  ;;  %v3817_v59 = vadd.f32 %v3816_v20, %v3815_v49  ;;  %v3844_v14 = vrot.slane %v3826_v25, 4 }
0x1f74   :  { %v3843_v56 = vsel %vm970_vm5, %v3842_v36, %v3841_v55 }
0x1f75   :  { %v3813_v9 = vrot.slane %v3812_v2, 1  ;;  %v3818_v50 = vrot.slane %v3817_v59, 2  ;;  %v3827_v26 = vmul.f32 %v3807_v8, %v7381_v34  ;;  %v3845_v11 = vsel %vm972_vm6, %v3844_v14, %v3843_v56 }
0x1f77   :  { %v3814_v7 = vadd.f32 %v3813_v9, %v3812_v2  ;;  %v3819_v12 = vadd.f32 %v3818_v50, %v3817_v59  ;;  %v3846_v54 = vrot.slane %v3827_v26, 3 }
0x1f79   :  { %v3820_v42 = vrot.slane %v3819_v12, 1  ;;  %v3828_v45 = vmul.f32 %v3814_v7, %v7381_v34  ;;  %v3847_v49 = vsel %vm974_vm7, %v3846_v54, %v3845_v11 }
0x1f7b   :  { %v3821_v57 = vadd.f32 %v3820_v42, %v3819_v12  ;;  %v3848_v44 = vrot.slane %v3828_v45, 2 }
0x1f7d   :  { %v3829_v3 = vmul.f32 %v3821_v57, %v7381_v34  ;;  %v3849_v51 = vsel %vm976_vm8, %v3848_v44, %v3847_v49 }
0x1f7f   :  { %v3850_v1 = vrot.slane %v3829_v3, 1 }
0x1f81   :  { %v3851_v40 = vsel %vm978_vm9, %v3850_v1, %v3849_v51 }
0x1f82   :  { %v3853_v20 = vsel %vm108_vm1, %v3851_v40, 0.0 }
0x1f83   :  { %3854 = vadd.xlane.f32.xlu0 %v3853_v20 }
0x2010   :  { %v3855_v58 = vpop.xlane.xlu0 %3854 }
0x2011   :  { %v3856_v63 = vadd.f32 %v3855_v58, %v7404_v48 }
0x2013   :  { %3859 = vperm.xlu1 %6467, %v3856_v63  }
0x2017   :  { %3864 = vrot.lane.b32.xlu1 %v7900_v62, %s6950_s10 }
0x201b   :  { %3874 = vrot.lane.b32.xlu1 %v7900_v62, %s6951_s11 }
0x2092   :  { %v3860_v52 = vpop.permute.xlu1 %3859 }
0x2093   :  { %v3862_v8 = vmul.f32 %v3860_v52, %v7411_v53 }
0x2095   :  { %v3863_v2 = vadd.f32 %v3862_v8, %v7415_v28 }
0x2096   :  { %v3865_v59 = vpop.permute.xlu1 %3864 }
0x2097   :  { %v3867_v35 = vadd.f32 %v3865_v59, %v3863_v2 }
0x2099   :  { %v6030_v10 = vmul.f32 -1.442695, %v3867_v35 }
0x209a   :  { %v3875_v25 = vpop.permute.xlu1 %3874 }
0x209b   :  { %6663 = vpow2.f32 %v6030_v10 }
0x20a5   :  { %v6664_v9 = vpop.eup %6663 }
0x20a6   :  { %v3871_v50 = vadd.f32 1.0, %v6664_v9 }
0x20a8   :  { %6665 = vrcp.f32 %v3871_v50 }
0x20b2   :  { %v6666_v21 = vpop.eup %6665 }
0x20b3   :  { %v3877_v4 = vmul.f32 %v6666_v21, %v3875_v25  ;;  %v3884_v12 = vsub.f32 1.0, %v6666_v21  ;;  %v3890_v36 = vmul.f32 %v6666_v21, %v7888_v0 }
0x20b5   :  { %3879 = vrot.lane.b32.xlu1 %v3877_v4, %s6952_s3 }
0x2127   :  { %v3880_v26 = vpop.permute.xlu1 %3879 }
0x2128   :  { %v3882_v7 = vadd.f32 %v3880_v26, %v3863_v2 }
0x212a   :  { %6667 = vtanh.f32 %v3882_v7 }
0x2134   :  { %v6668_v62 = vpop.eup %6667 }
0x2135   :  { %3886 = vrot.lane.b32.xlu0 %v6668_v62, %s6950_s10 }
0x21a7   :  { %v3887_v38 = vpop.permute.xlu0 %3886 }
0x21a8   :  { %v3889_v42 = vmul.f32 %v3887_v38, %v3884_v12 }
0x21aa   :  { %v8033_v45 = vadd.f32 %v3890_v36, %v3889_v42 }
0x21ac   :  { %3893 = vrot.lane.b32.xlu1 %v8033_v45, %s6950_s10 }
0x221e   :  { %v3894_v13 = vpop.permute.xlu1 %3893 }
0x221f   :  { %6281 = vmatmul.mubr.msk.f32.vlgmr.msra.gmra.mrb[12].mxu1 %vm108_vm1, %v3894_v13 }
0x2220   :  { %6435 = vmatpush3.bf16.msra.mxu1 %v7176_v18  ;;  %6302 = vmatprep.mubr.msk.f32.mxu1 %vm6946_vm0, %v8522_v17 }
0x2221   :  { %6436 = vmatprep.subr.bf16.mxu1 %v8523_v5 }
0x2224   :  { %6438 = vmatpush3.bf16.msra.mxu1 %v7183_v22 }
0x2225   :  { %6445 = vmatprep.subr.bf16.mxu1 %v8523_v5 }
0x22f2   :  { %v3963_v0 = vpop.f32.mrb[12].mxu1 }
0x22f3   :  { %v8045_v14 = vadd.f32 %v3963_v0, %v7234_v46  ;;  %v6282_v54 = vpop.f32.mrb[13].mxu1 }
0x22f5   :  { %v3968_v57 = vcombine.high %v8045_v14, %v8045_v14  ;;  %v3975_v18 = vrot.slane %v8045_v14, %v7237_v47 }
0x22f7   :  { %v3982_v55 = vrot.slane %v3968_v57, %v7237_v47  ;;  %v3983_v44 = vcombine.high %v3975_v18, %v3975_v18  ;;  %v3991_v3 = vrot.slane %v3975_v18, %v7237_v47 }
0x22f9   :  { %v3984_v56 = vcombine.high %v3982_v55, %v3982_v55  ;;  %v3998_v22 = vrot.slane %v3982_v55, %v7237_v47  ;;  %v4005_v11 = vrot.slane %v3983_v44, %v7237_v47  ;;  %v4013_v49 = vcombine.high %v3991_v3, %v3991_v3 }
0x22fa   :  { %v4020_v1 = vrot.slane %v3991_v3, %v7223_v41 }
0x22fb   :  { %v4012_v51 = vrot.slane %v3984_v56, %v7237_v47  ;;  %v4015_v40 = vcombine.high %v4005_v11, %v4005_v11  ;;  %v4024_v20 = vrot.slane %v4005_v11, %v7223_v41  ;;  %v4028_v58 = vrot.slane %v4013_v49, %v7223_v41 }
0x22fc   :  { %v4036_v63 = vrot.slane %v3998_v22, %v7223_v41  ;;  %v4057_v52 = vadd.f32 %v4020_v1, %v7205_v23  ;;  %v4014_v8 = vcombine.high %v3998_v22, %v3998_v22 }
0x22fd   :  { %v4016_v2 = vcombine.high %v4012_v51, %v4012_v51  ;;  %v4040_v59 = vrot.slane %v4012_v51, %v7223_v41  ;;  %v4032_v35 = vrot.slane %v4015_v40, %v7223_v41  ;;  %v4058_v10 = vadd.f32 %v4024_v20, %v7207_v24 }
0x22fe   :  { %6669 = vtanh.f32 %v4057_v52  ;;  %v4059_v9 = vadd.f32 %v4028_v58, %v7209_v27  ;;  %v4061_v21 = vadd.f32 %v4036_v63, %v7213_v31  ;;  %v4044_v26 = vrot.slane %v4014_v8, %v7223_v41 }
0x22ff   :  { %v4062_v50 = vadd.f32 %v4040_v59, %v7215_v33  ;;  %v4048_v25 = vrot.slane %v4016_v2, %v7223_v41  ;;  %6671 = vtanh.f32 %v4058_v10  ;;  %v4060_v7 = vadd.f32 %v4032_v35, %v7211_v29 }
0x2300   :  { %6673 = vtanh.f32 %v4059_v9  ;;  %v4063_v62 = vadd.f32 %v4044_v26, %v7220_v39 }
0x2301   :  { %v4064_v4 = vadd.f32 %v4048_v25, %v7230_v43  ;;  %6675 = vtanh.f32 %v4062_v50 }
0x2302   :  { %6677 = vtanh.f32 %v4061_v21 }
0x2303   :  { %6679 = vtanh.f32 %v4064_v4 }
0x2304   :  { %6681 = vtanh.f32 %v4060_v7 }
0x2305   :  { %6683 = vtanh.f32 %v4063_v62 }
0x2308   :  { %v6670_v12 = vpop.eup %6669 }
0x2309   :  { %v4073_v38 = vmul.f32 %v6670_v12, %v7272_v37  ;;  %v6672_v36 = vpop.eup %6671 }
0x230a   :  { %v6674_v42 = vpop.eup %6673  ;;  %v4074_v0 = vmul.f32 %v6672_v36, %v7272_v37 }
0x230b   :  { %v4081_v13 = vsel %vm108_vm1, %v4073_v38, 0.0  ;;  %v6676_v54 = vpop.eup %6675  ;;  %v4075_v57 = vmul.f32 %v6674_v42, %v7272_v37 }
0x230c   :  { %4082 = vadd.xlane.f32.xlu1 %v4081_v13  ;;  %v6678_v18 = vpop.eup %6677  ;;  %v4084_v55 = vsel %vm108_vm1, %v4074_v0, 0.0  ;;  %v4078_v44 = vmul.f32 %v6676_v54, %v7272_v37 }
0x230d   :  { %v6680_v3 = vpop.eup %6679  ;;  %4085 = vadd.xlane.f32.xlu0 %v4084_v55  ;;  %v4087_v56 = vsel %vm108_vm1, %v4075_v57, 0.0  ;;  %v4077_v22 = vmul.f32 %v6678_v18, %v7272_v37 }
0x230e   :  { %v6682_v11 = vpop.eup %6681  ;;  %v4096_v49 = vsel %vm108_vm1, %v4078_v44, 0.0  ;;  %v4080_v1 = vmul.f32 %v6680_v3, %v7272_v37 }
0x230f   :  { %v4093_v51 = vsel %vm108_vm1, %v4077_v22, 0.0  ;;  %v4076_v40 = vmul.f32 %v6682_v11, %v7272_v37  ;;  %v6684_v20 = vpop.eup %6683 }
0x2310   :  { %4088 = vadd.xlane.f32.xlu1 %v4087_v56  ;;  %v4102_v58 = vsel %vm108_vm1, %v4080_v1, 0.0  ;;  %v4079_v52 = vmul.f32 %v6684_v20, %v7272_v37 }
0x2311   :  { %4097 = vadd.xlane.f32.xlu0 %v4096_v49  ;;  %v4090_v63 = vsel %vm108_vm1, %v4076_v40, 0.0 }
0x2312   :  { %v4099_v8 = vsel %vm108_vm1, %v4079_v52, 0.0 }
0x2314   :  { %4094 = vadd.xlane.f32.xlu1 %v4093_v51 }
0x2315   :  { %4103 = vadd.xlane.f32.xlu0 %v4102_v58 }
0x2318   :  { %4091 = vadd.xlane.f32.xlu1 %v4090_v63 }
0x231c   :  { %4100 = vadd.xlane.f32.xlu1 %v4099_v8 }
0x2399   :  { %v4083_v2 = vpop.xlane.xlu1 %4082 }
0x239a   :  { %v4086_v59 = vpop.xlane.xlu0 %4085  ;;  %v4116_v50 = vrot.slane %v4083_v2, %v7292_v15 }
0x239b   :  { %v4120_v10 = vrot.slane %v4086_v59, %v7292_v15 }
0x239d   :  { %v4089_v35 = vpop.xlane.xlu1 %4088  ;;  %v4145_v4 = vsel %vm966_vm3, %v4120_v10, %v4116_v50 }
0x239e   :  { %v4098_v21 = vpop.xlane.xlu0 %4097  ;;  %v4124_v25 = vrot.slane %v4089_v35, %v7292_v15 }
0x239f   :  { %v4136_v38 = vrot.slane %v4098_v21, %v7292_v15 }
0x23a0   :  { %v4146_v62 = vsel %vm968_vm4, %v4124_v25, %v4145_v4 }
0x23a1   :  { %v4095_v9 = vpop.xlane.xlu1 %4094 }
0x23a2   :  { %v4132_v12 = vrot.slane %v4095_v9, %v7292_v15  ;;  %v4104_v36 = vpop.xlane.xlu0 %4103 }
0x23a3   :  { %v4144_v18 = vrot.slane %v4104_v36, %v7292_v15 }
0x23a5   :  { %v4092_v26 = vpop.xlane.xlu1 %4091 }
0x23a6   :  { %v4128_v7 = vrot.slane %v4092_v26, %v7292_v15 }
0x23a8   :  { %v4147_v42 = vsel %vm970_vm5, %v4128_v7, %v4146_v62 }
0x23a9   :  { %v4101_v13 = vpop.xlane.xlu1 %4100  ;;  %v4148_v0 = vsel %vm972_vm6, %v4132_v12, %v4147_v42 }
0x23aa   :  { %v4140_v54 = vrot.slane %v4101_v13, %v7292_v15  ;;  %v4149_v57 = vsel %vm974_vm7, %v4136_v38, %v4148_v0 }
0x23ac   :  { %v4150_v55 = vsel %vm976_vm8, %v4140_v54, %v4149_v57 }
0x23ad   :  { %v4151_v44 = vsel %vm978_vm9, %v4144_v18, %v4150_v55 }
0x23ae   :  { %v4153_v3 = vsel %vm981_vm10, %v4151_v44, -inf }
0x23af   :  { %4154 = vmax.xlane.f32.xlu1 %v4153_v3 }
0x243c   :  { %v4155_v56 = vpop.xlane.xlu1 %4154 }
0x243d   :  { %v4160_v22 = vrot.slane %v4155_v56, %v7223_v41  ;;  %v4164_v11 = vrot.slane %v4155_v56, %v7311_v60  ;;  %v4168_v49 = vrot.slane %v4155_v56, %v7314_v61  ;;  %v4176_v1 = vrot.slane %v4155_v56, %v7320_v6 }
0x243e   :  { %v4184_v51 = vrot.slane %v4155_v56, %v7328_v19  ;;  %v4172_v58 = vrot.slane %v4155_v56, %v7266_v30  ;;  %v4180_v4 = vrot.slane %v4155_v56, %v7324_v32  ;;  %v4188_v38 = vrot.slane %v4155_v56, %v7332_v16 }
0x243f   :  { %v4197_v40 = vsub.f32 %v4083_v2, %v4160_v22  ;;  %v4198_v20 = vsub.f32 %v4086_v59, %v4164_v11  ;;  %v4199_v63 = vsub.f32 %v4089_v35, %v4168_v49  ;;  %v4201_v52 = vsub.f32 %v4095_v9, %v4176_v1 }
0x2440   :  { %v4203_v50 = vsub.f32 %v4101_v13, %v4184_v51  ;;  %v4200_v7 = vsub.f32 %v4092_v26, %v4172_v58  ;;  %v4202_v2 = vsub.f32 %v4098_v21, %v4180_v4  ;;  %v4204_v35 = vsub.f32 %v4104_v36, %v4188_v38 }
0x2441   :  { %v4205_v8 = vmul.f32 1.442695, %v4197_v40  ;;  %v4207_v10 = vmul.f32 1.442695, %v4198_v20  ;;  %v4213_v25 = vmul.f32 1.442695, %v4201_v52 }
0x2442   :  { %v4209_v62 = vmul.f32 1.442695, %v4199_v63  ;;  %v4217_v12 = vmul.f32 1.442695, %v4203_v50  ;;  %v4211_v59 = vmul.f32 1.442695, %v4200_v7 }
0x2443   :  { %6685 = vpow2.f32 %v4205_v8  ;;  %v4215_v9 = vmul.f32 1.442695, %v4202_v2  ;;  %v4219_v0 = vmul.f32 1.442695, %v4204_v35 }
0x2444   :  { %6687 = vpow2.f32 %v4207_v10 }
0x2445   :  { %6689 = vpow2.f32 %v4213_v25 }
0x2446   :  { %6691 = vpow2.f32 %v4209_v62 }
0x2447   :  { %6693 = vpow2.f32 %v4217_v12 }
0x2448   :  { %6695 = vpow2.f32 %v4211_v59 }
0x2449   :  { %6697 = vpow2.f32 %v4215_v9 }
0x244a   :  { %6699 = vpow2.f32 %v4219_v0 }
0x244d   :  { %v6686_v42 = vpop.eup %6685 }
0x244e   :  { %v6688_v13 = vpop.eup %6687  ;;  %4230 = vperm.xlu0 %6468, %v6686_v42  }
0x244f   :  { %4233 = vperm.xlu1 %6467, %v6688_v13   ;;  %v6690_v26 = vpop.eup %6689 }
0x2450   :  { %v6692_v54 = vpop.eup %6691 }
0x2451   :  { %v6694_v57 = vpop.eup %6693 }
0x2452   :  { %4242 = vperm.xlu0 %6468, %v6690_v26   ;;  %v6696_v18 = vpop.eup %6695 }
0x2453   :  { %4236 = vperm.xlu1 %6467, %v6692_v54   ;;  %v6698_v21 = vpop.eup %6697 }
0x2454   :  { %v6700_v36 = vpop.eup %6699 }
0x2456   :  { %4248 = vperm.xlu0 %6468, %v6694_v57  }
0x2457   :  { %4239 = vperm.xlu1 %6467, %v6696_v18  }
0x245b   :  { %4245 = vperm.xlu1 %6467, %v6698_v21  }
0x245f   :  { %4251 = vperm.xlu1 %6467, %v6700_v36  }
0x24cd   :  { %v4231_v44 = vpop.permute.xlu0 %4230 }
0x24ce   :  { %v4234_v55 = vpop.permute.xlu1 %4233  ;;  %v4256_v22 = vrot.slane %v4231_v44, %v7292_v15 }
0x24cf   :  { %v4260_v56 = vrot.slane %v4234_v55, %v7292_v15 }
0x24d1   :  { %v4243_v49 = vpop.permute.xlu0 %4242  ;;  %v4285_v51 = vsel %vm966_vm3, %v4260_v56, %v4256_v22 }
0x24d2   :  { %v4237_v3 = vpop.permute.xlu1 %4236  ;;  %v4272_v63 = vrot.slane %v4243_v49, %v7292_v15 }
0x24d3   :  { %v4264_v11 = vrot.slane %v4237_v3, %v7292_v15 }
0x24d5   :  { %v4286_v20 = vsel %vm968_vm4, %v4264_v11, %v4285_v51  ;;  %v4249_v8 = vpop.permute.xlu0 %4248 }
0x24d6   :  { %v4240_v1 = vpop.permute.xlu1 %4239  ;;  %v4280_v4 = vrot.slane %v4249_v8, %v7292_v15 }
0x24d7   :  { %v4268_v40 = vrot.slane %v4240_v1, %v7292_v15 }
0x24d9   :  { %v4287_v58 = vsel %vm970_vm5, %v4268_v40, %v4286_v20 }
0x24da   :  { %v4246_v52 = vpop.permute.xlu1 %4245  ;;  %v4288_v50 = vsel %vm972_vm6, %v4272_v63, %v4287_v58 }
0x24db   :  { %v4276_v10 = vrot.slane %v4246_v52, %v7292_v15 }
0x24dd   :  { %v4289_v25 = vsel %vm974_vm7, %v4276_v10, %v4288_v50  ;;  %v8136_v10 = vld [vmem:[#allocation2 + $0x8] sm:$0xff] }
0x24de   :  { %v4252_v7 = vpop.permute.xlu1 %4251  ;;  %v4290_v12 = vsel %vm976_vm8, %v4280_v4, %v4289_v25  ;;  %v8140_v4 = vld [vmem:[#allocation2 + $0x10] sm:$0xff] }
0x24df   :  { %v4284_v62 = vrot.slane %v4252_v7, %v7292_v15 }
0x24e1   :  { %v4291_v38 = vsel %vm978_vm9, %v4284_v62, %v4290_v12  ;;  %v8144_v62 = vld [vmem:[#allocation2 + $0x38] sm:$0xff] }
0x24e2   :  { %v4293_v2 = vsel %vm981_vm10, %v4291_v38, 0.0  ;;  %8540 = vst [vmem:[#allocation13_spill] sm:$0xff] %v8144_v62  ;;  %v8147_v38 = vld [vmem:[#allocation2] sm:$0xff] }
0x24e3   :  { %4294 = vadd.xlane.f32.xlu0 %v4293_v2 }
0x2570   :  { %v4295_v59 = vpop.xlane.xlu0 %4294 }
0x2571   :  { %6701 = vrcp.f32 %v4295_v59 }
0x257b   :  { %v6702_v35 = vpop.eup %6701 }
0x257c   :  { %v4297_v9 = vmul.f32 %v6702_v35, %v4295_v59 }
0x257e   :  { %v4298_v0 = vsub.f32 2.0, %v4297_v9 }
0x2580   :  { %v4299_v55 = vmul.f32 %v6702_v35, %v4298_v0 }
0x2582   :  { %v4332_v44 = vrot.slane %v4299_v55, %v7332_v16  ;;  %v4308_v3 = vrot.slane %v4299_v55, %v7311_v60  ;;  %v4312_v11 = vrot.slane %v4299_v55, %v7314_v61  ;;  %v4304_v1 = vrot.slane %v4299_v55, %v7223_v41 }
0x2583   :  { %v4316_v40 = vrot.slane %v4299_v55, %v7266_v30  ;;  %v4320_v58 = vrot.slane %v4299_v55, %v7320_v6  ;;  %v4328_v52 = vrot.slane %v4299_v55, %v7328_v19 }
0x2584   :  { %v4348_v56 = vmul.f32 %v6700_v36, %v4332_v44  ;;  %v4342_v22 = vmul.f32 %v6688_v13, %v4308_v3  ;;  %v4343_v49 = vmul.f32 %v6692_v54, %v4312_v11  ;;  %v4341_v51 = vmul.f32 %v6686_v42, %v4304_v1  ;;  %v8152_v3 = vld [vmem:[#allocation2 + $0x18] sm:$0xff] }
0x2585   :  { %v4344_v20 = vmul.f32 %v6696_v18, %v4316_v40  ;;  %v4345_v63 = vmul.f32 %v6690_v26, %v4320_v58  ;;  %v4324_v36 = vrot.slane %v4299_v55, %v7324_v32  ;;  %v4347_v54 = vmul.f32 %v6694_v57, %v4328_v52 }
0x2586   :  { %4386 = vperm.xlu0 %6468, %v4348_v56   ;;  %4356 = vperm.xlu1 %6467, %v4342_v22  }
0x2587   :  { %v4346_v13 = vmul.f32 %v6698_v21, %v4324_v36 }
0x258a   :  { %4361 = vperm.xlu1 %6467, %v4343_v49  }
0x258e   :  { %4351 = vperm.xlu1 %6467, %v4341_v51  }
0x2592   :  { %4366 = vperm.xlu1 %6467, %v4344_v20  }
0x2596   :  { %4371 = vperm.xlu1 %6467, %v4345_v63   ;;  %v8156_v63 = vld [vmem:[#allocation2 + $0x20] sm:$0xff] }
0x2597   :  { %8541 = vst [vmem:[#allocation14_spill] sm:$0xff] %v8156_v63 }
0x259a   :  { %4376 = vperm.xlu1 %6467, %v4346_v13  }
0x259e   :  { %4381 = vperm.xlu1 %6467, %v4347_v54  }
0x2605   :  { %v4357_v8 = vpop.permute.xlu1 %4356  ;;  %v4387_v25 = vpop.permute.xlu0 %4386 }
0x2606   :  { %v4390_v42 = vmul.f32 %v8136_v10, %v4357_v8  ;;  %v4396_v57 = vmul.f32 %v8144_v62, %v4387_v25 }
0x2608   :  { %v4404_v18 = vsel %vm108_vm1, %v4390_v42, 0.0  ;;  %v4446_v0 = vsel %vm108_vm1, %v4396_v57, 0.0 }
0x2609   :  { %v4362_v50 = vpop.permute.xlu1 %4361  ;;  %v4405_v7 = vrot.slane %v4404_v18, 4  ;;  %v4447_v49 = vrot.slane %v4446_v0, 4 }
0x260a   :  { %v4391_v26 = vmul.f32 %v8140_v4, %v4362_v50 }
0x260b   :  { %v4406_v35 = vadd.f32 %v4405_v7, %v4404_v18  ;;  %v4448_v54 = vadd.f32 %v4447_v49, %v4446_v0  ;;  %v8160_v7 = vld [vmem:[#allocation2 + $0x28] sm:$0xff] }
0x260c   :  { %v4411_v21 = vsel %vm108_vm1, %v4391_v26, 0.0  ;;  %8542 = vst [vmem:[#allocation15_spill] sm:$0xff] %v8160_v7 }
0x260d   :  { %v4352_v12 = vpop.permute.xlu1 %4351  ;;  %v4412_v59 = vrot.slane %v4411_v21, 4  ;;  %v4407_v1 = vrot.slane %v4406_v35, 2 }
0x260e   :  { %v4389_v2 = vmul.f32 %v8147_v38, %v4352_v12 }
0x260f   :  { %v4413_v22 = vadd.f32 %v4412_v59, %v4411_v21  ;;  %v4408_v8 = vadd.f32 %v4407_v1, %v4406_v35  ;;  %v4449_v59 = vrot.slane %v4448_v54, 2  ;;  %v8164_v1 = vld [vmem:[#allocation2 + $0x30] sm:$0xff] }
0x2610   :  { %v4397_v9 = vsel %vm108_vm1, %v4389_v2, 0.0  ;;  %8543 = vst [vmem:[#allocation16_spill] sm:$0xff] %v8164_v1 }
0x2611   :  { %v4398_v55 = vrot.slane %v4397_v9, 4  ;;  %v4367_v44 = vpop.permute.xlu1 %4366  ;;  %v4414_v13 = vrot.slane %v4413_v22, 2 }
0x2612   :  { %v4392_v56 = vmul.f32 %v8152_v3, %v4367_v44 }
0x2613   :  { %v4399_v11 = vadd.f32 %v4398_v55, %v4397_v9  ;;  %v4415_v57 = vadd.f32 %v4414_v13, %v4413_v22  ;;  %v4409_v9 = vrot.slane %v4408_v8, 1 }
0x2614   :  { %v4418_v51 = vsel %vm108_vm1, %v4392_v56, 0.0 }
0x2615   :  { %v4419_v40 = vrot.slane %v4418_v51, 4  ;;  %v4372_v20 = vpop.permute.xlu1 %4371  ;;  %v4400_v58 = vrot.slane %v4399_v11, 2  ;;  %v4410_v22 = vadd.f32 %v4409_v9, %v4408_v8 }
0x2616   :  { %v4393_v36 = vmul.f32 %v8156_v63, %v4372_v20 }
0x2617   :  { %v4420_v52 = vadd.f32 %v4419_v40, %v4418_v51  ;;  %v4401_v26 = vadd.f32 %v4400_v58, %v4399_v11  ;;  %v4416_v51 = vrot.slane %v4415_v57, 1  ;;  %v4450_v58 = vadd.f32 %v4449_v59, %v4448_v54 }
0x2618   :  { %v4425_v42 = vsel %vm108_vm1, %v4393_v36, 0.0  ;;  %v4454_v63 = vmul.f32 %v4410_v22, %v7381_v34 }
0x2619   :  { %v4421_v18 = vrot.slane %v4420_v52, 2  ;;  %v4426_v50 = vrot.slane %v4425_v42, 4  ;;  %v4377_v25 = vpop.permute.xlu1 %4376  ;;  %v4402_v56 = vrot.slane %v4401_v26, 1 }
0x261a   :  { %v4394_v21 = vmul.f32 %v8160_v7, %v4377_v25  ;;  %v4417_v25 = vadd.f32 %v4416_v51, %v4415_v57  ;;  %v4451_v7 = vrot.slane %v4450_v58, 1  ;;  %v4469_v57 = vrot.slane %v4454_v63, 7 }
0x261b   :  { %v4422_v12 = vadd.f32 %v4421_v18, %v4420_v52  ;;  %v4427_v2 = vadd.f32 %v4426_v50, %v4425_v42  ;;  %v4403_v18 = vadd.f32 %v4402_v56, %v4401_v26 }
0x261c   :  { %v4432_v55 = vsel %vm108_vm1, %v4394_v21, 0.0  ;;  %v4455_v8 = vmul.f32 %v4417_v25, %v7381_v34 }
0x261d   :  { %v4428_v44 = vrot.slane %v4427_v2, 2  ;;  %v4433_v0 = vrot.slane %v4432_v55, 4  ;;  %v4382_v35 = vpop.permute.xlu1 %4381  ;;  %v4423_v49 = vrot.slane %v4422_v12, 1 }
0x261e   :  { %v4395_v11 = vmul.f32 %v8164_v1, %v4382_v35 }
0x261f   :  { %v4429_v40 = vadd.f32 %v4428_v44, %v4427_v2  ;;  %v4434_v20 = vadd.f32 %v4433_v0, %v4432_v55  ;;  %v4424_v50 = vadd.f32 %v4423_v49, %v4422_v12  ;;  %v4453_v2 = vmul.f32 %v4403_v18, %v7381_v34 }
0x2620   :  { %v4439_v36 = vsel %vm108_vm1, %v4395_v11, 0.0  ;;  %v4452_v12 = vadd.f32 %v4451_v7, %v4450_v58  ;;  %v4471_v49 = vrot.slane %v4455_v8, 6 }
0x2621   :  { %v4430_v13 = vrot.slane %v4429_v40, 1  ;;  %v4435_v52 = vrot.slane %v4434_v20, 2  ;;  %v4440_v42 = vrot.slane %v4439_v36, 4  ;;  %v4456_v54 = vmul.f32 %v4424_v50, %v7381_v34 }
0x2622   :  { %v4470_v0 = vsel %vm966_vm3, %v4469_v57, %v4453_v2 }
0x2623   :  { %v4431_v21 = vadd.f32 %v4430_v13, %v4429_v40  ;;  %v4436_v5 = vadd.f32 %v4435_v52, %v4434_v20  ;;  %v4441_v62 = vadd.f32 %v4440_v42, %v4439_v36  ;;  %v4473_v56 = vrot.slane %v4456_v54, 5 }
0x2624   :  { %v4460_v20 = vmul.f32 %v4452_v12, %v7381_v34  ;;  %v4472_v36 = vsel %vm968_vm4, %v4471_v49, %v4470_v0 }
0x2625   :  { %v4437_v35 = vrot.slane %v4436_v5, 1  ;;  %v4442_v1 = vrot.slane %v4441_v62, 2  ;;  %v4457_v59 = vmul.f32 %v4431_v21, %v7381_v34 }
0x2627   :  { %v4438_v9 = vadd.f32 %v4437_v35, %v4436_v5  ;;  %v4443_v26 = vadd.f32 %v4442_v1, %v4441_v62  ;;  %v4475_v11 = vrot.slane %v4457_v59, 4  ;;  %v4474_v5 = vsel %vm970_vm5, %v4473_v56, %v4472_v36 }
0x2628   :  { %v4481_v1 = vrot.slane %v4460_v20, 1 }
0x2629   :  { %v4458_v55 = vmul.f32 %v4438_v9, %v7381_v34  ;;  %v4444_v44 = vrot.slane %v4443_v26, 1  ;;  %v4476_v62 = vsel %vm972_vm6, %v4475_v11, %v4474_v5 }
0x262b   :  { %v4445_v51 = vadd.f32 %v4444_v44, %v4443_v26  ;;  %v4477_v40 = vrot.slane %v4458_v55, 3 }
0x262d   :  { %v4459_v22 = vmul.f32 %v4445_v51, %v7381_v34  ;;  %v4478_v7 = vsel %vm974_vm7, %v4477_v40, %v4476_v62 }
0x262f   :  { %v4479_v63 = vrot.slane %v4459_v22, 2 }
0x2631   :  { %v4480_v58 = vsel %vm976_vm8, %v4479_v63, %v4478_v7 }
0x2632   :  { %v4482_v13 = vsel %vm978_vm9, %v4481_v1, %v4480_v58 }
0x2633   :  { %v4484_v52 = vsel %vm108_vm1, %v4482_v13, 0.0 }
0x2634   :  { %4485 = vadd.xlane.f32.xlu1 %v4484_v52 }
0x26c1   :  { %v4486_v42 = vpop.xlane.xlu1 %4485 }
0x26c2   :  { %v4487_v18 = vadd.f32 %v4486_v42, %v7404_v48 }
0x26c4   :  { %4490 = vperm.xlu0 %6468, %v4487_v18  }
0x26c8   :  { %4495 = vrot.lane.b32.xlu0 %v8045_v14, %s6950_s10 }
0x26cc   :  { %4505 = vrot.lane.b32.xlu0 %v8045_v14, %s6951_s11 }
0x2743   :  { %v4491_v50 = vpop.permute.xlu0 %4490 }
0x2744   :  { %v4493_v25 = vmul.f32 %v4491_v50, %v7411_v53 }
0x2746   :  { %v4494_v21 = vadd.f32 %v4493_v25, %v7415_v28 }
0x2747   :  { %v4496_v35 = vpop.permute.xlu0 %4495 }
0x2748   :  { %v4498_v2 = vadd.f32 %v4496_v35, %v4494_v21 }
0x274a   :  { %v6032_v54 = vmul.f32 -1.442695, %v4498_v2 }
0x274b   :  { %v4506_v26 = vpop.permute.xlu0 %4505 }
0x274c   :  { %6703 = vpow2.f32 %v6032_v54 }
0x2756   :  { %v6704_v8 = vpop.eup %6703 }
0x2757   :  { %v4502_v59 = vadd.f32 1.0, %v6704_v8 }
0x2759   :  { %6705 = vrcp.f32 %v4502_v59 }
0x2763   :  { %v6706_v9 = vpop.eup %6705 }
0x2764   :  { %v4508_v12 = vmul.f32 %v6706_v9, %v4506_v26  ;;  %v4515_v44 = vsub.f32 1.0, %v6706_v9  ;;  %v4521_v56 = vmul.f32 %v6706_v9, %v8033_v45 }
0x2766   :  { %4510 = vrot.lane.b32.xlu0 %v4508_v12, %s6952_s3 }
0x27d8   :  { %v4511_v57 = vpop.permute.xlu0 %4510 }
0x27d9   :  { %v4513_v55 = vadd.f32 %v4511_v57, %v4494_v21 }
0x27db   :  { %6707 = vtanh.f32 %v4513_v55 }
0x27e5   :  { %v6708_v14 = vpop.eup %6707 }
0x27e6   :  { %4517 = vrot.lane.b32.xlu1 %v6708_v14, %s6950_s10 }
0x2858   :  { %v4518_v0 = vpop.permute.xlu1 %4517 }
0x2859   :  { %v4520_v49 = vmul.f32 %v4518_v0, %v4515_v44 }
0x285b   :  { %v8194_v11 = vadd.f32 %v4521_v56, %v4520_v49 }
0x285d   :  { %4524 = vrot.lane.b32.xlu0 %v8194_v11, %s6950_s10 }
0x28cf   :  { %v4525_v51 = vpop.permute.xlu0 %4524 }
0x28d0   :  { %6292 = vmatmul.mubr.msk.f32.vlgmr.msra.gmra.mrb[14].mxu0 %vm108_vm1, %v4525_v51 }
0x28d1   :  { %6313 = vmatprep.mubr.msk.f32.mxu0 %vm6946_vm0, %v8522_v17 }
0x29a3   :  { %v4594_v40 = vpop.f32.mrb[14].mxu0 }
0x29a4   :  { %v8202_v20 = vadd.f32 %v4594_v40, %v7234_v46  ;;  %v6293_v22 = vpop.f32.mrb[15].mxu0 }
0x29a6   :  { %v4599_v45 = vcombine.high %v8202_v20, %v8202_v20  ;;  %v4606_v36 = vrot.slane %v8202_v20, %v7237_v47 }
0x29a8   :  { %v4613_v5 = vrot.slane %v4599_v45, %v7237_v47  ;;  %v4614_v62 = vcombine.high %v4606_v36, %v4606_v36  ;;  %v4622_v63 = vrot.slane %v4606_v36, %v7237_v47 }
0x29aa   :  { %v4615_v7 = vcombine.high %v4613_v5, %v4613_v5  ;;  %v4629_v1 = vrot.slane %v4613_v5, %v7237_v47  ;;  %v4636_v58 = vrot.slane %v4614_v62, %v7237_v47  ;;  %v4644_v13 = vcombine.high %v4622_v63, %v4622_v63 }
0x29ab   :  { %v4651_v52 = vrot.slane %v4622_v63, %v7223_v41 }
0x29ac   :  { %v4643_v42 = vrot.slane %v4615_v7, %v7237_v47  ;;  %v4646_v18 = vcombine.high %v4636_v58, %v4636_v58  ;;  %v4655_v50 = vrot.slane %v4636_v58, %v7223_v41  ;;  %v4659_v25 = vrot.slane %v4644_v13, %v7223_v41 }
0x29ad   :  { %v4667_v21 = vrot.slane %v4629_v1, %v7223_v41  ;;  %v4688_v35 = vadd.f32 %v4651_v52, %v7205_v23  ;;  %v4645_v57 = vcombine.high %v4629_v1, %v4629_v1 }
0x29ae   :  { %v4647_v2 = vcombine.high %v4643_v42, %v4643_v42  ;;  %v4663_v54 = vrot.slane %v4646_v18, %v7223_v41  ;;  %v4689_v8 = vadd.f32 %v4655_v50, %v7207_v24  ;;  %v4690_v59 = vadd.f32 %v4659_v25, %v7209_v27 }
0x29af   :  { %6709 = vtanh.f32 %v4688_v35  ;;  %v4692_v9 = vadd.f32 %v4667_v21, %v7213_v31  ;;  %v4671_v55 = vrot.slane %v4643_v42, %v7223_v41  ;;  %v4675_v44 = vrot.slane %v4645_v57, %v7223_v41 }
0x29b0   :  { %v4679_v26 = vrot.slane %v4647_v2, %v7223_v41  ;;  %6711 = vtanh.f32 %v4689_v8  ;;  %v4691_v14 = vadd.f32 %v4663_v54, %v7211_v29 }
0x29b1   :  { %6713 = vtanh.f32 %v4690_v59  ;;  %v4693_v0 = vadd.f32 %v4671_v55, %v7215_v33  ;;  %v4694_v40 = vadd.f32 %v4675_v44, %v7220_v39 }
0x29b2   :  { %v4695_v12 = vadd.f32 %v4679_v26, %v7230_v43  ;;  %6715 = vtanh.f32 %v4692_v9 }
0x29b4   :  { %6717 = vtanh.f32 %v4695_v12 }
0x29b5   :  { %6719 = vtanh.f32 %v4691_v14 }
0x29b6   :  { %6721 = vtanh.f32 %v4693_v0 }
0x29b7   :  { %6723 = vtanh.f32 %v4694_v40 }
0x29b9   :  { %v6710_v56 = vpop.eup %6709 }
0x29ba   :  { %v4704_v49 = vmul.f32 %v6710_v56, %v7272_v37  ;;  %v6712_v51 = vpop.eup %6711 }
0x29bb   :  { %v6714_v22 = vpop.eup %6713  ;;  %v4705_v36 = vmul.f32 %v6712_v51, %v7272_v37 }
0x29bc   :  { %v4712_v45 = vsel %vm108_vm1, %v4704_v49, 0.0  ;;  %v6716_v5 = vpop.eup %6715  ;;  %v4706_v62 = vmul.f32 %v6714_v22, %v7272_v37 }
0x29bd   :  { %4713 = vadd.xlane.f32.xlu0 %v4712_v45  ;;  %v4715_v7 = vsel %vm108_vm1, %v4705_v36, 0.0  ;;  %v4708_v13 = vmul.f32 %v6716_v5, %v7272_v37 }
0x29be   :  { %v6718_v63 = vpop.eup %6717  ;;  %4716 = vadd.xlane.f32.xlu1 %v4715_v7  ;;  %v4718_v58 = vsel %vm108_vm1, %v4706_v62, 0.0 }
0x29bf   :  { %v4711_v1 = vmul.f32 %v6718_v63, %v7272_v37  ;;  %v6720_v52 = vpop.eup %6719  ;;  %v4724_v18 = vsel %vm108_vm1, %v4708_v13, 0.0 }
0x29c0   :  { %v4707_v50 = vmul.f32 %v6720_v52, %v7272_v37  ;;  %v6722_v25 = vpop.eup %6721 }
0x29c1   :  { %4719 = vadd.xlane.f32.xlu0 %v4718_v58  ;;  %v4733_v42 = vsel %vm108_vm1, %v4711_v1, 0.0  ;;  %v4709_v35 = vmul.f32 %v6722_v25, %v7272_v37  ;;  %v6724_v2 = vpop.eup %6723 }
0x29c2   :  { %4734 = vadd.xlane.f32.xlu1 %v4733_v42  ;;  %v4721_v21 = vsel %vm108_vm1, %v4707_v50, 0.0  ;;  %v4710_v8 = vmul.f32 %v6724_v2, %v7272_v37 }
0x29c3   :  { %v4727_v54 = vsel %vm108_vm1, %v4709_v35, 0.0 }
0x29c4   :  { %v4730_v59 = vsel %vm108_vm1, %v4710_v8, 0.0 }
0x29c5   :  { %4725 = vadd.xlane.f32.xlu0 %v4724_v18 }
0x29c9   :  { %4722 = vadd.xlane.f32.xlu0 %v4721_v21 }
0x29cd   :  { %4728 = vadd.xlane.f32.xlu0 %v4727_v54 }
0x29d1   :  { %4731 = vadd.xlane.f32.xlu0 %v4730_v59 }
0x2a4a   :  { %v4714_v9 = vpop.xlane.xlu0 %4713 }
0x2a4b   :  { %v4717_v12 = vpop.xlane.xlu1 %4716  ;;  %v4747_v14 = vrot.slane %v4714_v9, %v7292_v15 }
0x2a4c   :  { %v4751_v55 = vrot.slane %v4717_v12, %v7292_v15 }
0x2a4e   :  { %v4720_v26 = vpop.xlane.xlu0 %4719  ;;  %v4776_v56 = vsel %vm966_vm3, %v4751_v55, %v4747_v14 }
0x2a4f   :  { %v4755_v0 = vrot.slane %v4720_v26, %v7292_v15  ;;  %v4735_v36 = vpop.xlane.xlu1 %4734 }
0x2a50   :  { %v4775_v1 = vrot.slane %v4735_v36, %v7292_v15 }
0x2a51   :  { %v4777_v40 = vsel %vm968_vm4, %v4755_v0, %v4776_v56 }
0x2a52   :  { %v4726_v57 = vpop.xlane.xlu0 %4725 }
0x2a53   :  { %v4763_v5 = vrot.slane %v4726_v57, %v7292_v15 }
0x2a56   :  { %v4723_v44 = vpop.xlane.xlu0 %4722 }
0x2a57   :  { %v4759_v49 = vrot.slane %v4723_v44, %v7292_v15 }
0x2a59   :  { %v4778_v22 = vsel %vm970_vm5, %v4759_v49, %v4777_v40 }
0x2a5a   :  { %v4729_v51 = vpop.xlane.xlu0 %4728  ;;  %v4779_v63 = vsel %vm972_vm6, %v4763_v5, %v4778_v22 }
0x2a5b   :  { %v4767_v45 = vrot.slane %v4729_v51, %v7292_v15 }
0x2a5d   :  { %v4780_v58 = vsel %vm974_vm7, %v4767_v45, %v4779_v63 }
0x2a5e   :  { %v4732_v62 = vpop.xlane.xlu0 %4731 }
0x2a5f   :  { %v4771_v7 = vrot.slane %v4732_v62, %v7292_v15 }
0x2a61   :  { %v4781_v13 = vsel %vm976_vm8, %v4771_v7, %v4780_v58 }
0x2a62   :  { %v4782_v52 = vsel %vm978_vm9, %v4775_v1, %v4781_v13 }
0x2a63   :  { %v4784_v42 = vsel %vm981_vm10, %v4782_v52, -inf }
0x2a64   :  { %4785 = vmax.xlane.f32.xlu0 %v4784_v42 }
0x2af1   :  { %v4786_v18 = vpop.xlane.xlu0 %4785 }
0x2af2   :  { %v4791_v50 = vrot.slane %v4786_v18, %v7223_v41  ;;  %v4795_v25 = vrot.slane %v4786_v18, %v7311_v60  ;;  %v4799_v21 = vrot.slane %v4786_v18, %v7314_v61  ;;  %v4811_v35 = vrot.slane %v4786_v18, %v7324_v32 }
0x2af3   :  { %v4803_v2 = vrot.slane %v4786_v18, %v7266_v30  ;;  %v4819_v55 = vrot.slane %v4786_v18, %v7332_v16  ;;  %v4807_v49 = vrot.slane %v4786_v18, %v7320_v6  ;;  %v4815_v63 = vrot.slane %v4786_v18, %v7328_v19 }
0x2af4   :  { %v4828_v54 = vsub.f32 %v4714_v9, %v4791_v50  ;;  %v4829_v8 = vsub.f32 %v4717_v12, %v4795_v25  ;;  %v4830_v59 = vsub.f32 %v4720_v26, %v4799_v21  ;;  %v4833_v14 = vsub.f32 %v4729_v51, %v4811_v35 }
0x2af5   :  { %v4831_v40 = vsub.f32 %v4723_v44, %v4803_v2  ;;  %v4835_v45 = vsub.f32 %v4735_v36, %v4819_v55  ;;  %v4832_v7 = vsub.f32 %v4726_v57, %v4807_v49  ;;  %v4834_v12 = vsub.f32 %v4732_v62, %v4815_v63 }
0x2af6   :  { %v4836_v0 = vmul.f32 1.442695, %v4828_v54  ;;  %v4838_v56 = vmul.f32 1.442695, %v4829_v8  ;;  %v4840_v22 = vmul.f32 1.442695, %v4830_v59 }
0x2af7   :  { %v4846_v5 = vmul.f32 1.442695, %v4833_v14  ;;  %v4842_v9 = vmul.f32 1.442695, %v4831_v40  ;;  %v4850_v26 = vmul.f32 1.442695, %v4835_v45 }
0x2af8   :  { %6725 = vpow2.f32 %v4836_v0  ;;  %v4844_v51 = vmul.f32 1.442695, %v4832_v7  ;;  %v4848_v44 = vmul.f32 1.442695, %v4834_v12 }
0x2af9   :  { %6727 = vpow2.f32 %v4838_v56 }
0x2afa   :  { %6729 = vpow2.f32 %v4840_v22 }
0x2afb   :  { %6731 = vpow2.f32 %v4846_v5 }
0x2afc   :  { %6733 = vpow2.f32 %v4842_v9 }
0x2afd   :  { %6735 = vpow2.f32 %v4850_v26 }
0x2afe   :  { %6737 = vpow2.f32 %v4844_v51 }
0x2aff   :  { %6739 = vpow2.f32 %v4848_v44 }
0x2b02   :  { %v6726_v1 = vpop.eup %6725 }
0x2b03   :  { %v6728_v58 = vpop.eup %6727  ;;  %4861 = vperm.xlu1 %6467, %v6726_v1  }
0x2b04   :  { %4864 = vperm.xlu0 %6468, %v6728_v58   ;;  %v6730_v36 = vpop.eup %6729 }
0x2b05   :  { %v6732_v13 = vpop.eup %6731 }
0x2b06   :  { %v6734_v57 = vpop.eup %6733 }
0x2b07   :  { %4867 = vperm.xlu1 %6467, %v6730_v36   ;;  %v6736_v52 = vpop.eup %6735 }
0x2b08   :  { %4876 = vperm.xlu0 %6468, %v6732_v13   ;;  %v6738_v42 = vpop.eup %6737 }
0x2b09   :  { %v6740_v62 = vpop.eup %6739 }
0x2b0b   :  { %4870 = vperm.xlu1 %6467, %v6734_v57  }
0x2b0c   :  { %4882 = vperm.xlu0 %6468, %v6736_v52  }
0x2b0f   :  { %4873 = vperm.xlu1 %6467, %v6738_v42  }
0x2b13   :  { %4879 = vperm.xlu1 %6467, %v6740_v62  }
0x2b82   :  { %v4862_v18 = vpop.permute.xlu1 %4861 }
0x2b83   :  { %v4865_v50 = vpop.permute.xlu0 %4864  ;;  %v4887_v35 = vrot.slane %v4862_v18, %v7292_v15 }
0x2b84   :  { %v4891_v21 = vrot.slane %v4865_v50, %v7292_v15 }
0x2b86   :  { %v4868_v25 = vpop.permute.xlu1 %4867  ;;  %v4916_v55 = vsel %vm966_vm3, %v4891_v21, %v4887_v35 }
0x2b87   :  { %v4877_v54 = vpop.permute.xlu0 %4876  ;;  %v4895_v8 = vrot.slane %v4868_v25, %v7292_v15 }
0x2b88   :  { %v4907_v45 = vrot.slane %v4877_v54, %v7292_v15 }
0x2b89   :  { %v4917_v0 = vsel %vm968_vm4, %v4895_v8, %v4916_v55 }
0x2b8a   :  { %v4871_v2 = vpop.permute.xlu1 %4870 }
0x2b8b   :  { %v4899_v59 = vrot.slane %v4871_v2, %v7292_v15  ;;  %v4883_v40 = vpop.permute.xlu0 %4882 }
0x2b8c   :  { %v4915_v7 = vrot.slane %v4883_v40, %v7292_v15 }
0x2b8d   :  { %v4918_v49 = vsel %vm970_vm5, %v4899_v59, %v4917_v0 }
0x2b8e   :  { %v4874_v14 = vpop.permute.xlu1 %4873 }
0x2b8f   :  { %v4903_v56 = vrot.slane %v4874_v14, %v7292_v15 }
0x2b91   :  { %v4919_v22 = vsel %vm972_vm6, %v4903_v56, %v4918_v49 }
0x2b92   :  { %v4880_v5 = vpop.permute.xlu1 %4879  ;;  %v4920_v9 = vsel %vm974_vm7, %v4907_v45, %v4919_v22 }
0x2b93   :  { %v4911_v63 = vrot.slane %v4880_v5, %v7292_v15 }
0x2b95   :  { %v4921_v26 = vsel %vm976_vm8, %v4911_v63, %v4920_v9 }
0x2b96   :  { %v4922_v12 = vsel %vm978_vm9, %v4915_v7, %v4921_v26 }
0x2b97   :  { %v4924_v51 = vsel %vm981_vm10, %v4922_v12, 0.0 }
0x2b98   :  { %4925 = vadd.xlane.f32.xlu1 %v4924_v51 }
0x2c25   :  { %v4926_v44 = vpop.xlane.xlu1 %4925 }
0x2c26   :  { %6741 = vrcp.f32 %v4926_v44 }
0x2c30   :  { %v6742_v18 = vpop.eup %6741 }
0x2c31   :  { %v4928_v50 = vmul.f32 %v6742_v18, %v4926_v44 }
0x2c33   :  { %v4929_v25 = vsub.f32 2.0, %v4928_v50 }
0x2c35   :  { %v4930_v21 = vmul.f32 %v6742_v18, %v4929_v25 }
0x2c37   :  { %v4939_v35 = vrot.slane %v4930_v21, %v7311_v60  ;;  %v4943_v54 = vrot.slane %v4930_v21, %v7314_v61  ;;  %v4935_v59 = vrot.slane %v4930_v21, %v7223_v41  ;;  %v4947_v14 = vrot.slane %v4930_v21, %v7266_v30 }
0x2c38   :  { %v4951_v56 = vrot.slane %v4930_v21, %v7320_v6  ;;  %v4955_v40 = vrot.slane %v4930_v21, %v7324_v32  ;;  %v4959_v22 = vrot.slane %v4930_v21, %v7328_v19  ;;  %v4963_v45 = vrot.slane %v4930_v21, %v7332_v16 }
0x2c39   :  { %v4973_v2 = vmul.f32 %v6728_v58, %v4939_v35  ;;  %v4974_v8 = vmul.f32 %v6730_v36, %v4943_v54  ;;  %v4972_v55 = vmul.f32 %v6726_v1, %v4935_v59  ;;  %v4975_v0 = vmul.f32 %v6734_v57, %v4947_v14 }
0x2c3a   :  { %v4976_v49 = vmul.f32 %v6738_v42, %v4951_v56  ;;  %v4977_v58 = vmul.f32 %v6732_v13, %v4955_v40  ;;  %v4978_v36 = vmul.f32 %v6740_v62, %v4959_v22  ;;  %v4979_v1 = vmul.f32 %v6736_v52, %v4963_v45  ;;  %v8545_v40 = vld [vmem:[#allocation15_spill] sm:$0xff] }
0x2c3b   :  { %4987 = vperm.xlu0 %6468, %v4973_v2   ;;  %v8544_v2 = vld [vmem:[#allocation14_spill] sm:$0xff] }
0x2c3f   :  { %4992 = vperm.xlu0 %6468, %v4974_v8  }
0x2c43   :  { %4982 = vperm.xlu0 %6468, %v4972_v55  }
0x2c47   :  { %4997 = vperm.xlu0 %6468, %v4975_v0  }
0x2c4b   :  { %5002 = vperm.xlu0 %6468, %v4976_v49  }
0x2c4f   :  { %5007 = vperm.xlu0 %6468, %v4977_v58  }
0x2c53   :  { %5012 = vperm.xlu0 %6468, %v4978_v36  }
0x2c57   :  { %5017 = vperm.xlu0 %6468, %v4979_v1  }
0x2cba   :  { %v4988_v5 = vpop.permute.xlu0 %4987 }
0x2cbb   :  { %v5021_v57 = vmul.f32 %v8136_v10, %v4988_v5 }
0x2cbd   :  { %v5035_v42 = vsel %vm108_vm1, %v5021_v57, 0.0 }
0x2cbe   :  { %v4993_v63 = vpop.permute.xlu0 %4992  ;;  %v5036_v26 = vrot.slane %v5035_v42, 4 }
0x2cbf   :  { %v5022_v7 = vmul.f32 %v8140_v4, %v4993_v63 }
0x2cc0   :  { %v5037_v50 = vadd.f32 %v5036_v26, %v5035_v42  ;;  %v8546_v42 = vld [vmem:[#allocation16_spill] sm:$0xff] }
0x2cc1   :  { %v5042_v12 = vsel %vm108_vm1, %v5022_v7, 0.0 }
0x2cc2   :  { %v4983_v9 = vpop.permute.xlu0 %4982  ;;  %v5043_v52 = vrot.slane %v5042_v12, 4 }
0x2cc3   :  { %v5020_v13 = vmul.f32 %v8147_v38, %v4983_v9  ;;  %v5038_v38 = vrot.slane %v5037_v50, 2 }
0x2cc4   :  { %v5044_v35 = vadd.f32 %v5043_v52, %v5042_v12 }
0x2cc5   :  { %v5028_v62 = vsel %vm108_vm1, %v5020_v13, 0.0  ;;  %v5039_v58 = vadd.f32 %v5038_v38, %v5037_v50 }
0x2cc6   :  { %v5029_v51 = vrot.slane %v5028_v62, 4  ;;  %v4998_v44 = vpop.permute.xlu0 %4997  ;;  %v5045_v49 = vrot.slane %v5044_v35, 2 }
0x2cc7   :  { %v5023_v18 = vmul.f32 %v8152_v3, %v4998_v44  ;;  %v5040_v13 = vrot.slane %v5039_v58, 1 }
0x2cc8   :  { %v5030_v10 = vadd.f32 %v5029_v51, %v5028_v62  ;;  %v5046_v7 = vadd.f32 %v5045_v49, %v5044_v35 }
0x2cc9   :  { %v5049_v25 = vsel %vm108_vm1, %v5023_v18, 0.0 }
0x2cca   :  { %v5050_v4 = vrot.slane %v5049_v25, 4  ;;  %v5003_v21 = vpop.permute.xlu0 %5002  ;;  %v5031_v59 = vrot.slane %v5030_v10, 2 }
0x2ccb   :  { %v5024_v54 = vmul.f32 %v8544_v2, %v5003_v21  ;;  %v5041_v2 = vadd.f32 %v5040_v13, %v5039_v58 }
0x2ccc   :  { %v5051_v8 = vadd.f32 %v5050_v4, %v5049_v25  ;;  %v5032_v36 = vadd.f32 %v5031_v59, %v5030_v10  ;;  %v5047_v10 = vrot.slane %v5046_v7, 1  ;;  %v8547_v4 = vld [vmem:[#allocation13_spill] sm:$0xff] }
0x2ccd   :  { %v5056_v55 = vsel %vm108_vm1, %v5024_v54, 0.0 }
0x2cce   :  { %v5052_v14 = vrot.slane %v5051_v8, 2  ;;  %v5057_v0 = vrot.slane %v5056_v55, 4  ;;  %v5008_v56 = vpop.permute.xlu0 %5007  ;;  %v5033_v62 = vrot.slane %v5032_v36, 1 }
0x2ccf   :  { %v5025_v3 = vmul.f32 %v8545_v40, %v5008_v56  ;;  %v5048_v56 = vadd.f32 %v5047_v10, %v5046_v7  ;;  %v5085_v40 = vmul.f32 %v5041_v2, %v7381_v34 }
0x2cd0   :  { %v5058_v22 = vadd.f32 %v5057_v0, %v5056_v55  ;;  %v5053_v1 = vadd.f32 %v5052_v14, %v5051_v8  ;;  %v5034_v35 = vadd.f32 %v5033_v62, %v5032_v36 }
0x2cd1   :  { %v5063_v45 = vsel %vm108_vm1, %v5025_v3, 0.0  ;;  %v5086_v36 = vmul.f32 %v5048_v56, %v7381_v34 }
0x2cd2   :  { %v5059_v5 = vrot.slane %v5058_v22, 2  ;;  %v5064_v57 = vrot.slane %v5063_v45, 4  ;;  %v5013_v63 = vpop.permute.xlu0 %5012  ;;  %v5054_v44 = vrot.slane %v5053_v1, 1 }
0x2cd3   :  { %v5026_v9 = vmul.f32 %v8546_v42, %v5013_v63  ;;  %v5100_v42 = vrot.slane %v5085_v40, 7 }
0x2cd4   :  { %v5060_v26 = vadd.f32 %v5059_v5, %v5058_v22  ;;  %v5065_v12 = vadd.f32 %v5064_v57, %v5063_v45  ;;  %v5055_v59 = vadd.f32 %v5054_v44, %v5053_v1  ;;  %v5084_v5 = vmul.f32 %v5034_v35, %v7381_v34 }
0x2cd5   :  { %v5070_v51 = vsel %vm108_vm1, %v5026_v9, 0.0  ;;  %v5102_v44 = vrot.slane %v5086_v36, 6 }
0x2cd6   :  { %v5066_v52 = vrot.slane %v5065_v12, 2  ;;  %v5071_v18 = vrot.slane %v5070_v51, 4  ;;  %v5018_v50 = vpop.permute.xlu0 %5017  ;;  %v5061_v25 = vrot.slane %v5060_v26, 1  ;;  %v5087_v58 = vmul.f32 %v5055_v59, %v7381_v34 }
0x2cd7   :  { %v5027_v21 = vmul.f32 %v8547_v4, %v5018_v50 }
0x2cd8   :  { %v5067_v54 = vadd.f32 %v5066_v52, %v5065_v12  ;;  %v5072_v38 = vadd.f32 %v5071_v18, %v5070_v51  ;;  %v5062_v49 = vadd.f32 %v5061_v25, %v5060_v26  ;;  %v5101_v26 = vsel %vm966_vm3, %v5100_v42, %v5084_v5 }
0x2cd9   :  { %v5077_v8 = vsel %vm108_vm1, %v5027_v21, 0.0  ;;  %v5104_v12 = vrot.slane %v5087_v58, 5  ;;  %v5103_v10 = vsel %vm968_vm4, %v5102_v44, %v5101_v26 }
0x2cda   :  { %v5068_v55 = vrot.slane %v5067_v54, 1  ;;  %v5073_v14 = vrot.slane %v5072_v38, 2  ;;  %v5078_v0 = vrot.slane %v5077_v8, 4  ;;  %v5088_v1 = vmul.f32 %v5062_v49, %v7381_v34 }
0x2cdb   :  { %v5105_v21 = vsel %vm970_vm5, %v5104_v12, %v5103_v10 }
0x2cdc   :  { %v5069_v3 = vadd.f32 %v5068_v55, %v5067_v54  ;;  %v5074_v22 = vadd.f32 %v5073_v14, %v5072_v38  ;;  %v5079_v45 = vadd.f32 %v5078_v0, %v5077_v8  ;;  %v5106_v52 = vrot.slane %v5088_v1, 4 }
0x2cde   :  { %v5075_v57 = vrot.slane %v5074_v22, 1  ;;  %v5080_v63 = vrot.slane %v5079_v45, 2  ;;  %v5089_v9 = vmul.f32 %v5069_v3, %v7381_v34  ;;  %v5107_v2 = vsel %vm972_vm6, %v5106_v52, %v5105_v21 }
0x2ce0   :  { %v5076_v7 = vadd.f32 %v5075_v57, %v5074_v22  ;;  %v5081_v13 = vadd.f32 %v5080_v63, %v5079_v45  ;;  %v5108_v18 = vrot.slane %v5089_v9, 3 }
0x2ce2   :  { %v5090_v62 = vmul.f32 %v5076_v7, %v7381_v34  ;;  %v5082_v51 = vrot.slane %v5081_v13, 1  ;;  %v5109_v54 = vsel %vm974_vm7, %v5108_v18, %v5107_v2 }
0x2ce4   :  { %v5083_v50 = vadd.f32 %v5082_v51, %v5081_v13  ;;  %v5110_v25 = vrot.slane %v5090_v62, 2 }
0x2ce6   :  { %v5091_v4 = vmul.f32 %v5083_v50, %v7381_v34  ;;  %v5111_v35 = vsel %vm976_vm8, %v5110_v25, %v5109_v54 }
0x2ce8   :  { %v5112_v38 = vrot.slane %v5091_v4, 1 }
0x2cea   :  { %v5113_v8 = vsel %vm978_vm9, %v5112_v38, %v5111_v35 }
0x2ceb   :  { %v5115_v59 = vsel %vm108_vm1, %v5113_v8, 0.0 }
0x2cec   :  { %5116 = vadd.xlane.f32.xlu0 %v5115_v59 }
0x2d79   :  { %v5117_v55 = vpop.xlane.xlu0 %5116 }
0x2d7a   :  { %v5118_v14 = vadd.f32 %v5117_v55, %v7404_v48 }
0x2d7c   :  { %5121 = vperm.xlu1 %6467, %v5118_v14  }
0x2d80   :  { %5126 = vrot.lane.b32.xlu1 %v8202_v20, %s6950_s10 }
0x2d84   :  { %5136 = vrot.lane.b32.xlu1 %v8202_v20, %s6951_s11 }
0x2dfb   :  { %v5122_v0 = vpop.permute.xlu1 %5121 }
0x2dfc   :  { %v5124_v56 = vmul.f32 %v5122_v0, %v7411_v53 }
0x2dfe   :  { %v5125_v49 = vadd.f32 %v5124_v56, %v7415_v28 }
0x2dff   :  { %v5127_v40 = vpop.permute.xlu1 %5126 }
0x2e00   :  { %v5129_v3 = vadd.f32 %v5127_v40, %v5125_v49 }
0x2e02   :  { %v6034_v22 = vmul.f32 -1.442695, %v5129_v3 }
0x2e03   :  { %v5137_v57 = vpop.permute.xlu1 %5136 }
0x2e04   :  { %6743 = vpow2.f32 %v6034_v22 }
0x2e0e   :  { %v6744_v45 = vpop.eup %6743 }
0x2e0f   :  { %v5133_v5 = vadd.f32 1.0, %v6744_v45 }
0x2e11   :  { %6745 = vrcp.f32 %v5133_v5 }
0x2e1b   :  { %v6746_v58 = vpop.eup %6745 }
0x2e1c   :  { %v5139_v63 = vmul.f32 %v6746_v58, %v5137_v57  ;;  %v5146_v42 = vsub.f32 1.0, %v6746_v58  ;;  %v5152_v7 = vmul.f32 %v6746_v58, %v8194_v11 }
0x2e1e   :  { %5141 = vrot.lane.b32.xlu1 %v5139_v63, %s6952_s3 }
0x2e90   :  { %v5142_v36 = vpop.permute.xlu1 %5141 }
0x2e91   :  { %v5144_v1 = vadd.f32 %v5142_v36, %v5125_v49 }
0x2e93   :  { %6747 = vtanh.f32 %v5144_v1 }
0x2e9d   :  { %v6748_v20 = vpop.eup %6747 }
0x2e9e   :  { %5148 = vrot.lane.b32.xlu0 %v6748_v20, %s6950_s10 }
0x2f10   :  { %v5149_v9 = vpop.permute.xlu0 %5148 }
0x2f11   :  { %v5151_v13 = vmul.f32 %v5149_v9, %v5146_v42 }
0x2f13   :  { %v8335_v26 = vadd.f32 %v5152_v7, %v5151_v13 }
0x2f15   :  { %5155 = vrot.lane.b32.xlu1 %v8335_v26, %s6950_s10 }
0x2f87   :  { %v5156_v12 = vpop.permute.xlu1 %5155 }
0x2f88   :  { %6303 = vmatmul.mubr.msk.f32.vlgmr.msra.gmra.mrb[14].mxu1 %vm108_vm1, %v5156_v12 }
0x2f89   :  { %6324 = vmatprep.mubr.msk.f32.mxu1 %vm6946_vm0, %v8522_v17 }
0x305b   :  { %v5225_v62 = vpop.f32.mrb[14].mxu1 }
0x305c   :  { %v8343_v51 = vadd.f32 %v5225_v62, %v7234_v46  ;;  %v6304_v44 = vpop.f32.mrb[15].mxu1 }
0x305e   :  { %v5230_v11 = vcombine.high %v8343_v51, %v8343_v51  ;;  %v5237_v52 = vrot.slane %v8343_v51, %v7237_v47 }
0x3060   :  { %v5244_v18 = vrot.slane %v5230_v11, %v7237_v47  ;;  %v5245_v50 = vcombine.high %v5237_v52, %v5237_v52  ;;  %v5253_v10 = vrot.slane %v5237_v52, %v7237_v47 }
0x3062   :  { %v5246_v25 = vcombine.high %v5244_v18, %v5244_v18  ;;  %v5260_v4 = vrot.slane %v5244_v18, %v7237_v47  ;;  %v5267_v17 = vrot.slane %v5245_v50, %v7237_v47  ;;  %v5275_v21 = vcombine.high %v5253_v10, %v5253_v10 }
0x3063   :  { %v5282_v46 = vrot.slane %v5253_v10, %v7223_v41 }
0x3064   :  { %v5274_v2 = vrot.slane %v5246_v25, %v7237_v47  ;;  %v5277_v54 = vcombine.high %v5267_v17, %v5267_v17  ;;  %v5286_v38 = vrot.slane %v5267_v17, %v7223_v41  ;;  %v5290_v35 = vrot.slane %v5275_v21, %v7223_v41 }
0x3065   :  { %v5298_v8 = vrot.slane %v5260_v4, %v7223_v41  ;;  %v5319_v59 = vadd.f32 %v5282_v46, %v7205_v23  ;;  %v5276_v55 = vcombine.high %v5260_v4, %v5260_v4 }
0x3066   :  { %v5278_v14 = vcombine.high %v5274_v2, %v5274_v2  ;;  %v5302_v0 = vrot.slane %v5274_v2, %v7223_v41  ;;  %v5294_v56 = vrot.slane %v5277_v54, %v7223_v41  ;;  %v5320_v49 = vadd.f32 %v5286_v38, %v7207_v24 }
0x3067   :  { %6749 = vtanh.f32 %v5319_v59  ;;  %v5321_v47 = vadd.f32 %v5290_v35, %v7209_v27  ;;  %v5323_v3 = vadd.f32 %v5298_v8, %v7213_v31  ;;  %v5306_v45 = vrot.slane %v5276_v55, %v7223_v41 }
0x3068   :  { %v5324_v40 = vadd.f32 %v5302_v0, %v7215_v33  ;;  %v5310_v22 = vrot.slane %v5278_v14, %v7223_v41  ;;  %6751 = vtanh.f32 %v5320_v49  ;;  %v5322_v5 = vadd.f32 %v5294_v56, %v7211_v29 }
0x3069   :  { %6753 = vtanh.f32 %v5321_v47  ;;  %v5325_v24 = vadd.f32 %v5306_v45, %v7220_v39 }
0x306a   :  { %v5326_v23 = vadd.f32 %v5310_v22, %v7230_v43  ;;  %6755 = vtanh.f32 %v5324_v40 }
0x306b   :  { %6757 = vtanh.f32 %v5323_v3 }
0x306c   :  { %6759 = vtanh.f32 %v5326_v23 }
0x306d   :  { %6761 = vtanh.f32 %v5322_v5 }
0x306e   :  { %6763 = vtanh.f32 %v5325_v24 }
0x3071   :  { %v6750_v27 = vpop.eup %6749 }
0x3072   :  { %v5335_v33 = vmul.f32 %v6750_v27, %v7272_v37  ;;  %v6752_v31 = vpop.eup %6751 }
0x3073   :  { %v6754_v58 = vpop.eup %6753  ;;  %v5336_v43 = vmul.f32 %v6752_v31, %v7272_v37 }
0x3074   :  { %v5343_v57 = vsel %vm108_vm1, %v5335_v33, 0.0  ;;  %v6756_v63 = vpop.eup %6755  ;;  %v5337_v36 = vmul.f32 %v6754_v58, %v7272_v37 }
0x3075   :  { %5344 = vadd.xlane.f32.xlu1 %v5343_v57  ;;  %v6758_v29 = vpop.eup %6757  ;;  %v5346_v1 = vsel %vm108_vm1, %v5336_v43, 0.0  ;;  %v5340_v20 = vmul.f32 %v6756_v63, %v7272_v37 }
0x3076   :  { %v6760_v39 = vpop.eup %6759  ;;  %5347 = vadd.xlane.f32.xlu0 %v5346_v1  ;;  %v5349_v42 = vsel %vm108_vm1, %v5337_v36, 0.0  ;;  %v5339_v9 = vmul.f32 %v6758_v29, %v7272_v37 }
0x3077   :  { %v6762_v7 = vpop.eup %6761  ;;  %v5358_v13 = vsel %vm108_vm1, %v5340_v20, 0.0  ;;  %v5342_v12 = vmul.f32 %v6760_v39, %v7272_v37 }
0x3078   :  { %v5355_v62 = vsel %vm108_vm1, %v5339_v9, 0.0  ;;  %v5338_v44 = vmul.f32 %v6762_v7, %v7272_v37  ;;  %v6764_v11 = vpop.eup %6763 }
0x3079   :  { %5350 = vadd.xlane.f32.xlu1 %v5349_v42  ;;  %v5364_v52 = vsel %vm108_vm1, %v5342_v12, 0.0  ;;  %v5341_v50 = vmul.f32 %v6764_v11, %v7272_v37 }
0x307a   :  { %5359 = vadd.xlane.f32.xlu0 %v5358_v13  ;;  %v5352_v18 = vsel %vm108_vm1, %v5338_v44, 0.0 }
0x307b   :  { %v5361_v10 = vsel %vm108_vm1, %v5341_v50, 0.0 }
0x307d   :  { %5356 = vadd.xlane.f32.xlu1 %v5355_v62 }
0x307e   :  { %5365 = vadd.xlane.f32.xlu0 %v5364_v52 }
0x3081   :  { %5353 = vadd.xlane.f32.xlu1 %v5352_v18 }
0x3085   :  { %5362 = vadd.xlane.f32.xlu1 %v5361_v10 }
0x3102   :  { %v5345_v25 = vpop.xlane.xlu1 %5344 }
0x3103   :  { %v5348_v4 = vpop.xlane.xlu0 %5347  ;;  %v5378_v2 = vrot.slane %v5345_v25, %v7292_v15 }
0x3104   :  { %v5382_v21 = vrot.slane %v5348_v4, %v7292_v15 }
0x3106   :  { %v5351_v17 = vpop.xlane.xlu1 %5350  ;;  %v5407_v35 = vsel %vm966_vm3, %v5382_v21, %v5378_v2 }
0x3107   :  { %v5360_v54 = vpop.xlane.xlu0 %5359  ;;  %v5386_v38 = vrot.slane %v5351_v17, %v7292_v15 }
0x3108   :  { %v5398_v14 = vrot.slane %v5360_v54, %v7292_v15 }
0x3109   :  { %v5408_v59 = vsel %vm968_vm4, %v5386_v38, %v5407_v35 }
0x310a   :  { %v5357_v46 = vpop.xlane.xlu1 %5356 }
0x310b   :  { %v5394_v55 = vrot.slane %v5357_v46, %v7292_v15  ;;  %v5366_v0 = vpop.xlane.xlu0 %5365 }
0x310c   :  { %v5406_v22 = vrot.slane %v5366_v0, %v7292_v15 }
0x310e   :  { %v5354_v8 = vpop.xlane.xlu1 %5353 }
0x310f   :  { %v5390_v37 = vrot.slane %v5354_v8, %v7292_v15 }
0x3111   :  { %v5409_v56 = vsel %vm970_vm5, %v5390_v37, %v5408_v59 }
0x3112   :  { %v5410_v49 = vsel %vm972_vm6, %v5394_v55, %v5409_v56  ;;  %v5363_v47 = vpop.xlane.xlu1 %5362 }
0x3113   :  { %v5402_v40 = vrot.slane %v5363_v47, %v7292_v15  ;;  %v5411_v3 = vsel %vm974_vm7, %v5398_v14, %v5410_v49 }
0x3115   :  { %v5412_v23 = vsel %vm976_vm8, %v5402_v40, %v5411_v3 }
0x3116   :  { %v5413_v45 = vsel %vm978_vm9, %v5406_v22, %v5412_v23 }
0x3117   :  { %v5415_v5 = vsel %vm981_vm10, %v5413_v45, -inf }
0x3118   :  { %5416 = vmax.xlane.f32.xlu1 %v5415_v5 }
0x31a5   :  { %v5417_v24 = vpop.xlane.xlu1 %5416 }
0x31a6   :  { %v5422_v27 = vrot.slane %v5417_v24, %v7223_v41  ;;  %v5426_v33 = vrot.slane %v5417_v24, %v7311_v60  ;;  %v5430_v31 = vrot.slane %v5417_v24, %v7314_v61  ;;  %v5438_v58 = vrot.slane %v5417_v24, %v7320_v6 }
0x31a7   :  { %v5446_v57 = vrot.slane %v5417_v24, %v7328_v19  ;;  %v5434_v36 = vrot.slane %v5417_v24, %v7266_v30  ;;  %v5442_v7 = vrot.slane %v5417_v24, %v7324_v32  ;;  %v5450_v44 = vrot.slane %v5417_v24, %v7332_v16 }
0x31a8   :  { %v5459_v43 = vsub.f32 %v5345_v25, %v5422_v27  ;;  %v5460_v63 = vsub.f32 %v5348_v4, %v5426_v33  ;;  %v5461_v29 = vsub.f32 %v5351_v17, %v5430_v31  ;;  %v5463_v1 = vsub.f32 %v5357_v46, %v5438_v58 }
0x31a9   :  { %v5465_v42 = vsub.f32 %v5363_v47, %v5446_v57  ;;  %v5462_v13 = vsub.f32 %v5354_v8, %v5434_v36  ;;  %v5464_v11 = vsub.f32 %v5360_v54, %v5442_v7  ;;  %v5466_v18 = vsub.f32 %v5366_v0, %v5450_v44 }
0x31aa   :  { %v5467_v20 = vmul.f32 1.442695, %v5459_v43  ;;  %v5469_v39 = vmul.f32 1.442695, %v5460_v63  ;;  %v5475_v9 = vmul.f32 1.442695, %v5463_v1 }
0x31ab   :  { %v5471_v12 = vmul.f32 1.442695, %v5461_v29  ;;  %v5479_v62 = vmul.f32 1.442695, %v5465_v42  ;;  %v5473_v52 = vmul.f32 1.442695, %v5462_v13 }
0x31ac   :  { %6765 = vpow2.f32 %v5467_v20  ;;  %v5477_v50 = vmul.f32 1.442695, %v5464_v11  ;;  %v5481_v4 = vmul.f32 1.442695, %v5466_v18 }
0x31ad   :  { %6767 = vpow2.f32 %v5469_v39 }
0x31ae   :  { %6769 = vpow2.f32 %v5475_v9 }
0x31af   :  { %6771 = vpow2.f32 %v5471_v12 }
0x31b0   :  { %6773 = vpow2.f32 %v5479_v62 }
0x31b1   :  { %6775 = vpow2.f32 %v5473_v52 }
0x31b2   :  { %6777 = vpow2.f32 %v5477_v50 }
0x31b3   :  { %6779 = vpow2.f32 %v5481_v4  ;;  %v5790_v4 = vld [vmem:[#allocation9 + $0x8] sm:$0xff] }
0x31b6   :  { %v6766_v10 = vpop.eup %6765 }
0x31b7   :  { %v6768_v25 = vpop.eup %6767  ;;  %5492 = vperm.xlu0 %6468, %v6766_v10  }
0x31b8   :  { %5495 = vperm.xlu1 %6467, %v6768_v25   ;;  %v6770_v17 = vpop.eup %6769 }
0x31b9   :  { %v6772_v21 = vpop.eup %6771 }
0x31ba   :  { %v6774_v46 = vpop.eup %6773 }
0x31bb   :  { %5504 = vperm.xlu0 %6468, %v6770_v17   ;;  %v6776_v2 = vpop.eup %6775 }
0x31bc   :  { %5498 = vperm.xlu1 %6467, %v6772_v21   ;;  %v6778_v54 = vpop.eup %6777 }
0x31bd   :  { %v6780_v38 = vpop.eup %6779 }
0x31bf   :  { %5510 = vperm.xlu0 %6468, %v6774_v46  }
0x31c0   :  { %5501 = vperm.xlu1 %6467, %v6776_v2  }
0x31c4   :  { %5507 = vperm.xlu1 %6467, %v6778_v54  }
0x31c8   :  { %5513 = vperm.xlu1 %6467, %v6780_v38  }
0x3236   :  { %v5493_v8 = vpop.permute.xlu0 %5492 }
0x3237   :  { %v5496_v35 = vpop.permute.xlu1 %5495  ;;  %v5518_v55 = vrot.slane %v5493_v8, %v7292_v15 }
0x3238   :  { %v5522_v59 = vrot.slane %v5496_v35, %v7292_v15 }
0x323a   :  { %v5505_v0 = vpop.permute.xlu0 %5504  ;;  %v5547_v49 = vsel %vm966_vm3, %v5522_v59, %v5518_v55  ;;  %v6814_v59 = vld [vmem:[#allocation2 + $0x10] sm:$0xff] }
0x323b   :  { %v5499_v37 = vpop.permute.xlu1 %5498  ;;  %v5534_v22 = vrot.slane %v5505_v0, %v7292_v15  ;;  %v6815_v0 = vld [vmem:[#allocation2 + $0x38] sm:$0xff] }
0x323c   :  { %v5526_v14 = vrot.slane %v5499_v37, %v7292_v15 }
0x323e   :  { %v5548_v40 = vsel %vm968_vm4, %v5526_v14, %v5547_v49  ;;  %v5511_v45 = vpop.permute.xlu0 %5510 }
0x323f   :  { %v5502_v56 = vpop.permute.xlu1 %5501  ;;  %v5542_v33 = vrot.slane %v5511_v45, %v7292_v15 }
0x3240   :  { %v5530_v47 = vrot.slane %v5502_v56, %v7292_v15 }
0x3242   :  { %v5549_v3 = vsel %vm970_vm5, %v5530_v47, %v5548_v40  ;;  %v6816_v47 = vld [vmem:[#allocation2] sm:$0xff] }
0x3243   :  { %v5508_v23 = vpop.permute.xlu1 %5507  ;;  %v5550_v24 = vsel %vm972_vm6, %v5534_v22, %v5549_v3 }
0x3244   :  { %v5538_v5 = vrot.slane %v5508_v23, %v7292_v15 }
0x3246   :  { %v5551_v27 = vsel %vm974_vm7, %v5538_v5, %v5550_v24 }
0x3247   :  { %v5514_v31 = vpop.permute.xlu1 %5513  ;;  %v5552_v57 = vsel %vm976_vm8, %v5542_v33, %v5551_v27  ;;  %v6817_v27 = vld [vmem:[#allocation2 + $0x18] sm:$0xff] }
0x3248   :  { %v5546_v58 = vrot.slane %v5514_v31, %v7292_v15 }
0x324a   :  { %v5553_v43 = vsel %vm978_vm9, %v5546_v58, %v5552_v57 }
0x324b   :  { %v5555_v63 = vsel %vm981_vm10, %v5553_v43, 0.0 }
0x324c   :  { %5556 = vadd.xlane.f32.xlu0 %v5555_v63 }
0x32d9   :  { %v5557_v36 = vpop.xlane.xlu0 %5556 }
0x32da   :  { %6781 = vrcp.f32 %v5557_v36 }
0x32e4   :  { %v6782_v29 = vpop.eup %6781 }
0x32e5   :  { %v5559_v1 = vmul.f32 %v6782_v29, %v5557_v36 }
0x32e7   :  { %v5560_v20 = vsub.f32 2.0, %v5559_v1 }
0x32e9   :  { %v5561_v39 = vmul.f32 %v6782_v29, %v5560_v20  ;;  %v6818_v20 = vld [vmem:[#allocation2 + $0x20] sm:$0xff] }
0x32eb   :  { %v5594_v42 = vrot.slane %v5561_v39, %v7332_v16  ;;  %v5570_v9 = vrot.slane %v5561_v39, %v7311_v60  ;;  %v5574_v15 = vrot.slane %v5561_v39, %v7314_v61  ;;  %v5566_v62 = vrot.slane %v5561_v39, %v7223_v41  ;;  %v5789_v41 = vld [vmem:[#allocation9] sm:$0xff] }
0x32ec   :  { %v5578_v11 = vrot.slane %v5561_v39, %v7266_v30  ;;  %v5582_v18 = vrot.slane %v5561_v39, %v7320_v6  ;;  %v5586_v60 = vrot.slane %v5561_v39, %v7324_v32  ;;  %v5590_v61 = vrot.slane %v5561_v39, %v7328_v19  ;;  %v5792_v30 = vld [vmem:[#allocation9 + $0x18] sm:$0xff] }
0x32ed   :  { %v5610_v7 = vmul.f32 %v6780_v38, %v5594_v42  ;;  %v5604_v13 = vmul.f32 %v6768_v25, %v5570_v9  ;;  %v5605_v12 = vmul.f32 %v6772_v21, %v5574_v15  ;;  %v5603_v44 = vmul.f32 %v6766_v10, %v5566_v62  ;;  %v5791_v21 = vld [vmem:[#allocation9 + $0x10] sm:$0xff] }
0x32ee   :  { %v5606_v52 = vmul.f32 %v6776_v2, %v5578_v11  ;;  %v5607_v16 = vmul.f32 %v6770_v17, %v5582_v18  ;;  %v5608_v50 = vmul.f32 %v6778_v54, %v5586_v60  ;;  %v5609_v25 = vmul.f32 %v6774_v46, %v5590_v61  ;;  %v6813_v17 = vld [vmem:[#allocation2 + $0x8] sm:$0xff] }
0x32ef   :  { %5648 = vperm.xlu0 %6468, %v5610_v7   ;;  %5618 = vperm.xlu1 %6467, %v5604_v13   ;;  %v6440_v10 = vpack.c.bf16 %v5790_v4, %v5789_v41  ;;  %v6443_v2 = vpack.c.bf16 %v5792_v30, %v5791_v21  ;;  %v8548_v38 = vmov 0.0|0.0  }
0x32f1   :  { %6441 = vmatpush3.bf16.msra.mxu0 %v6440_v10 }
0x32f2   :  { %6442 = vmatprep.subr.bf16.mxu0 %v8548_v38 }
0x32f3   :  { %5623 = vperm.xlu1 %6467, %v5605_v12  }
0x32f5   :  { %6444 = vmatpush3.bf16.msra.mxu0 %v6443_v2 }
0x32f7   :  { %5613 = vperm.xlu1 %6467, %v5603_v44  }
0x32fb   :  { %5628 = vperm.xlu1 %6467, %v5606_v52   ;;  %v6819_v52 = vld [vmem:[#allocation2 + $0x28] sm:$0xff] }
0x32ff   :  { %5633 = vperm.xlu1 %6467, %v5607_v16  }
0x3303   :  { %5638 = vperm.xlu1 %6467, %v5608_v50  }
0x3307   :  { %5643 = vperm.xlu1 %6467, %v5609_v25  }
0x336e   :  { %v5619_v6 = vpop.permute.xlu1 %5618  ;;  %v5649_v37 = vpop.permute.xlu0 %5648 }
0x336f   :  { %v5652_v35 = vmul.f32 %v6813_v17, %v5619_v6  ;;  %v5658_v56 = vmul.f32 %v6815_v0, %v5649_v37  ;;  %v6820_v6 = vld [vmem:[#allocation2 + $0x30] sm:$0xff] }
0x3371   :  { %v5666_v54 = vsel %vm108_vm1, %v5652_v35, 0.0  ;;  %v5708_v45 = vsel %vm108_vm1, %v5658_v56, 0.0 }
0x3372   :  { %v5624_v8 = vpop.permute.xlu1 %5623  ;;  %v5667_v55 = vrot.slane %v5666_v54, 4  ;;  %v5709_v57 = vrot.slane %v5708_v45, 4 }
0x3373   :  { %v5653_v46 = vmul.f32 %v6814_v59, %v5624_v8 }
0x3374   :  { %v5668_v22 = vadd.f32 %v5667_v55, %v5666_v54  ;;  %v5710_v7 = vadd.f32 %v5709_v57, %v5708_v45 }
0x3375   :  { %v5673_v14 = vsel %vm108_vm1, %v5653_v46, 0.0 }
0x3376   :  { %v5614_v49 = vpop.permute.xlu1 %5613  ;;  %v5674_v3 = vrot.slane %v5673_v14, 4  ;;  %v5669_v43 = vrot.slane %v5668_v22, 2  ;;  %v5711_v61 = vrot.slane %v5710_v7, 2 }
0x3377   :  { %v5651_v40 = vmul.f32 %v6816_v47, %v5614_v49 }
0x3378   :  { %v5675_v31 = vadd.f32 %v5674_v3, %v5673_v14  ;;  %v5670_v13 = vadd.f32 %v5669_v43, %v5668_v22  ;;  %v5712_v8 = vadd.f32 %v5711_v61, %v5710_v7 }
0x3379   :  { %v5659_v23 = vsel %vm108_vm1, %v5651_v40, 0.0 }
0x337a   :  { %v5660_v5 = vrot.slane %v5659_v23, 4  ;;  %v5629_v24 = vpop.permute.xlu1 %5628  ;;  %v5676_v42 = vrot.slane %v5675_v31, 2  ;;  %v5671_v25 = vrot.slane %v5670_v13, 1  ;;  %v5713_v22 = vrot.slane %v5712_v8, 1 }
0x337b   :  { %v5654_v33 = vmul.f32 %v6817_v27, %v5629_v24 }
0x337c   :  { %v5661_v58 = vadd.f32 %v5660_v5, %v5659_v23  ;;  %v5677_v16 = vadd.f32 %v5676_v42, %v5675_v31  ;;  %v5672_v37 = vadd.f32 %v5671_v25, %v5670_v13 }
0x337d   :  { %v5680_v63 = vsel %vm108_vm1, %v5654_v33, 0.0 }
0x337e   :  { %v5681_v36 = vrot.slane %v5680_v63, 4  ;;  %v5634_v29 = vpop.permute.xlu1 %5633  ;;  %v5662_v1 = vrot.slane %v5661_v58, 2  ;;  %v5678_v35 = vrot.slane %v5677_v16, 1  ;;  %v5716_v23 = vmul.f32 %v5672_v37, %v7381_v34 }
0x337f   :  { %v5655_v39 = vmul.f32 %v6818_v20, %v5634_v29 }
0x3380   :  { %v5682_v9 = vadd.f32 %v5681_v36, %v5680_v63  ;;  %v5663_v11 = vadd.f32 %v5662_v1, %v5661_v58  ;;  %v5679_v47 = vadd.f32 %v5678_v35, %v5677_v16  ;;  %v5714_v63 = vadd.f32 %v5713_v22, %v5712_v8  ;;  %v5786_v22 = vld [vmem:[#allocation7 + $0x8] sm:$0xff] }
0x3381   :  { %v5687_v15 = vsel %vm108_vm1, %v5655_v39, 0.0  ;;  %v5731_v36 = vrot.slane %v5716_v23, 7 }
0x3382   :  { %v5683_v12 = vrot.slane %v5682_v9, 2  ;;  %v5688_v62 = vrot.slane %v5687_v15, 4  ;;  %v5639_v44 = vpop.permute.xlu1 %5638  ;;  %v5664_v21 = vrot.slane %v5663_v11, 1  ;;  %v5717_v58 = vmul.f32 %v5679_v47, %v7381_v34 }
0x3383   :  { %v5656_v18 = vmul.f32 %v6819_v52, %v5639_v44  ;;  %v5722_v52 = vmul.f32 %v5714_v63, %v7381_v34 }
0x3384   :  { %v5684_v60 = vadd.f32 %v5683_v12, %v5682_v9  ;;  %v5689_v50 = vadd.f32 %v5688_v62, %v5687_v15  ;;  %v5665_v0 = vadd.f32 %v5664_v21, %v5663_v11  ;;  %v5733_v13 = vrot.slane %v5717_v58, 6 }
0x3385   :  { %v5694_v41 = vsel %vm108_vm1, %v5656_v18, 0.0 }
0x3386   :  { %v5690_v4 = vrot.slane %v5689_v50, 2  ;;  %v5644_v10 = vpop.permute.xlu1 %5643  ;;  %v5685_v30 = vrot.slane %v5684_v60, 1  ;;  %v5695_v2 = vrot.slane %v5694_v41, 4  ;;  %v5715_v24 = vmul.f32 %v5665_v0, %v7381_v34 }
0x3387   :  { %v5657_v17 = vmul.f32 %v6820_v6, %v5644_v10  ;;  %v5801_v27 = vsel %vm966_vm3, %v5672_v37, %v5665_v0  ;;  %v5743_v10 = vrot.slane %v5722_v52, 1 }
0x3388   :  { %v5691_v54 = vadd.f32 %v5690_v4, %v5689_v50  ;;  %v5696_v59 = vadd.f32 %v5695_v2, %v5694_v41  ;;  %v5686_v56 = vadd.f32 %v5685_v30, %v5684_v60  ;;  %v5802_v1 = vsel %vm968_vm4, %v5679_v47, %v5801_v27 }
0x3389   :  { %v5701_v46 = vsel %vm108_vm1, %v5657_v17, 0.0  ;;  %v5732_v39 = vsel %vm966_vm3, %v5731_v36, %v5715_v24 }
0x338a   :  { %v5692_v55 = vrot.slane %v5691_v54, 1  ;;  %v5702_v14 = vrot.slane %v5701_v46, 4  ;;  %v5697_v49 = vrot.slane %v5696_v59, 2  ;;  %v5718_v33 = vmul.f32 %v5686_v56, %v7381_v34 }
0x338b   :  { %v5803_v9 = vsel %vm970_vm5, %v5686_v56, %v5802_v1  ;;  %v5734_v60 = vsel %vm968_vm4, %v5733_v13, %v5732_v39 }
0x338c   :  { %v5693_v40 = vadd.f32 %v5692_v55, %v5691_v54  ;;  %v5703_v3 = vadd.f32 %v5702_v14, %v5701_v46  ;;  %v5698_v45 = vadd.f32 %v5697_v49, %v5696_v59  ;;  %v5735_v42 = vrot.slane %v5718_v33, 5 }
0x338e   :  { %v5704_v5 = vrot.slane %v5703_v3, 2  ;;  %v5699_v31 = vrot.slane %v5698_v45, 1  ;;  %v5719_v57 = vmul.f32 %v5693_v40, %v7381_v34  ;;  %v5804_v12 = vsel %vm972_vm6, %v5693_v40, %v5803_v9 }
0x338f   :  { %v5736_v61 = vsel %vm970_vm5, %v5735_v42, %v5734_v60 }
0x3390   :  { %v5705_v43 = vadd.f32 %v5704_v5, %v5703_v3  ;;  %v5700_v29 = vadd.f32 %v5699_v31, %v5698_v45  ;;  %v5737_v15 = vrot.slane %v5719_v57, 4  ;;  %v5785_v3 = vld [vmem:[#allocation7] sm:$0xff] }
0x3391   :  { %v6446_v23 = vpack.c.bf16 %v5786_v22, %v5785_v3 }
0x3392   :  { %v5706_v20 = vrot.slane %v5705_v43, 1  ;;  %v5720_v7 = vmul.f32 %v5700_v29, %v7381_v34  ;;  %v5805_v11 = vsel %vm974_vm7, %v5700_v29, %v5804_v12  ;;  %v5738_v25 = vsel %vm972_vm6, %v5737_v15, %v5736_v61 }
0x3393   :  { %6447 = vmatpush3.bf16.msra.mxu1 %v6446_v23 }
0x3394   :  { %v5707_v62 = vadd.f32 %v5706_v20, %v5705_v43  ;;  %v5739_v44 = vrot.slane %v5720_v7, 3  ;;  %6448 = vmatprep.subr.bf16.mxu1 %v8548_v38  ;;  %v6821_v43 = vld [vmem:[%s8495_s5] sm:$0xff] }
0x3395   :  { %v5958_v38 = vrot.slane %v6821_v43, %v7324_v32  ;;  %v5963_v1 = vrot.slane %v6821_v43, %v7328_v19 }
0x3396   :  { %v5721_v18 = vmul.f32 %v5707_v62, %v7381_v34  ;;  %v5806_v16 = vsel %vm976_vm8, %v5707_v62, %v5805_v11  ;;  %v5740_v4 = vsel %vm974_vm7, %v5739_v44, %v5738_v25 }
0x3397   :  { %v5807_v50 = vsel %vm978_vm9, %v5714_v63, %v5806_v16 }
0x3398   :  { %6314 = vmatmul.mubr.msk.f32.vlgmr.msra.gmra.mrb[16].mxu0 %vm108_vm1, %v5807_v50  ;;  %v5741_v41 = vrot.slane %v5721_v18, 2 }
0x339a   :  { %v5742_v21 = vsel %vm976_vm8, %v5741_v41, %v5740_v4 }
0x339b   :  { %v5744_v34 = vsel %vm978_vm9, %v5743_v10, %v5742_v21 }
0x339c   :  { %v5746_v30 = vsel %vm108_vm1, %v5744_v34, 0.0 }
0x339d   :  { %5747 = vadd.xlane.f32.xlu1 %v5746_v30 }
0x342a   :  { %v5748_v2 = vpop.xlane.xlu1 %5747 }
0x342b   :  { %v5749_v6 = vadd.f32 %v5748_v2, %v7404_v48 }
0x342d   :  { %5752 = vperm.xlu0 %6468, %v5749_v6  }
0x3431   :  { %5757 = vrot.lane.b32.xlu0 %v8343_v51, %s6950_s10 }
0x3435   :  { %5767 = vrot.lane.b32.xlu0 %v8343_v51, %s6951_s11 }
0x346b   :  { %v5876_v17 = vpop.f32.mrb[16].mxu0 }
0x346c   :  { %v6315_v35 = vpop.f32.mrb[17].mxu0 }
0x34ac   :  { %v5753_v54 = vpop.permute.xlu0 %5752 }
0x34ad   :  { %v5755_v8 = vmul.f32 %v5753_v54, %v7411_v53  ;;  %v5787_v53 = vld [vmem:[#allocation7 + $0x10] sm:$0xff] }
0x34af   :  { %v5756_v37 = vadd.f32 %v5755_v8, %v7415_v28  ;;  %v5788_v28 = vld [vmem:[#allocation7 + $0x18] sm:$0xff] }
0x34b0   :  { %v5758_v59 = vpop.permute.xlu0 %5757  ;;  %v6449_v45 = vpack.c.bf16 %v5788_v28, %v5787_v53 }
0x34b1   :  { %v5760_v46 = vadd.f32 %v5758_v59, %v5756_v37 }
0x34b2   :  { %6450 = vmatpush3.bf16.msra.mxu1 %v6449_v45 }
0x34b3   :  { %v6036_v55 = vmul.f32 -1.442695, %v5760_v46 }
0x34b4   :  { %v5768_v49 = vpop.permute.xlu0 %5767 }
0x34b5   :  { %6783 = vpow2.f32 %v6036_v55 }
0x34bf   :  { %v6784_v14 = vpop.eup %6783 }
0x34c0   :  { %v5764_v0 = vadd.f32 1.0, %v6784_v14 }
0x34c2   :  { %6785 = vrcp.f32 %v5764_v0 }
0x34cc   :  { %v6786_v56 = vpop.eup %6785 }
0x34cd   :  { %v5770_v47 = vmul.f32 %v6786_v56, %v5768_v49  ;;  %v5777_v24 = vsub.f32 1.0, %v6786_v56  ;;  %v5783_v33 = vmul.f32 %v6786_v56, %v8335_v26 }
0x34cf   :  { %5772 = vrot.lane.b32.xlu0 %v5770_v47, %s6952_s3 }
0x3541   :  { %v5773_v51 = vpop.permute.xlu0 %5772 }
0x3542   :  { %v5775_v40 = vadd.f32 %v5773_v51, %v5756_v37 }
0x3544   :  { %6787 = vtanh.f32 %v5775_v40 }
0x354e   :  { %v6788_v5 = vpop.eup %6787 }
0x354f   :  { %5779 = vrot.lane.b32.xlu1 %v6788_v5, %s6950_s10 }
0x35c1   :  { %v5780_v27 = vpop.permute.xlu1 %5779 }
0x35c2   :  { %v5782_v31 = vmul.f32 %v5780_v27, %v5777_v24 }
0x35c4   :  { %v5784_v58 = vadd.f32 %v5783_v33, %v5782_v31 }
0x35c6   :  { %5881 = vrot.lane.b32.xlu0 %v5784_v58, %s6950_s10 }
0x3638   :  { %v5882_v57 = vpop.permute.xlu0 %5881 }
0x3639   :  { %6325 = vmatmul.mubr.msk.f32.vlgmr.msra.gmra.mrb[16].mxu1 %vm108_vm1, %v5882_v57 }
0x370c   :  { %v5951_v63 = vpop.f32.mrb[16].mxu1 }
0x370d   :  { %v5952_v36 = vadd.f32 %v5951_v63, %v5876_v17  ;;  %v6326_v29 = vpop.f32.mrb[17].mxu1 }
0x370f   :  { %v5959_v20 = vadd.f32 %v5958_v38, %v5952_v36 }
0x3711   :  { %v5964_v26 = vmul.f32 %v5963_v1, %v5959_v20 }
0x3713   :  { %v5965_v39 = vsel %vm108_vm1, %v5964_v26, 0.0 }
0x3714   :  { %5966 = vadd.xlane.f32.xlu0 %v5965_v39 }
0x37a1   :  { %v5967_v42 = vpop.xlane.xlu0 %5966 }
0x37a2   :  { %v5968_v9 = vadd.f32 %v5967_v42, %v7404_v48 }
0x37a4   :  { %5970 = vrot.lane.b32.xlu1 %v5968_v9, %s6953_s13 }
0x3816   :  { %v5971_v7 = vpop.permute.xlu1 %5970 }
0x3817   :  { %5974 = vst.msk [vmem:[%s8496_s6] sm:$0xff] %vm5973_vm11, %v5971_v7 }
0x3818   :  { %5979 = vsyncpa [#allocation3], 1 }
0x3819   :  { %5980 = vsyncpa [#allocation5], 1 }
0x381a   :  { %5981 = vsyncpa [#allocation8], 1 }

</bundles_post_ra>
